<compile_context>
chip_gen: v6e
topology: v6e:2x2x1
jax: 0.10.0
libtpu: 0.0.40
codegen_flags: <defaults>
</compile_context>

<pallas_src>
import functools

import jax
import jax.numpy as jnp
import numpy as np
from jax import lax
from jax.experimental import pallas as pl
from jax.experimental.pallas import tpu as pltpu

H = 28
W = 28
HW = H * W                 # 784 (lane-dense flat spatial length, unpadded)
HWP = 896                  # 7 * 128: lane-aligned width used only for pltpu.roll
KS = 3
NCLS = 10

# Non-center type-B taps of a 3x3 kernel as (flat roll shift, kh, kw).
# Spatial offset (dy, dx) = (kh-1, kw-1); shift = -(28*dy + dx).
ROLLED_TAPS = (
    (1, 1, 0),     # left       (0, -1)
    (27, 0, 2),    # top-right  (-1, +1)
    (28, 0, 1),    # top        (-1,  0)
    (29, 0, 0),    # top-left   (-1, -1)
)


def _tap_boundary_masks():
    """(4, 784) f32 masks reproducing the 3x3 conv's zero padding for the
    rolled taps (kill intra-row wraps and the row-0 wrap-around)."""
    idx = np.arange(HW)
    row, col = idx // W, idx % W
    m = np.zeros((len(ROLLED_TAPS), HW), np.float32)
    m[0] = (col >= 1)                      # shift 1  : left
    m[1] = (row >= 1) & (col <= W - 2)     # shift 27 : top-right
    m[2] = (row >= 1)                      # shift 28 : top
    m[3] = (row >= 1) & (col >= 1)         # shift 29 : top-left
    # Invariant the kernel relies on: for a tap of shift s, every output lane
    # i < s (which the roll fills with wrapped / scratch-tail data) is zeroed
    # by that tap's mask.  (The scratch tail is additionally zeroed in-kernel.)
    for (s, _, _), mask_row in zip(ROLLED_TAPS, m):
        assert not mask_row[:s].any()
    return m


def _kernel(x_ref, cc_ref, mask_ref, wh_ref, bh_ref,
            w0_ref, b0_ref, wm_ref, bm_ref, w2_ref, b2_ref,
            out_ref, wide_ref, *, C, Chalf, Cout):
    """One batch tile of BT images, spatial flattened to HW=784 lanes.

    x_ref   : VMEM (BT, C, 784)        flat input (unpadded)
    cc_ref  : VMEM (BT, 10)            class condition
    mask_ref: VMEM (4, 784)            per-tap boundary masks (ROLLED_TAPS order)
    wh_ref  : VMEM (10, 784)           h_func weight (k, flat)
    bh_ref  : VMEM (1, 784)            h_func bias
    w0/b0, wm/bm, w2/b2 : SMEM         flattened conv weights / biases
    out_ref : VMEM (BT, Cout, 784)
    wide_ref: VMEM scratch (BT, 896)   128-aligned staging plane for pltpu.roll
    """
    # Zero the roll staging buffer once (its 784..895 tail stays zero for the
    # whole step, so rolled-in tail data is exactly the conv's zero padding).
    wide_ref[...] = jnp.zeros(wide_ref.shape, wide_ref.dtype)

    # ---- net0: 1x1 conv + ReLU (scalar-weighted plane MACs on the VPU) ----
    h0 = []
    for oc in range(Chalf):
        acc = w0_ref[oc * C] * x_ref[:, 0, :]
        for ic in range(1, C):
            acc = acc + w0_ref[oc * C + ic] * x_ref[:, ic, :]
        h0.append(jnp.maximum(acc + b0_ref[oc], 0.0))          # (BT, 784)

    # ---- conditional plane on the MXU: vh = cc @ Wh + bh ----
    vh = jnp.dot(cc_ref[...], wh_ref[...],
                 preferred_element_type=jnp.float32) + bh_ref[...]   # (BT, 784)

    # ---- masked 3x3 conv (type B) via lane rolls + boundary masks ----
    # Mask rows hoisted out of the channel loops (JAX does not CSE broadcasts).
    mrows = [mask_ref[t:t + 1, :] for t in range(len(ROLLED_TAPS))]

    # TODO(synk): for Chalf >~ 16, restructure so channels sit on an MXU
    # contraction dim (stack the Chalf*5 rolled/masked taps and contract with a
    # (Chalf, Chalf*5) weight) instead of these unrolled VPU plane MACs.
    acc_mc = [vh + bm_ref[oc] for oc in range(Chalf)]
    for ic in range(Chalf):
        p = h0[ic]                                             # (BT, 784)
        # center tap (always in-image, no mask needed)
        for oc in range(Chalf):
            w_center = wm_ref[((oc * Chalf + ic) * KS + 1) * KS + 1]
            acc_mc[oc] = acc_mc[oc] + w_center * p
        # widen to 896 lanes so the roll stays on a 128-multiple lane axis
        wide_ref[:, :HW] = p
        p_wide = wide_ref[...]                                 # (BT, 896), tail = 0
        for t, (s, kh, kw) in enumerate(ROLLED_TAPS):
            tap = pltpu.roll(p_wide, s, 1)[:, :HW] * mrows[t]  # (BT, 784)
            for oc in range(Chalf):
                wv = wm_ref[((oc * Chalf + ic) * KS + kh) * KS + kw]
                acc_mc[oc] = acc_mc[oc] + wv * tap
    h1 = [jnp.maximum(a, 0.0) for a in acc_mc]

    # ---- net2: 1x1 conv + ReLU, then residual add ----
    for oc in range(Cout):
        acc = w2_ref[oc * Chalf] * h1[0]
        for ic in range(1, Chalf):
            acc = acc + w2_ref[oc * Chalf + ic] * h1[ic]
        out_ref[:, oc, :] = x_ref[:, oc, :] + jnp.maximum(acc + b2_ref[oc], 0.0)


def _pick_block_batch(B, C):
    """Batch tile: bounded by vreg pressure (masked-conv live set
    ~ (Chalf+2)*(BT/8)*7 vregs <= ~48), capped at 32, preferring an even grid
    length so the 'parallel' batch axis splits across both v7x TensorCores."""
    Chalf = max(C // 2, 1)
    vreg_cap = 8 * max(1, 48 // ((Chalf + 2) * 7))
    cap = max(8, min(32, vreg_cap))
    cands = [bt for bt in (32, 16, 8) if bt <= cap and B % bt == 0]
    for bt in cands:
        if (B // bt) % 2 == 0:
            return bt
    return cands[0]


def _vmem_guard(BT, C, Cout, budget_bytes=24 << 20):
    """Shrink BT until the double-buffered working set fits a conservative
    VMEM budget (v7x: 64 MiB physical, 32 MiB default scoped limit)."""
    def need(bt):
        blocks = bt * (C + Cout) * HW * 4 + bt * NCLS * 4        # x + out + cc
        consts = (len(ROLLED_TAPS) + NCLS + 1) * HW * 4          # masks + wh + bh
        scratch = bt * HWP * 4
        return 2 * (blocks + consts) + scratch
    while BT > 8 and need(BT) > budget_bytes:
        BT //= 2
    return BT


def residual_conditional_masked_conv(x, class_condition, params, *,
                                     block_batch=None, alias_input=False):
    """x: (B, C, 28, 28) f32, class_condition: (B, 10) f32."""
    B, C, h, w = x.shape
    assert (h, w) == (H, W), "ConditionalMaskedConv2d hard-codes 28x28 spatial"
    assert C >= 2 and C % 2 == 0
    # TODO(synk): support batches that are not a multiple of 8 (pad last tile).
    assert B % 8 == 0, "batch must be a multiple of 8 (sublane tiling)"
    Chalf = C // 2
    w0, b0, wm, bm = params["w0"], params["b0"], params["wm"], params["bm"]
    wh_lin, bh_lin = params["wh_lin"], params["bh_lin"]
    w2, b2 = params["w2"], params["b2"]
    Cout = w2.shape[0]
    assert Cout == C, "residual add requires output_num_dim == input_num_dim"

    BT = block_batch if block_batch is not None else _pick_block_batch(B, C)
    BT = _vmem_guard(BT, C, Cout)
    assert B % BT == 0 and BT % 8 == 0

    # ---- glue (reshapes only — no extra HBM passes over x / out) ----
    xf = x.reshape(B, C, HW)
    wh = wh_lin.T.reshape(NCLS, HW)                      # (10, 784)
    bh = bh_lin.reshape(1, HW)
    masks = jnp.asarray(_tap_boundary_masks())           # (4, 784)
    w0_flat = w0.reshape(Chalf * C)                      # [oc*C + ic]
    wm_flat = wm.reshape(Chalf * Chalf * KS * KS)        # [((oc*Ch+ic)*3+kh)*3+kw]
    w2_flat = w2.reshape(Cout * Chalf)                   # [oc*Chalf + ic]

    smem = functools.partial(pl.BlockSpec, memory_space=pltpu.MemorySpace.SMEM)
    kern = functools.partial(_kernel, C=C, Chalf=Chalf, Cout=Cout)

    out_flat = pl.pallas_call(
        kern,
        out_shape=jax.ShapeDtypeStruct((B, Cout, HW), jnp.float32),
        grid=(B // BT,),
        in_specs=[
            pl.BlockSpec((BT, C, HW), lambda b: (b, 0, 0)),          # x (flat)
            pl.BlockSpec((BT, NCLS), lambda b: (b, 0)),              # class cond
            pl.BlockSpec((len(ROLLED_TAPS), HW), lambda b: (0, 0)),  # tap masks
            pl.BlockSpec((NCLS, HW), lambda b: (0, 0)),              # h_func W
            pl.BlockSpec((1, HW), lambda b: (0, 0)),                 # h_func b
            smem((Chalf * C,), lambda b: (0,)),                      # w0
            smem((Chalf,), lambda b: (0,)),                          # b0
            smem((Chalf * Chalf * KS * KS,), lambda b: (0,)),        # wm (masked)
            smem((Chalf,), lambda b: (0,)),                          # bm
            smem((Cout * Chalf,), lambda b: (0,)),                   # w2
            smem((Cout,), lambda b: (0,)),                           # b2
        ],
        out_specs=pl.BlockSpec((BT, Cout, HW), lambda b: (b, 0, 0)),
        scratch_shapes=[pltpu.VMEM((BT, HWP), jnp.float32)],
        # x -> out buffer reuse only pays off when the caller donates x.
        input_output_aliases=({0: 0} if alias_input else {}),
        compiler_params=pltpu.CompilerParams(
            dimension_semantics=("parallel",)),
    )(xf, class_condition, masks, wh, bh, w0_flat, b0, wm_flat, bm, w2_flat, b2)

    return out_flat.reshape(B, Cout, H, W)


def reference(x, cc, params):
    """Pure-JAX reference of the PyTorch forward (NCHW)."""
    dn = ("NCHW", "OIHW", "NCHW")
    w0, b0, wm, bm = params["w0"], params["b0"], params["wm"], params["bm"]
    wh_lin, bh_lin = params["wh_lin"], params["bh_lin"]
    w2, b2 = params["w2"], params["b2"]

    h0 = lax.conv_general_dilated(x, w0.reshape(w0.shape[0], w0.shape[1], 1, 1),
                                  (1, 1), "VALID", dimension_numbers=dn)
    h0 = jax.nn.relu(h0 + b0[None, :, None, None])
    vh = (cc @ wh_lin.T + bh_lin).reshape(-1, 1, H, W)
    c = lax.conv_general_dilated(h0, wm, (1, 1), [(1, 1), (1, 1)],
                                 dimension_numbers=dn)
    c = c + bm[None, :, None, None] + vh
    h1 = jax.nn.relu(c)
    h2 = lax.conv_general_dilated(h1, w2.reshape(w2.shape[0], w2.shape[1], 1, 1),
                                  (1, 1), "VALID", dimension_numbers=dn)
    h2 = jax.nn.relu(h2 + b2[None, :, None, None])
    return x + h2


def make_params(key, C, Cout):
    Chalf = C // 2
    ks = jax.random.split(key, 8)
    w0 = jax.random.normal(ks[0], (Chalf, C), jnp.float32) * 0.3
    b0 = jax.random.normal(ks[1], (Chalf,), jnp.float32) * 0.1
    wm = jax.random.normal(ks[2], (Chalf, Chalf, KS, KS), jnp.float32) * 0.3
    bm = jax.random.normal(ks[3], (Chalf,), jnp.float32) * 0.1
    wh_lin = jax.random.normal(ks[4], (H * W, NCLS), jnp.float32) * 0.1
    bh_lin = jax.random.normal(ks[5], (H * W,), jnp.float32) * 0.1
    w2 = jax.random.normal(ks[6], (Cout, Chalf), jnp.float32) * 0.3
    b2 = jax.random.normal(ks[7], (Cout,), jnp.float32) * 0.1

    # Apply the type-B autoregressive mask to the 3x3 weight (as MaskedConv2d does).
    mask = np.ones((Chalf, Chalf, KS, KS), np.float32)
    mask[:, :, KS // 2 + 1:, :] = 0.0
    mask[:, :, KS // 2, KS // 2 + 1:] = 0.0
    wm = wm * jnp.asarray(mask)

    return dict(w0=w0, b0=b0, wm=wm, bm=bm, wh_lin=wh_lin, bh_lin=bh_lin,
                w2=w2, b2=b2)


if __name__ == "__main__":
    B, C = 16, 4                    # input_num_dim = output_num_dim = 4
    key = jax.random.PRNGKey(0)
    kx, kc, kp = jax.random.split(key, 3)
    x = jax.random.normal(kx, (B, C, H, W), jnp.float32)
    class_condition = jax.random.normal(kc, (B, NCLS), jnp.float32)
    params = make_params(kp, C, C)

    fwd = jax.jit(lambda xi, ci: residual_conditional_masked_conv(xi, ci, params))
    out = jax.block_until_ready(fwd(x, class_condition))

    ref = jax.block_until_ready(reference(x, class_condition, params))
    # The class-conditional term runs as an MXU dot; depending on the backend's
    # default f32 matmul precision this can differ from the XLA reference by up
    # to ~1e-3 absolute, hence the slightly relaxed tolerance.
    np.testing.assert_allclose(np.asarray(out), np.asarray(ref),
                               rtol=5e-3, atol=5e-3)
    print("KERNEL_OK")
</pallas_src>

<mosaic_0001>
module attributes {stable_mosaic.version = 11 : i64} {
  func.func @_kernel(%arg0: i32, %arg1: memref<8x4x784xf32, #tpu.memory_space<vmem>>, %arg2: memref<8x10xf32, #tpu.memory_space<vmem>>, %arg3: memref<4x784xf32, #tpu.memory_space<vmem>>, %arg4: memref<10x784xf32, #tpu.memory_space<vmem>>, %arg5: memref<1x784xf32, #tpu.memory_space<vmem>>, %arg6: memref<8xf32, #tpu.memory_space<smem>>, %arg7: memref<2xf32, #tpu.memory_space<smem>>, %arg8: memref<36xf32, #tpu.memory_space<smem>>, %arg9: memref<2xf32, #tpu.memory_space<smem>>, %arg10: memref<8xf32, #tpu.memory_space<smem>>, %arg11: memref<4xf32, #tpu.memory_space<smem>>, %arg12: memref<8x4x784xf32, #tpu.memory_space<vmem>>, %arg13: memref<8x896xf32, #tpu.memory_space<vmem>>) attributes {dimension_semantics = [#tpu.dimension_semantics<parallel>], iteration_bounds = array<i64: 2>, scalar_prefetch = 0 : i64, scratch_operands = 1 : i64, tpu.core_type = #tpu.core_type<tc>, window_params = [{transform_indices = @transform_0, window_bounds = array<i64: 8, 4, 784>}, {transform_indices = @transform_1, window_bounds = array<i64: 8, 10>}, {pipeline_mode = #tpu.pipeline_mode<synchronous>, transform_indices = @transform_2, window_bounds = array<i64: 4, 784>}, {pipeline_mode = #tpu.pipeline_mode<synchronous>, transform_indices = @transform_3, window_bounds = array<i64: 10, 784>}, {pipeline_mode = #tpu.pipeline_mode<synchronous>, transform_indices = @transform_4, window_bounds = array<i64: 1, 784>}, {transform_indices = @transform_5, window_bounds = array<i64: 8>}, {transform_indices = @transform_6, window_bounds = array<i64: 2>}, {transform_indices = @transform_7, window_bounds = array<i64: 36>}, {transform_indices = @transform_8, window_bounds = array<i64: 2>}, {transform_indices = @transform_9, window_bounds = array<i64: 8>}, {transform_indices = @transform_10, window_bounds = array<i64: 4>}, {transform_indices = @transform_11, window_bounds = array<i64: 8, 4, 784>}]} {
    %cst = arith.constant 0.000000e+00 : f32
    %0 = vector.broadcast %cst : f32 to vector<8x896xf32>
    %c0 = arith.constant 0 : index
    %c0_0 = arith.constant 0 : index
    %1 = vector.load %arg13[%c0, %c0_0] : memref<8x896xf32, #tpu.memory_space<vmem>>, vector<8x896xf32>
    tpu.vector_store %arg13[%c0, %c0_0], %0 {strides = array<i32>} : memref<8x896xf32, #tpu.memory_space<vmem>>, vector<8x896xf32>,
    %c0_1 = arith.constant 0 : index
    %2 = memref.load %arg6[%c0_1] : memref<8xf32, #tpu.memory_space<smem>>
    %c0_2 = arith.constant 0 : index
    %c0_3 = arith.constant 0 : index
    %c0_4 = arith.constant 0 : index
    %3 = vector.load %arg1[%c0_2, %c0_3, %c0_4] : memref<8x4x784xf32, #tpu.memory_space<vmem>>, vector<8x1x784xf32>
    %4 = vector.shape_cast %3 : vector<8x1x784xf32> to vector<8x784xf32>
    %5 = vector.broadcast %2 : f32 to vector<8x784xf32>
    %6 = arith.mulf %5, %4 : vector<8x784xf32>
    %c1 = arith.constant 1 : index
    %7 = memref.load %arg6[%c1] : memref<8xf32, #tpu.memory_space<smem>>
    %c0_5 = arith.constant 0 : index
    %c1_6 = arith.constant 1 : index
    %c0_7 = arith.constant 0 : index
    %8 = vector.load %arg1[%c0_5, %c1_6, %c0_7] : memref<8x4x784xf32, #tpu.memory_space<vmem>>, vector<8x1x784xf32>
    %9 = vector.shape_cast %8 : vector<8x1x784xf32> to vector<8x784xf32>
    %10 = vector.broadcast %7 : f32 to vector<8x784xf32>
    %11 = arith.mulf %10, %9 : vector<8x784xf32>
    %12 = arith.addf %6, %11 : vector<8x784xf32>
    %c2 = arith.constant 2 : index
    %13 = memref.load %arg6[%c2] : memref<8xf32, #tpu.memory_space<smem>>
    %c0_8 = arith.constant 0 : index
    %c2_9 = arith.constant 2 : index
    %c0_10 = arith.constant 0 : index
    %14 = vector.load %arg1[%c0_8, %c2_9, %c0_10] : memref<8x4x784xf32, #tpu.memory_space<vmem>>, vector<8x1x784xf32>
    %15 = vector.shape_cast %14 : vector<8x1x784xf32> to vector<8x784xf32>
    %16 = vector.broadcast %13 : f32 to vector<8x784xf32>
    %17 = arith.mulf %16, %15 : vector<8x784xf32>
    %18 = arith.addf %12, %17 : vector<8x784xf32>
    %c3 = arith.constant 3 : index
    %19 = memref.load %arg6[%c3] : memref<8xf32, #tpu.memory_space<smem>>
    %c0_11 = arith.constant 0 : index
    %c3_12 = arith.constant 3 : index
    %c0_13 = arith.constant 0 : index
    %20 = vector.load %arg1[%c0_11, %c3_12, %c0_13] : memref<8x4x784xf32, #tpu.memory_space<vmem>>, vector<8x1x784xf32>
    %21 = vector.shape_cast %20 : vector<8x1x784xf32> to vector<8x784xf32>
    %22 = vector.broadcast %19 : f32 to vector<8x784xf32>
    %23 = arith.mulf %22, %21 : vector<8x784xf32>
    %24 = arith.addf %18, %23 : vector<8x784xf32>
    %c0_14 = arith.constant 0 : index
    %25 = memref.load %arg7[%c0_14] : memref<2xf32, #tpu.memory_space<smem>>
    %26 = vector.broadcast %25 : f32 to vector<8x784xf32>
    %27 = arith.addf %24, %26 : vector<8x784xf32>
    %cst_15 = arith.constant 0.000000e+00 : f32
    %28 = vector.broadcast %cst_15 : f32 to vector<8x784xf32>
    %29 = arith.maximumf %27, %28 : vector<8x784xf32>
    %c4 = arith.constant 4 : index
    %30 = memref.load %arg6[%c4] : memref<8xf32, #tpu.memory_space<smem>>
    %c0_16 = arith.constant 0 : index
    %c0_17 = arith.constant 0 : index
    %c0_18 = arith.constant 0 : index
    %31 = vector.load %arg1[%c0_16, %c0_17, %c0_18] : memref<8x4x784xf32, #tpu.memory_space<vmem>>, vector<8x1x784xf32>
    %32 = vector.shape_cast %31 : vector<8x1x784xf32> to vector<8x784xf32>
    %33 = vector.broadcast %30 : f32 to vector<8x784xf32>
    %34 = arith.mulf %33, %32 : vector<8x784xf32>
    %c5 = arith.constant 5 : index
    %35 = memref.load %arg6[%c5] : memref<8xf32, #tpu.memory_space<smem>>
    %c0_19 = arith.constant 0 : index
    %c1_20 = arith.constant 1 : index
    %c0_21 = arith.constant 0 : index
    %36 = vector.load %arg1[%c0_19, %c1_20, %c0_21] : memref<8x4x784xf32, #tpu.memory_space<vmem>>, vector<8x1x784xf32>
    %37 = vector.shape_cast %36 : vector<8x1x784xf32> to vector<8x784xf32>
    %38 = vector.broadcast %35 : f32 to vector<8x784xf32>
    %39 = arith.mulf %38, %37 : vector<8x784xf32>
    %40 = arith.addf %34, %39 : vector<8x784xf32>
    %c6 = arith.constant 6 : index
    %41 = memref.load %arg6[%c6] : memref<8xf32, #tpu.memory_space<smem>>
    %c0_22 = arith.constant 0 : index
    %c2_23 = arith.constant 2 : index
    %c0_24 = arith.constant 0 : index
    %42 = vector.load %arg1[%c0_22, %c2_23, %c0_24] : memref<8x4x784xf32, #tpu.memory_space<vmem>>, vector<8x1x784xf32>
    %43 = vector.shape_cast %42 : vector<8x1x784xf32> to vector<8x784xf32>
    %44 = vector.broadcast %41 : f32 to vector<8x784xf32>
    %45 = arith.mulf %44, %43 : vector<8x784xf32>
    %46 = arith.addf %40, %45 : vector<8x784xf32>
    %c7 = arith.constant 7 : index
    %47 = memref.load %arg6[%c7] : memref<8xf32, #tpu.memory_space<smem>>
    %c0_25 = arith.constant 0 : index
    %c3_26 = arith.constant 3 : index
    %c0_27 = arith.constant 0 : index
    %48 = vector.load %arg1[%c0_25, %c3_26, %c0_27] : memref<8x4x784xf32, #tpu.memory_space<vmem>>, vector<8x1x784xf32>
    %49 = vector.shape_cast %48 : vector<8x1x784xf32> to vector<8x784xf32>
    %50 = vector.broadcast %47 : f32 to vector<8x784xf32>
    %51 = arith.mulf %50, %49 : vector<8x784xf32>
    %52 = arith.addf %46, %51 : vector<8x784xf32>
    %c1_28 = arith.constant 1 : index
    %53 = memref.load %arg7[%c1_28] : memref<2xf32, #tpu.memory_space<smem>>
    %54 = vector.broadcast %53 : f32 to vector<8x784xf32>
    %55 = arith.addf %52, %54 : vector<8x784xf32>
    %cst_29 = arith.constant 0.000000e+00 : f32
    %56 = vector.broadcast %cst_29 : f32 to vector<8x784xf32>
    %57 = arith.maximumf %55, %56 : vector<8x784xf32>
    %c0_30 = arith.constant 0 : index
    %c0_31 = arith.constant 0 : index
    %58 = vector.load %arg2[%c0_30, %c0_31] : memref<8x10xf32, #tpu.memory_space<vmem>>, vector<8x10xf32>
    %c0_32 = arith.constant 0 : index
    %c0_33 = arith.constant 0 : index
    %59 = vector.load %arg4[%c0_32, %c0_33] : memref<10x784xf32, #tpu.memory_space<vmem>>, vector<10x784xf32>
    %cst_34 = arith.constant dense<0.000000e+00> : vector<8x784xf32>
    %60 = tpu.matmul %58, %59, %cst_34 {dimension_numbers = #tpu.dot_dimension_numbers<[1], [0], [0], [1], [0, 0, 1, 1], [], []>} : vector<8x10xf32>, vector<10x784xf32>, vector<8x784xf32> -> vector<8x784xf32>
    %c0_35 = arith.constant 0 : index
    %c0_36 = arith.constant 0 : index
    %61 = vector.load %arg5[%c0_35, %c0_36] : memref<1x784xf32, #tpu.memory_space<vmem>>, vector<1x784xf32>
    %62 = vector.broadcast %61 : vector<1x784xf32> to vector<8x784xf32>
    %63 = arith.addf %60, %62 : vector<8x784xf32>
    %c0_37 = arith.constant 0 : index
    %c0_38 = arith.constant 0 : index
    %64 = vector.load %arg3[%c0_37, %c0_38] : memref<4x784xf32, #tpu.memory_space<vmem>>, vector<1x784xf32>
    %c1_39 = arith.constant 1 : index
    %c0_40 = arith.constant 0 : index
    %65 = vector.load %arg3[%c1_39, %c0_40] : memref<4x784xf32, #tpu.memory_space<vmem>>, vector<1x784xf32>
    %c2_41 = arith.constant 2 : index
    %c0_42 = arith.constant 0 : index
    %66 = vector.load %arg3[%c2_41, %c0_42] : memref<4x784xf32, #tpu.memory_space<vmem>>, vector<1x784xf32>
    %c3_43 = arith.constant 3 : index
    %c0_44 = arith.constant 0 : index
    %67 = vector.load %arg3[%c3_43, %c0_44] : memref<4x784xf32, #tpu.memory_space<vmem>>, vector<1x784xf32>
    %c0_45 = arith.constant 0 : index
    %68 = memref.load %arg9[%c0_45] : memref<2xf32, #tpu.memory_space<smem>>
    %69 = vector.broadcast %68 : f32 to vector<8x784xf32>
    %70 = arith.addf %63, %69 : vector<8x784xf32>
    %c1_46 = arith.constant 1 : index
    %71 = memref.load %arg9[%c1_46] : memref<2xf32, #tpu.memory_space<smem>>
    %72 = vector.broadcast %71 : f32 to vector<8x784xf32>
    %73 = arith.addf %63, %72 : vector<8x784xf32>
    %c4_47 = arith.constant 4 : index
    %74 = memref.load %arg8[%c4_47] : memref<36xf32, #tpu.memory_space<smem>>
    %75 = vector.broadcast %74 : f32 to vector<8x784xf32>
    %76 = arith.mulf %75, %29 : vector<8x784xf32>
    %77 = arith.addf %70, %76 : vector<8x784xf32>
    %c22 = arith.constant 22 : index
    %78 = memref.load %arg8[%c22] : memref<36xf32, #tpu.memory_space<smem>>
    %79 = vector.broadcast %78 : f32 to vector<8x784xf32>
    %80 = arith.mulf %79, %29 : vector<8x784xf32>
    %81 = arith.addf %73, %80 : vector<8x784xf32>
    %c0_48 = arith.constant 0 : index
    %c0_49 = arith.constant 0 : index
    %82 = vector.load %arg13[%c0_48, %c0_49] : memref<8x896xf32, #tpu.memory_space<vmem>>, vector<8x784xf32>
    tpu.vector_store %arg13[%c0_48, %c0_49], %29 {strides = array<i32>} : memref<8x896xf32, #tpu.memory_space<vmem>>, vector<8x784xf32>,
    %c0_50 = arith.constant 0 : index
    %c0_51 = arith.constant 0 : index
    %83 = vector.load %arg13[%c0_50, %c0_51] : memref<8x896xf32, #tpu.memory_space<vmem>>, vector<8x896xf32>
    %c1_i32 = arith.constant 1 : i32
    %84 = tpu.dynamic_rotate %83 by %c1_i32 dim 1 : vector<8x896xf32>, i32 -> vector<8x896xf32>
    %85 = vector.extract_strided_slice %84 {offsets = [0, 0], sizes = [8, 784], strides = [1, 1]} : vector<8x896xf32> to vector<8x784xf32>
    %86 = vector.broadcast %64 : vector<1x784xf32> to vector<8x784xf32>
    %87 = arith.mulf %85, %86 : vector<8x784xf32>
    %c3_52 = arith.constant 3 : index
    %88 = memref.load %arg8[%c3_52] : memref<36xf32, #tpu.memory_space<smem>>
    %89 = vector.broadcast %88 : f32 to vector<8x784xf32>
    %90 = arith.mulf %89, %87 : vector<8x784xf32>
    %91 = arith.addf %77, %90 : vector<8x784xf32>
    %c21 = arith.constant 21 : index
    %92 = memref.load %arg8[%c21] : memref<36xf32, #tpu.memory_space<smem>>
    %93 = vector.broadcast %92 : f32 to vector<8x784xf32>
    %94 = arith.mulf %93, %87 : vector<8x784xf32>
    %95 = arith.addf %81, %94 : vector<8x784xf32>
    %c27_i32 = arith.constant 27 : i32
    %96 = tpu.dynamic_rotate %83 by %c27_i32 dim 1 : vector<8x896xf32>, i32 -> vector<8x896xf32>
    %97 = vector.extract_strided_slice %96 {offsets = [0, 0], sizes = [8, 784], strides = [1, 1]} : vector<8x896xf32> to vector<8x784xf32>
    %98 = vector.broadcast %65 : vector<1x784xf32> to vector<8x784xf32>
    %99 = arith.mulf %97, %98 : vector<8x784xf32>
    %c2_53 = arith.constant 2 : index
    %100 = memref.load %arg8[%c2_53] : memref<36xf32, #tpu.memory_space<smem>>
    %101 = vector.broadcast %100 : f32 to vector<8x784xf32>
    %102 = arith.mulf %101, %99 : vector<8x784xf32>
    %103 = arith.addf %91, %102 : vector<8x784xf32>
    %c20 = arith.constant 20 : index
    %104 = memref.load %arg8[%c20] : memref<36xf32, #tpu.memory_space<smem>>
    %105 = vector.broadcast %104 : f32 to vector<8x784xf32>
    %106 = arith.mulf %105, %99 : vector<8x784xf32>
    %107 = arith.addf %95, %106 : vector<8x784xf32>
    %c28_i32 = arith.constant 28 : i32
    %108 = tpu.dynamic_rotate %83 by %c28_i32 dim 1 : vector<8x896xf32>, i32 -> vector<8x896xf32>
    %109 = vector.extract_strided_slice %108 {offsets = [0, 0], sizes = [8, 784], strides = [1, 1]} : vector<8x896xf32> to vector<8x784xf32>
    %110 = vector.broadcast %66 : vector<1x784xf32> to vector<8x784xf32>
    %111 = arith.mulf %109, %110 : vector<8x784xf32>
    %c1_54 = arith.constant 1 : index
    %112 = memref.load %arg8[%c1_54] : memref<36xf32, #tpu.memory_space<smem>>
    %113 = vector.broadcast %112 : f32 to vector<8x784xf32>
    %114 = arith.mulf %113, %111 : vector<8x784xf32>
    %115 = arith.addf %103, %114 : vector<8x784xf32>
    %c19 = arith.constant 19 : index
    %116 = memref.load %arg8[%c19] : memref<36xf32, #tpu.memory_space<smem>>
    %117 = vector.broadcast %116 : f32 to vector<8x784xf32>
    %118 = arith.mulf %117, %111 : vector<8x784xf32>
    %119 = arith.addf %107, %118 : vector<8x784xf32>
    %c29_i32 = arith.constant 29 : i32
    %120 = tpu.dynamic_rotate %83 by %c29_i32 dim 1 : vector<8x896xf32>, i32 -> vector<8x896xf32>
    %121 = vector.extract_strided_slice %120 {offsets = [0, 0], sizes = [8, 784], strides = [1, 1]} : vector<8x896xf32> to vector<8x784xf32>
    %122 = vector.broadcast %67 : vector<1x784xf32> to vector<8x784xf32>
    %123 = arith.mulf %121, %122 : vector<8x784xf32>
    %c0_55 = arith.constant 0 : index
    %124 = memref.load %arg8[%c0_55] : memref<36xf32, #tpu.memory_space<smem>>
    %125 = vector.broadcast %124 : f32 to vector<8x784xf32>
    %126 = arith.mulf %125, %123 : vector<8x784xf32>
    %127 = arith.addf %115, %126 : vector<8x784xf32>
    %c18 = arith.constant 18 : index
    %128 = memref.load %arg8[%c18] : memref<36xf32, #tpu.memory_space<smem>>
    %129 = vector.broadcast %128 : f32 to vector<8x784xf32>
    %130 = arith.mulf %129, %123 : vector<8x784xf32>
    %131 = arith.addf %119, %130 : vector<8x784xf32>
    %c13 = arith.constant 13 : index
    %132 = memref.load %arg8[%c13] : memref<36xf32, #tpu.memory_space<smem>>
    %133 = vector.broadcast %132 : f32 to vector<8x784xf32>
    %134 = arith.mulf %133, %57 : vector<8x784xf32>
    %135 = arith.addf %127, %134 : vector<8x784xf32>
    %c31 = arith.constant 31 : index
    %136 = memref.load %arg8[%c31] : memref<36xf32, #tpu.memory_space<smem>>
    %137 = vector.broadcast %136 : f32 to vector<8x784xf32>
    %138 = arith.mulf %137, %57 : vector<8x784xf32>
    %139 = arith.addf %131, %138 : vector<8x784xf32>
    %c0_56 = arith.constant 0 : index
    %c0_57 = arith.constant 0 : index
    %140 = vector.load %arg13[%c0_56, %c0_57] : memref<8x896xf32, #tpu.memory_space<vmem>>, vector<8x784xf32>
    tpu.vector_store %arg13[%c0_56, %c0_57], %57 {strides = array<i32>} : memref<8x896xf32, #tpu.memory_space<vmem>>, vector<8x784xf32>,
    %c0_58 = arith.constant 0 : index
    %c0_59 = arith.constant 0 : index
    %141 = vector.load %arg13[%c0_58, %c0_59] : memref<8x896xf32, #tpu.memory_space<vmem>>, vector<8x896xf32>
    %c1_i32_60 = arith.constant 1 : i32
    %142 = tpu.dynamic_rotate %141 by %c1_i32_60 dim 1 : vector<8x896xf32>, i32 -> vector<8x896xf32>
    %143 = vector.extract_strided_slice %142 {offsets = [0, 0], sizes = [8, 784], strides = [1, 1]} : vector<8x896xf32> to vector<8x784xf32>
    %144 = vector.broadcast %64 : vector<1x784xf32> to vector<8x784xf32>
    %145 = arith.mulf %143, %144 : vector<8x784xf32>
    %c12 = arith.constant 12 : index
    %146 = memref.load %arg8[%c12] : memref<36xf32, #tpu.memory_space<smem>>
    %147 = vector.broadcast %146 : f32 to vector<8x784xf32>
    %148 = arith.mulf %147, %145 : vector<8x784xf32>
    %149 = arith.addf %135, %148 : vector<8x784xf32>
    %c30 = arith.constant 30 : index
    %150 = memref.load %arg8[%c30] : memref<36xf32, #tpu.memory_space<smem>>
    %151 = vector.broadcast %150 : f32 to vector<8x784xf32>
    %152 = arith.mulf %151, %145 : vector<8x784xf32>
    %153 = arith.addf %139, %152 : vector<8x784xf32>
    %c27_i32_61 = arith.constant 27 : i32
    %154 = tpu.dynamic_rotate %141 by %c27_i32_61 dim 1 : vector<8x896xf32>, i32 -> vector<8x896xf32>
    %155 = vector.extract_strided_slice %154 {offsets = [0, 0], sizes = [8, 784], strides = [1, 1]} : vector<8x896xf32> to vector<8x784xf32>
    %156 = vector.broadcast %65 : vector<1x784xf32> to vector<8x784xf32>
    %157 = arith.mulf %155, %156 : vector<8x784xf32>
    %c11 = arith.constant 11 : index
    %158 = memref.load %arg8[%c11] : memref<36xf32, #tpu.memory_space<smem>>
    %159 = vector.broadcast %158 : f32 to vector<8x784xf32>
    %160 = arith.mulf %159, %157 : vector<8x784xf32>
    %161 = arith.addf %149, %160 : vector<8x784xf32>
    %c29 = arith.constant 29 : index
    %162 = memref.load %arg8[%c29] : memref<36xf32, #tpu.memory_space<smem>>
    %163 = vector.broadcast %162 : f32 to vector<8x784xf32>
    %164 = arith.mulf %163, %157 : vector<8x784xf32>
    %165 = arith.addf %153, %164 : vector<8x784xf32>
    %c28_i32_62 = arith.constant 28 : i32
    %166 = tpu.dynamic_rotate %141 by %c28_i32_62 dim 1 : vector<8x896xf32>, i32 -> vector<8x896xf32>
    %167 = vector.extract_strided_slice %166 {offsets = [0, 0], sizes = [8, 784], strides = [1, 1]} : vector<8x896xf32> to vector<8x784xf32>
    %168 = vector.broadcast %66 : vector<1x784xf32> to vector<8x784xf32>
    %169 = arith.mulf %167, %168 : vector<8x784xf32>
    %c10 = arith.constant 10 : index
    %170 = memref.load %arg8[%c10] : memref<36xf32, #tpu.memory_space<smem>>
    %171 = vector.broadcast %170 : f32 to vector<8x784xf32>
    %172 = arith.mulf %171, %169 : vector<8x784xf32>
    %173 = arith.addf %161, %172 : vector<8x784xf32>
    %c28 = arith.constant 28 : index
    %174 = memref.load %arg8[%c28] : memref<36xf32, #tpu.memory_space<smem>>
    %175 = vector.broadcast %174 : f32 to vector<8x784xf32>
    %176 = arith.mulf %175, %169 : vector<8x784xf32>
    %177 = arith.addf %165, %176 : vector<8x784xf32>
    %c29_i32_63 = arith.constant 29 : i32
    %178 = tpu.dynamic_rotate %141 by %c29_i32_63 dim 1 : vector<8x896xf32>, i32 -> vector<8x896xf32>
    %179 = vector.extract_strided_slice %178 {offsets = [0, 0], sizes = [8, 784], strides = [1, 1]} : vector<8x896xf32> to vector<8x784xf32>
    %180 = vector.broadcast %67 : vector<1x784xf32> to vector<8x784xf32>
    %181 = arith.mulf %179, %180 : vector<8x784xf32>
    %c9 = arith.constant 9 : index
    %182 = memref.load %arg8[%c9] : memref<36xf32, #tpu.memory_space<smem>>
    %183 = vector.broadcast %182 : f32 to vector<8x784xf32>
    %184 = arith.mulf %183, %181 : vector<8x784xf32>
    %185 = arith.addf %173, %184 : vector<8x784xf32>
    %c27 = arith.constant 27 : index
    %186 = memref.load %arg8[%c27] : memref<36xf32, #tpu.memory_space<smem>>
    %187 = vector.broadcast %186 : f32 to vector<8x784xf32>
    %188 = arith.mulf %187, %181 : vector<8x784xf32>
    %189 = arith.addf %177, %188 : vector<8x784xf32>
    %cst_64 = arith.constant 0.000000e+00 : f32
    %190 = vector.broadcast %cst_64 : f32 to vector<8x784xf32>
    %191 = arith.maximumf %185, %190 : vector<8x784xf32>
    %cst_65 = arith.constant 0.000000e+00 : f32
    %192 = vector.broadcast %cst_65 : f32 to vector<8x784xf32>
    %193 = arith.maximumf %189, %192 : vector<8x784xf32>
    %c0_66 = arith.constant 0 : index
    %194 = memref.load %arg10[%c0_66] : memref<8xf32, #tpu.memory_space<smem>>
    %195 = vector.broadcast %194 : f32 to vector<8x784xf32>
    %196 = arith.mulf %195, %191 : vector<8x784xf32>
    %c1_67 = arith.constant 1 : index
    %197 = memref.load %arg10[%c1_67] : memref<8xf32, #tpu.memory_space<smem>>
    %198 = vector.broadcast %197 : f32 to vector<8x784xf32>
    %199 = arith.mulf %198, %193 : vector<8x784xf32>
    %200 = arith.addf %196, %199 : vector<8x784xf32>
    %c0_68 = arith.constant 0 : index
    %c0_69 = arith.constant 0 : index
    %c0_70 = arith.constant 0 : index
    %201 = vector.load %arg1[%c0_68, %c0_69, %c0_70] : memref<8x4x784xf32, #tpu.memory_space<vmem>>, vector<8x1x784xf32>
    %202 = vector.shape_cast %201 : vector<8x1x784xf32> to vector<8x784xf32>
    %c0_71 = arith.constant 0 : index
    %203 = memref.load %arg11[%c0_71] : memref<4xf32, #tpu.memory_space<smem>>
    %204 = vector.broadcast %203 : f32 to vector<8x784xf32>
    %205 = arith.addf %200, %204 : vector<8x784xf32>
    %cst_72 = arith.constant 0.000000e+00 : f32
    %206 = vector.broadcast %cst_72 : f32 to vector<8x784xf32>
    %207 = arith.maximumf %205, %206 : vector<8x784xf32>
    %208 = arith.addf %202, %207 : vector<8x784xf32>
    %c0_73 = arith.constant 0 : index
    %c0_74 = arith.constant 0 : index
    %c0_75 = arith.constant 0 : index
    %209 = vector.load %arg12[%c0_73, %c0_74, %c0_75] : memref<8x4x784xf32, #tpu.memory_space<vmem>>, vector<8x1x784xf32>
    %210 = vector.shape_cast %209 : vector<8x1x784xf32> to vector<8x784xf32>
    %211 = vector.shape_cast %208 : vector<8x784xf32> to vector<8x1x784xf32>
    tpu.vector_store %arg12[%c0_73, %c0_74, %c0_75], %211 {strides = array<i32>} : memref<8x4x784xf32, #tpu.memory_space<vmem>>, vector<8x1x784xf32>,
    %c2_76 = arith.constant 2 : index
    %212 = memref.load %arg10[%c2_76] : memref<8xf32, #tpu.memory_space<smem>>
    %213 = vector.broadcast %212 : f32 to vector<8x784xf32>
    %214 = arith.mulf %213, %191 : vector<8x784xf32>
    %c3_77 = arith.constant 3 : index
    %215 = memref.load %arg10[%c3_77] : memref<8xf32, #tpu.memory_space<smem>>
    %216 = vector.broadcast %215 : f32 to vector<8x784xf32>
    %217 = arith.mulf %216, %193 : vector<8x784xf32>
    %218 = arith.addf %214, %217 : vector<8x784xf32>
    %c0_78 = arith.constant 0 : index
    %c1_79 = arith.constant 1 : index
    %c0_80 = arith.constant 0 : index
    %219 = vector.load %arg1[%c0_78, %c1_79, %c0_80] : memref<8x4x784xf32, #tpu.memory_space<vmem>>, vector<8x1x784xf32>
    %220 = vector.shape_cast %219 : vector<8x1x784xf32> to vector<8x784xf32>
    %c1_81 = arith.constant 1 : index
    %221 = memref.load %arg11[%c1_81] : memref<4xf32, #tpu.memory_space<smem>>
    %222 = vector.broadcast %221 : f32 to vector<8x784xf32>
    %223 = arith.addf %218, %222 : vector<8x784xf32>
    %cst_82 = arith.constant 0.000000e+00 : f32
    %224 = vector.broadcast %cst_82 : f32 to vector<8x784xf32>
    %225 = arith.maximumf %223, %224 : vector<8x784xf32>
    %226 = arith.addf %220, %225 : vector<8x784xf32>
    %c0_83 = arith.constant 0 : index
    %c1_84 = arith.constant 1 : index
    %c0_85 = arith.constant 0 : index
    %227 = vector.load %arg12[%c0_83, %c1_84, %c0_85] : memref<8x4x784xf32, #tpu.memory_space<vmem>>, vector<8x1x784xf32>
    %228 = vector.shape_cast %227 : vector<8x1x784xf32> to vector<8x784xf32>
    %229 = vector.shape_cast %226 : vector<8x784xf32> to vector<8x1x784xf32>
    tpu.vector_store %arg12[%c0_83, %c1_84, %c0_85], %229 {strides = array<i32>} : memref<8x4x784xf32, #tpu.memory_space<vmem>>, vector<8x1x784xf32>,
    %c4_86 = arith.constant 4 : index
    %230 = memref.load %arg10[%c4_86] : memref<8xf32, #tpu.memory_space<smem>>
    %231 = vector.broadcast %230 : f32 to vector<8x784xf32>
    %232 = arith.mulf %231, %191 : vector<8x784xf32>
    %c5_87 = arith.constant 5 : index
    %233 = memref.load %arg10[%c5_87] : memref<8xf32, #tpu.memory_space<smem>>
    %234 = vector.broadcast %233 : f32 to vector<8x784xf32>
    %235 = arith.mulf %234, %193 : vector<8x784xf32>
    %236 = arith.addf %232, %235 : vector<8x784xf32>
    %c0_88 = arith.constant 0 : index
    %c2_89 = arith.constant 2 : index
    %c0_90 = arith.constant 0 : index
    %237 = vector.load %arg1[%c0_88, %c2_89, %c0_90] : memref<8x4x784xf32, #tpu.memory_space<vmem>>, vector<8x1x784xf32>
    %238 = vector.shape_cast %237 : vector<8x1x784xf32> to vector<8x784xf32>
    %c2_91 = arith.constant 2 : index
    %239 = memref.load %arg11[%c2_91] : memref<4xf32, #tpu.memory_space<smem>>
    %240 = vector.broadcast %239 : f32 to vector<8x784xf32>
    %241 = arith.addf %236, %240 : vector<8x784xf32>
    %cst_92 = arith.constant 0.000000e+00 : f32
    %242 = vector.broadcast %cst_92 : f32 to vector<8x784xf32>
    %243 = arith.maximumf %241, %242 : vector<8x784xf32>
    %244 = arith.addf %238, %243 : vector<8x784xf32>
    %c0_93 = arith.constant 0 : index
    %c2_94 = arith.constant 2 : index
    %c0_95 = arith.constant 0 : index
    %245 = vector.load %arg12[%c0_93, %c2_94, %c0_95] : memref<8x4x784xf32, #tpu.memory_space<vmem>>, vector<8x1x784xf32>
    %246 = vector.shape_cast %245 : vector<8x1x784xf32> to vector<8x784xf32>
    %247 = vector.shape_cast %244 : vector<8x784xf32> to vector<8x1x784xf32>
    tpu.vector_store %arg12[%c0_93, %c2_94, %c0_95], %247 {strides = array<i32>} : memref<8x4x784xf32, #tpu.memory_space<vmem>>, vector<8x1x784xf32>,
    %c6_96 = arith.constant 6 : index
    %248 = memref.load %arg10[%c6_96] : memref<8xf32, #tpu.memory_space<smem>>
    %249 = vector.broadcast %248 : f32 to vector<8x784xf32>
    %250 = arith.mulf %249, %191 : vector<8x784xf32>
    %c7_97 = arith.constant 7 : index
    %251 = memref.load %arg10[%c7_97] : memref<8xf32, #tpu.memory_space<smem>>
    %252 = vector.broadcast %251 : f32 to vector<8x784xf32>
    %253 = arith.mulf %252, %193 : vector<8x784xf32>
    %254 = arith.addf %250, %253 : vector<8x784xf32>
    %c0_98 = arith.constant 0 : index
    %c3_99 = arith.constant 3 : index
    %c0_100 = arith.constant 0 : index
    %255 = vector.load %arg1[%c0_98, %c3_99, %c0_100] : memref<8x4x784xf32, #tpu.memory_space<vmem>>, vector<8x1x784xf32>
    %256 = vector.shape_cast %255 : vector<8x1x784xf32> to vector<8x784xf32>
    %c3_101 = arith.constant 3 : index
    %257 = memref.load %arg11[%c3_101] : memref<4xf32, #tpu.memory_space<smem>>
    %258 = vector.broadcast %257 : f32 to vector<8x784xf32>
    %259 = arith.addf %254, %258 : vector<8x784xf32>
    %cst_102 = arith.constant 0.000000e+00 : f32
    %260 = vector.broadcast %cst_102 : f32 to vector<8x784xf32>
    %261 = arith.maximumf %259, %260 : vector<8x784xf32>
    %262 = arith.addf %256, %261 : vector<8x784xf32>
    %c0_103 = arith.constant 0 : index
    %c3_104 = arith.constant 3 : index
    %c0_105 = arith.constant 0 : index
    %263 = vector.load %arg12[%c0_103, %c3_104, %c0_105] : memref<8x4x784xf32, #tpu.memory_space<vmem>>, vector<8x1x784xf32>
    %264 = vector.shape_cast %263 : vector<8x1x784xf32> to vector<8x784xf32>
    %265 = vector.shape_cast %262 : vector<8x784xf32> to vector<8x1x784xf32>
    tpu.vector_store %arg12[%c0_103, %c3_104, %c0_105], %265 {strides = array<i32>} : memref<8x4x784xf32, #tpu.memory_space<vmem>>, vector<8x1x784xf32>,
    return
  }
  func.func @transform_0(%arg0: i32) -> (i32, i32, i32) {
    %c0_i32 = arith.constant 0 : i32
    %c0_i32_0 = arith.constant 0 : i32
    %c0_i32_1 = arith.constant 0 : i32
    return %arg0, %c0_i32, %c0_i32_0 : i32, i32, i32
  }
  func.func @transform_1(%arg0: i32) -> (i32, i32) {
    %c0_i32 = arith.constant 0 : i32
    %c0_i32_0 = arith.constant 0 : i32
    return %arg0, %c0_i32 : i32, i32
  }
  func.func @transform_2(%arg0: i32) -> (i32, i32) {
    %c0_i32 = arith.constant 0 : i32
    %c0_i32_0 = arith.constant 0 : i32
    %c0_i32_1 = arith.constant 0 : i32
    return %c0_i32, %c0_i32_0 : i32, i32
  }
  func.func @transform_3(%arg0: i32) -> (i32, i32) {
    %c0_i32 = arith.constant 0 : i32
    %c0_i32_0 = arith.constant 0 : i32
    %c0_i32_1 = arith.constant 0 : i32
    return %c0_i32, %c0_i32_0 : i32, i32
  }
  func.func @transform_4(%arg0: i32) -> (i32, i32) {
    %c0_i32 = arith.constant 0 : i32
    %c0_i32_0 = arith.constant 0 : i32
    %c0_i32_1 = arith.constant 0 : i32
    return %c0_i32, %c0_i32_0 : i32, i32
  }
  func.func @transform_5(%arg0: i32) -> i32 {
    %c0_i32 = arith.constant 0 : i32
    %c0_i32_0 = arith.constant 0 : i32
    return %c0_i32 : i32
  }
  func.func @transform_6(%arg0: i32) -> i32 {
    %c0_i32 = arith.constant 0 : i32
    %c0_i32_0 = arith.constant 0 : i32
    return %c0_i32 : i32
  }
  func.func @transform_7(%arg0: i32) -> i32 {
    %c0_i32 = arith.constant 0 : i32
    %c0_i32_0 = arith.constant 0 : i32
    return %c0_i32 : i32
  }
  func.func @transform_8(%arg0: i32) -> i32 {
    %c0_i32 = arith.constant 0 : i32
    %c0_i32_0 = arith.constant 0 : i32
    return %c0_i32 : i32
  }
  func.func @transform_9(%arg0: i32) -> i32 {
    %c0_i32 = arith.constant 0 : i32
    %c0_i32_0 = arith.constant 0 : i32
    return %c0_i32 : i32
  }
  func.func @transform_10(%arg0: i32) -> i32 {
    %c0_i32 = arith.constant 0 : i32
    %c0_i32_0 = arith.constant 0 : i32
    return %c0_i32 : i32
  }
  func.func @transform_11(%arg0: i32) -> (i32, i32, i32) {
    %c0_i32 = arith.constant 0 : i32
    %c0_i32_0 = arith.constant 0 : i32
    %c0_i32_1 = arith.constant 0 : i32
    return %arg0, %c0_i32, %c0_i32_0 : i32, i32, i32
  }
}

</mosaic_0001>

<bundles_post_ra>
// kernel: _lambda_.1
= control target key start
LH: loop header
LB: loop body
LE: loop exit
PB: predicated region body
PF: predicated region fallthrough
CT: control target
= control target key end

     0   :  { %s6536_s0 = inlined_call_operand.vmem [shape: f32[16,4,784], index: 0, kind: input, shape index: {}]   ;;  %s6537_s1 = inlined_call_operand.vmem [shape: f32[16,10], index: 1, kind: input, shape index: {}]   ;;  %s6538_s2 = inlined_call_operand.vmem [shape: f32[4,784], index: 2, kind: input, shape index: {}]   ;;  %s6539_s3 = inlined_call_operand.vmem [shape: f32[10,784], index: 3, kind: input, shape index: {}]   ;;  %s6540_s4 = inlined_call_operand.vmem [shape: f32[1,784], index: 4, kind: input, shape index: {}]   ;;  %s6541_s5 = inlined_call_operand.vmem [shape: f32[8], index: 5, kind: input, shape index: {}]   ;;  %s6542_s6 = inlined_call_operand.vmem [shape: f32[2], index: 6, kind: input, shape index: {}]   ;;  %s6543_s7 = inlined_call_operand.vmem [shape: f32[36], index: 7, kind: input, shape index: {}]   ;;  %s6544_s8 = inlined_call_operand.vmem [shape: f32[2], index: 8, kind: input, shape index: {}]   ;;  %s6545_s9 = inlined_call_operand.vmem [shape: f32[8], index: 9, kind: input, shape index: {}]   ;;  %s6546_s10 = inlined_call_operand.vmem [shape: f32[4], index: 10, kind: input, shape index: {}]   ;;  %s6547_s11 = inlined_call_operand.vmem [shape: f32[16,4,784], index: 11, kind: output, shape index: {}]  }
   0x1   :  { %6649 = sst [smem:[#allocation80_spill]] %s6536_s0 }
   0x2   :  { %6650 = sst [smem:[#allocation81_spill]] %s6537_s1 }
   0x3   :  { %16 = vsyncpa [#allocation4], 0 }
   0x4   :  { %17 = vsyncpa [#allocation6], 0 }
   0x5   :  { %18 = vsyncpa [#allocation9], 0 }
   0x6   :  { %19 = vsyncpa [#allocation12], 0  ;;  %s4218_s17 = smov 0  }
   0x7 LB: > { %s330_s20 = sshll.u32 %s6542_s6, 4  ;;  %s4227_s21 = sadd.s32 4294967295, %s4143_s17   ;;  %s4143_s17 = sphi %s4218_s17, %s25_s17   ;;  %s331_s20 = int_to_ptr.vmem [resolvable:$true] %s330_s20 }
   0x8   : > { %p3777_p0 = scmp.ge.s32.totalorder %s4143_s17, 1  ;;  %p297_p1 = scmp.lt.s32.totalorder %s4143_s17, 3 }
   0x9   : > { %p6548_p2 = scmp.eq.s32.totalorder %s4227_s21, 0  ;;  %s352_s25 = sshll.u32 %s6544_s8, 4  ;;  %s4239_s25 = int_to_ptr.vmem [resolvable:$true] %s352_s25 }
   0xa   : > { %p4232_p3 = pnand %p3777_p0, %p297_p1  ;;  %s319_s28 = sshll.u32 %s6541_s5, 4  ;;  %s4246_s28 = int_to_ptr.vmem [resolvable:$true] %s319_s28 }
   0xb   : > { %s341_s13 = sshll.u32 %s6543_s7, 4  ;;  %s363_s16 = sshll.u32 %s6545_s9, 4  ;;  %s4257_s13 = int_to_ptr.vmem [resolvable:$true] %s341_s13  ;;  %s364_s16 = int_to_ptr.vmem [resolvable:$true] %s363_s16 }
   0xc   : > { %p3979_p4 = pneg %p4232_p3  ;;  %s4031_s18 = scalar_lea.vmem %s331_s20, 16 }
   0xd   : > { %p4032_p6 = scmp.ne.s32.totalorder %s331_s20, %s4031_s18  ;;  %p4039_p10 = scmp.lt.s32.totalorder %s331_s20, %s331_s20 }
   0xe   : > { %p4250_p5 = pnand %p6548_p2, %p3979_p4  ;;  %p4040_p11 = scmp.lt.s32.totalorder %s4031_s18, %s4031_s18 }
  0x10   : > { %p4264_p7 = pneg %p4250_p5  ;;  %p4041_p12 = por %p4040_p11, %p4039_p10 }
  0x12   : > { %p4034_p8 = pnand %p4264_p7, %p4032_p6 }
  0x14   : > { %p4035_p9 = pneg %p4034_p8 }
  0x16   : > { %p4042_p13 = pnand %p4041_p12, %p4035_p9 }
  0x18   : > { %4045 = shalt.err (!%p4042_p13)
}
  0x19   : > { %s4145_s23 = smov [#allocation5]   ;;  %s4046_s24 = scalar_lea.vmem %s4239_s25, 16 }
  0x1a   : > { %3985 = dma.vmem_to_smem (!%p4250_p5), %s331_s20, 16, %s4145_s23, [#allocation6]  }
  0x1b   : > { %p4047_p0 = scmp.ne.s32.totalorder %s4239_s25, %s4046_s24  ;;  %p4054_p6 = scmp.lt.s32.totalorder %s4239_s25, %s4239_s25 }
  0x1c   : > { %p4055_p8 = scmp.lt.s32.totalorder %s4046_s24, %s4046_s24 }
  0x1d   : > { %p4049_p1 = pnand %p4047_p0, %p4264_p7 }
  0x1e   : > { %p4056_p2 = por %p4055_p8, %p4054_p6 }
  0x1f   : > { %p4050_p4 = pneg %p4049_p1 }
  0x21   : > { %p4057_p10 = pnand %p4056_p2, %p4050_p4 }
  0x23   : > { %4060 = shalt.err (!%p4057_p10)
}
  0x24   : > { %s4146_s26 = smov [#allocation8]   ;;  %s4061_s20 = scalar_lea.vmem %s4246_s28, 16 }
  0x25   : > { %3991 = dma.vmem_to_smem (!%p4250_p5), %s4239_s25, 16, %s4146_s26, [#allocation9]  }
  0x26   : > { %p4062_p9 = scmp.ne.s32.totalorder %s4246_s28, %s4061_s20  ;;  %p4069_p13 = scmp.lt.s32.totalorder %s4246_s28, %s4246_s28 }
  0x27   : > { %p4070_p0 = scmp.lt.s32.totalorder %s4061_s20, %s4061_s20 }
  0x28   : > { %p4064_p11 = pnand %p4062_p9, %p4264_p7 }
  0x29   : > { %p4071_p1 = por %p4070_p0, %p4069_p13 }
  0x2a   : > { %p4065_p12 = pneg %p4064_p11 }
  0x2c   : > { %p4072_p2 = pnand %p4071_p1, %p4065_p12 }
  0x2e   : > { %4075 = shalt.err (!%p4072_p2)
}
  0x2f   : > { %s4147_s27 = smov [#allocation3]   ;;  %s4076_s25 = scalar_lea.vmem %s4257_s13, 16 }
  0x30   : > { %3982 = dma.vmem_to_smem (!%p4250_p5), %s4246_s28, 16, %s4147_s27, [#allocation4]  }
  0x31   : > { %p4077_p4 = scmp.ne.s32.totalorder %s4257_s13, %s4076_s25  ;;  %p4084_p10 = scmp.lt.s32.totalorder %s4257_s13, %s4257_s13 }
  0x32   : > { %p4085_p9 = scmp.lt.s32.totalorder %s4076_s25, %s4076_s25 }
  0x33   : > { %p4079_p6 = pnand %p4077_p4, %p4264_p7 }
  0x34   : > { %p4086_p11 = por %p4085_p9, %p4084_p10 }
  0x35   : > { %p4080_p8 = pneg %p4079_p6 }
  0x37   : > { %p4087_p12 = pnand %p4086_p11, %p4080_p8 }
  0x39   : > { %4090 = shalt.err (!%p4087_p12)
}
  0x3a   : > { %s4148_s30 = smov [#allocation7]   ;;  %s4091_s28 = scalar_lea.vmem %s364_s16, 16 }
  0x3b   : > { %3988 = dma.vmem_to_smem (!%p4250_p5), %s4257_s13, 16, %s4148_s30, [#allocation6]  }
  0x3c   : > { %p4092_p13 = scmp.ne.s32.totalorder %s364_s16, %s4091_s28  ;;  %p4099_p2 = scmp.lt.s32.totalorder %s364_s16, %s364_s16 }
  0x3d   : > { %p4100_p4 = scmp.lt.s32.totalorder %s4091_s28, %s4091_s28 }
  0x3e   : > { %p4094_p0 = pnand %p4092_p13, %p4264_p7 }
  0x3f   : > { %p4101_p6 = por %p4100_p4, %p4099_p2 }
  0x40   : > { %p4095_p1 = pneg %p4094_p0 }
  0x42   : > { %p4102_p8 = pnand %p4101_p6, %p4095_p1 }
  0x44   : > { %4105 = shalt.err (!%p4102_p8)
}
  0x45   : > { %s4149_s15 = smov [#allocation10]   ;;  %s374_s23 = sshll.u32 %s6546_s10, 4  ;;  %s375_s23 = int_to_ptr.vmem [resolvable:$true] %s374_s23 }
  0x46   : > { %3994 = dma.vmem_to_smem (!%p4250_p5), %s364_s16, 16, %s4149_s15, [#allocation9]  }
  0x47   : > { %s4106_s24 = scalar_lea.vmem %s375_s23, 16  ;;  %p4114_p12 = scmp.lt.s32.totalorder %s375_s23, %s375_s23 }
  0x48   : > { %p4107_p10 = scmp.ne.s32.totalorder %s375_s23, %s4106_s24  ;;  %p4115_p13 = scmp.lt.s32.totalorder %s4106_s24, %s4106_s24 }
  0x4a   : > { %p4109_p9 = pnand %p4107_p10, %p4264_p7  ;;  %p4116_p0 = por %p4115_p13, %p4114_p12 }
  0x4c   : > { %p4110_p11 = pneg %p4109_p9 }
  0x4e   : > { %p4117_p1 = pnand %p4116_p0, %p4110_p11 }
  0x50   : > { %4120 = shalt.err (!%p4117_p1)
}
  0x51   : > { %s4150_s26 = smov [#allocation11]   ;;  %404 = sbr.rel (%p4232_p3) target bundleno = 507 (0x1fb), region = 64 }
  0x52   : > { %3997 = dma.vmem_to_smem (!%p4250_p5), %s375_s23, 16, %s4150_s26, [#allocation12]  }
  0x56   : > { %p6654_p2 = scmp.eq.s32.totalorder %s4227_s21, 0 }
  0x58   : > { %4126 = dma.done.wait (%p6654_p2), [#allocation4], 16   ;;  %p6655_p4 = pmov %p6654_p2 }
  0x59   : > { %p6656_p7 = pmov %p6654_p2 }
  0x5a   : > { %4128 = vsyncadd (%p6655_p4), [#allocation4], 4294967280 }
  0x5b   : > { %4130 = dma.done.wait (%p6656_p7), [#allocation6], 32   ;;  %p6657_p6 = pmov %p6654_p2 }
  0x5c   : > { %p6658_p8 = pmov %p6654_p2 }
  0x5d   : > { %4132 = vsyncadd (%p6657_p6), [#allocation6], 4294967264 }
  0x5e   : > { %4134 = dma.done.wait (%p6658_p8), [#allocation9], 32   ;;  %p6659_p5 = pmov %p6654_p2 }
  0x5f   : > { %p6660_p3 = pmov %p6654_p2 }
  0x60   : > { %4136 = vsyncadd (%p6659_p5), [#allocation9], 4294967264 }
  0x61   : > { %4138 = dma.done.wait (%p6660_p3), [#allocation12], 16   ;;  %p6661_p10 = pmov %p6654_p2 }
  0x63   : > { %4140 = vsyncadd (%p6661_p10), [#allocation12], 4294967280 }
  0x64   : > { %430 = sfence }
  0x65   : > { %v732_v0 = vld [vmem:[%s6539_s3 + $0x40] sm:$0x3]  ;;  %vm779_vm0 = vcmask 1041408   ;;  %v734_v1 = vld [vmem:[%s6539_s3 + $0x50] sm:$0x3]  ;;  %v725_v2 = vld [vmem:[%s6539_s3 + $0x8] sm:$0xff]  ;;  %v6549_v12 = vlaneseq }
  0x66   : > { %3836 = vmatprep.subr.msk.mxu0 %vm779_vm0, %v732_v0  ;;  %3839 = vmatprep.subr.msk.mxu1 %vm779_vm0, %v734_v1  ;;  %v731_v3 = vld [vmem:[%s6539_s3 + $0x38] sm:$0x3]  ;;  %v733_v4 = vld [vmem:[%s6539_s3 + $0x48] sm:$0x3]  ;;  %v724_v6 = vld [vmem:[%s6539_s3] sm:$0xff]  ;;  %v4151_v7 = vmov 0.0  }
  0x67   : > { %v727_v5 = vld [vmem:[%s6539_s3 + $0x18] sm:$0xff]  ;;  %3837 = vmatpush1.msk.msra.mxu0 %vm779_vm0, %v731_v3  ;;  %3840 = vmatpush1.msk.msra.mxu1 %vm779_vm0, %v733_v4  ;;  %495 = vst [vmem:[#allocation2 + $0x30] sm:$0xff] %v4151_v7  ;;  %v726_v8 = vld [vmem:[%s6539_s3 + $0x10] sm:$0xff]  ;;  %p478_p9 = scmp.lt.s32.totalorder %s4227_s21, 1  ;;  %v736_v9 = vld [vmem:[%s6539_s3 + $0x60] sm:$0x3] }
  0x68   : > { %831 = vmatprep.subr.mxu0 %v725_v2  ;;  %902 = vmatprep.subr.mxu1 %v727_v5  ;;  %s3792_s16 = sshll.u32 %s4227_s21, 3  ;;  %s4366_s19 = sld [smem:[#allocation3]]  ;;  %vm775_vm1 = vcmask 80896   ;;  %v735_v10 = vld [vmem:[%s6539_s3 + $0x58] sm:$0x3]  ;;  %v729_v16 = vld [vmem:[%s6539_s3 + $0x28] sm:$0xff] }
  0x69   : > { %832 = vmatpush1.msra.mxu0 %v724_v6  ;;  %865 = vmatprep.mubr.f32.mxu0 %v4151_v7  ;;  %s479_s29 = scalar_select %p478_p9, %s4227_s21, 1  ;;  %v737_v11 = vld [vmem:[%s6539_s3 + $0x68] sm:$0x3]  ;;  %v4152_v13 = vmov 1966171168   ;;  %v728_v17 = vld [vmem:[%s6539_s3 + $0x20] sm:$0xff] }
  0x6a   : > { %903 = vmatpush1.msra.mxu1 %v726_v8  ;;  %936 = vmatprep.mubr.f32.mxu1 %v4151_v7  ;;  %p472_p11 = scmp.lt.s32.totalorder %s3792_s16, 15  ;;  %s6662_s1 = sld [smem:[#allocation81_spill]]  ;;  %v1136_v14 = vunpack.c.l.s4 %v4152_v13  ;;  %v730_v18 = vld [vmem:[%s6539_s3 + $0x30] sm:$0xff]  ;;  %v4403_v19 = vshrl.u32 %v6549_v12, 7  ;;  %vm4153_vm2 = vmmov 0   ;;  %vm1599_vm3 = vcmask 130048  }
  0x6b   : > { %s3794_s20 = sshll.u32 %s479_s29, 3  ;;  %3842 = vmatprep.subr.msk.mxu0 %vm779_vm0, %v736_v9  ;;  %3947 = vmatprep.subr.mxu1 %v4151_v7  ;;  %s4378_s21 = sld [smem:[#allocation3 + $0x1]] }
  0x6c   : > { %s6884_s16 = smov (!%p472_p11, %s3792_s16), 15  ;;  %s4390_s26 = sld [smem:[#allocation3 + $0x2]]  ;;  %v1137_v20 = vunpack.c.0.s8 %v1136_v14 }
  0x6d   : > { %s4398_s27 = sld [smem:[#allocation3 + $0x3]]  ;;  %s4154_s18 = smov 1  }
  0x6e   : > { %s4400_s25 = sld [smem:[#allocation5]]  ;;  %v512_v21 = vstv %s4366_s19  ;;  %v4433_v31 = vsub.s32 %v1137_v20, %v4403_v19  ;;  %s4155_s23 = smov 27  }
  0x6f   : > { %s6663_s0 = sld [smem:[#allocation80_spill]]  ;;  %s4156_s24 = smov 28  }
  0x70   : > { %s481_s30 = scalar_lea.vmem %s6662_s1, %s3794_s20  ;;  %s6630_s20 = smul.u32 28, %s6884_s16  ;;  %6664 = vst [vmem:[#allocation17_spill] sm:$0xff] %v4433_v31 }
  0x71   : > { %v723_v15 = vld [vmem:[%s481_s30] sm:$0xff]  ;;  %s4413_s28 = sld [smem:[#allocation3 + $0x4]]  ;;  %v538_v30 = vstv %s4378_s21  ;;  %s4157_s29 = smov 29  }
  0x72   : > { %3838 = vmatmul.mubr.msk.f32.vlgmr.msra.gmra.mxu0 %vm775_vm1, %v723_v15  ;;  %3841 = vmatmul.mubr.msk.f32.vlgmr.msra.gmra.mxu1 %vm775_vm1, %v723_v15  ;;  %v572_v37 = vstv %s4390_s26  ;;  %s3832_s19 = sld [smem:[#allocation3 + $0x5]] }
  0x73   : > { %3843 = vmatpush1.msk.msra.mxu0 %vm779_vm0, %v735_v10  ;;  %3948 = vmatpush3.msk.msra.mxu1 %vm779_vm0, %v737_v11  ;;  %v4455_v43 = vstv %s4398_s27  ;;  %s3833_s15 = sld [smem:[#allocation3 + $0x6]] }
  0x74   : > { %973 = vmatprep.subr.mxu0 %v729_v16  ;;  %3949 = vmatprep.subr.mxu1 %v4151_v7  ;;  %v4466_v48 = vstv %s4400_s25  ;;  %s4603_s21 = sld [smem:[#allocation3 + $0x7]] }
  0x75   : > { %974 = vmatpush1.msra.mxu0 %v728_v17  ;;  %1007 = vmatprep.mubr.f32.mxu0 %v4151_v7  ;;  %s4410_s14 = scalar_lea.vmem %s6663_s0, %s6630_s20  ;;  %s4609_s13 = sld [smem:[#allocation5 + $0x1]] }
  0x76   : > { %3950 = vmatpush3.msra.mxu1 %v730_v18  ;;  %3951 = vmatprep.mubr.msk.f32.mxu1 %vm4153_vm2, %v4151_v7  ;;  %v497_v22 = vld [vmem:[%s4410_s14] ss:$4 sm:$0x7f]  ;;  %v4449_v41 = vld [vmem:[%s4410_s14 + $0x1] ss:$4 sm:$0x7f] }
  0x77   : > { %v3797_v23 = vld [vmem:[%s4410_s14 + $0x1c] ss:$4 sm:$0x7f]  ;;  %3844 = vmatmul.mubr.msk.f32.vlgmr.msra.gmra.mxu0 %vm775_vm1, %v723_v15  ;;  %3952 = vmatmul.mubr.msk.f32.vlgmr.msra.gmra.mxu1 %vm775_vm1, %v723_v15  ;;  %v513_v28 = vmul.f32 %v512_v21, %v497_v22  ;;  %v4452_v42 = vld [vmem:[%s4410_s14 + $0x1d] ss:$4 sm:$0x7f]  ;;  %v539_v46 = vmul.f32 %v4449_v41, %v538_v30  ;;  %v4469_v49 = vstv %s4413_s28 }
  0x78   : > { %v4420_v24 = vld [vmem:[%s4410_s14 + $0x38] ss:$4 sm:$0x7f]  ;;  %v514_v29 = vmul.f32 %v3797_v23, %v512_v21  ;;  %v4458_v44 = vld [vmem:[%s4410_s14 + $0x39] ss:$4 sm:$0x7f]  ;;  %v540_v47 = vmul.f32 %v4452_v42, %v538_v30  ;;  %v4480_v54 = vmul.f32 %v4469_v49, %v497_v22  ;;  %v4483_v55 = vmul.f32 %v3797_v23, %v4469_v49 }
  0x79   : > { %v4423_v25 = vld [vmem:[%s4410_s14 + $0x54] ss:$4 sm:$0x7f]  ;;  %v515_v34 = vmul.f32 %v4420_v24, %v512_v21  ;;  %v4461_v45 = vld [vmem:[%s4410_s14 + $0x55] ss:$4 sm:$0x7f]  ;;  %v541_v52 = vmul.f32 %v4458_v44, %v538_v30  ;;  %v547_v60 = vadd.f32 %v539_v46, %v513_v28 }
  0x7a   : > { %v4426_v26 = vld [vmem:[%s4410_s14 + $0x70] ss:$4 sm:$0x7f]  ;;  %v516_v35 = vmul.f32 %v4423_v25, %v512_v21  ;;  %v4472_v50 = vld [vmem:[%s4410_s14 + $0x71] ss:$4 sm:$0x7f]  ;;  %v542_v53 = vmul.f32 %v4461_v45, %v538_v30  ;;  %v548_v61 = vadd.f32 %v540_v47, %v514_v29 }
  0x7b   : > { %v4429_v27 = vld [vmem:[%s4410_s14 + $0x8c] ss:$4 sm:$0x7f]  ;;  %v517_v36 = vmul.f32 %v4426_v26, %v512_v21  ;;  %v4475_v51 = vld [vmem:[%s4410_s14 + $0x8d] ss:$4 sm:$0x7f]  ;;  %v543_v58 = vmul.f32 %v4472_v50, %v538_v30  ;;  %v549_v0 = vadd.f32 %v541_v52, %v515_v34 }
  0x7c   : > { %v4436_v32 = vld [vmem:[%s4410_s14 + $0xa8] ss:$4 sm:$0x7f]  ;;  %v518_v38 = vmul.f32 %v4429_v27, %v512_v21  ;;  %v4486_v56 = vld [vmem:[%s4410_s14 + $0xa9] ss:$4 sm:$0x7f]  ;;  %v544_v59 = vmul.f32 %v4475_v51, %v538_v30  ;;  %v550_v1 = vadd.f32 %v542_v53, %v516_v35 }
  0x7d   : > { %v4439_v33 = vld [vmem:[%s4410_s14 + $0xc4] ss:$4 sm:$0x7f]  ;;  %v519_v39 = vmul.f32 %v4436_v32, %v512_v21  ;;  %v4489_v57 = vld [vmem:[%s4410_s14 + $0xc5] ss:$4 sm:$0x7f]  ;;  %v545_v62 = vmul.f32 %v4486_v56, %v538_v30  ;;  %v551_v4 = vadd.f32 %v543_v58, %v517_v36 }
  0x7e   : > { %v520_v40 = vmul.f32 %v4439_v33, %v512_v21  ;;  %v546_v63 = vmul.f32 %v4489_v57, %v538_v30  ;;  %v4496_v2 = vld [vmem:[%s4410_s14 + $0x2] ss:$4 sm:$0x7f]  ;;  %v552_v5 = vadd.f32 %v544_v59, %v518_v38  ;;  %v4528_v35 = vld [vmem:[%s4410_s14 + $0x3] ss:$4 sm:$0x7f] }
  0x7f   : > { %v4499_v3 = vld [vmem:[%s4410_s14 + $0x1e] ss:$4 sm:$0x7f]  ;;  %v573_v8 = vmul.f32 %v4496_v2, %v572_v37  ;;  %v553_v10 = vadd.f32 %v545_v62, %v519_v39  ;;  %v4531_v36 = vld [vmem:[%s4410_s14 + $0x1f] ss:$4 sm:$0x7f]  ;;  %v607_v47 = vmul.f32 %v4528_v35, %v4455_v43 }
  0x80   : > { %v4502_v6 = vld [vmem:[%s4410_s14 + $0x3a] ss:$4 sm:$0x7f]  ;;  %v574_v9 = vmul.f32 %v4499_v3, %v572_v37  ;;  %v554_v11 = vadd.f32 %v546_v63, %v520_v40  ;;  %v4534_v40 = vld [vmem:[%s4410_s14 + $0x3b] ss:$4 sm:$0x7f] }
  0x81   : > { %v4505_v7 = vld [vmem:[%s4410_s14 + $0x56] ss:$4 sm:$0x7f]  ;;  %v575_v15 = vmul.f32 %v4502_v6, %v572_v37  ;;  %v581_v22 = vadd.f32 %v573_v8, %v547_v60  ;;  %v4537_v46 = vld [vmem:[%s4410_s14 + $0x57] ss:$4 sm:$0x7f]  ;;  %v609_v60 = vmul.f32 %v4534_v40, %v4455_v43 }
  0x82   : > { %v4510_v13 = vld [vmem:[%s4410_s14 + $0x72] ss:$4 sm:$0x7f]  ;;  %v576_v16 = vmul.f32 %v4505_v7, %v572_v37  ;;  %v582_v23 = vadd.f32 %v574_v9, %v548_v61  ;;  %v4544_v58 = vld [vmem:[%s4410_s14 + $0x73] ss:$4 sm:$0x7f]  ;;  %v610_v61 = vmul.f32 %v4537_v46, %v4455_v43 }
  0x83   : > { %v4513_v14 = vld [vmem:[%s4410_s14 + $0x8e] ss:$4 sm:$0x7f]  ;;  %v577_v20 = vmul.f32 %v4510_v13, %v572_v37  ;;  %v583_v30 = vadd.f32 %v575_v15, %v549_v0  ;;  %v4547_v59 = vld [vmem:[%s4410_s14 + $0x8f] ss:$4 sm:$0x7f]  ;;  %v611_v0 = vmul.f32 %v4544_v58, %v4455_v43 }
  0x84   : > { %v4518_v17 = vld [vmem:[%s4410_s14 + $0xaa] ss:$4 sm:$0x7f]  ;;  %v578_v21 = vmul.f32 %v4513_v14, %v572_v37  ;;  %v584_v34 = vadd.f32 %v576_v16, %v550_v1  ;;  %v4554_v62 = vld [vmem:[%s4410_s14 + $0xab] ss:$4 sm:$0x7f]  ;;  %v612_v1 = vmul.f32 %v4547_v59, %v4455_v43 }
  0x85   : > { %v4521_v18 = vld [vmem:[%s4410_s14 + $0xc6] ss:$4 sm:$0x7f]  ;;  %v579_v28 = vmul.f32 %v4518_v17, %v572_v37  ;;  %v585_v38 = vadd.f32 %v577_v20, %v551_v4  ;;  %v4557_v63 = vld [vmem:[%s4410_s14 + $0xc7] ss:$4 sm:$0x7f]  ;;  %v615_v4 = vadd.f32 %v607_v47, %v581_v22  ;;  %v613_v8 = vmul.f32 %v4554_v62, %v4455_v43 }
  0x86   : > { %v580_v29 = vmul.f32 %v4521_v18, %v572_v37  ;;  %v586_v39 = vadd.f32 %v578_v21, %v552_v5  ;;  %v608_v37 = vmul.f32 %v4531_v36, %v4455_v43  ;;  %v614_v9 = vmul.f32 %v4557_v63, %v4455_v43  ;;  %s3851_s26 = sld [smem:[#allocation7 + $0x4]] }
  0x87   : > { %v587_v52 = vadd.f32 %v579_v28, %v553_v10  ;;  %v617_v10 = vadd.f32 %v609_v60, %v583_v30  ;;  %v619_v15 = vadd.f32 %v611_v0, %v585_v38  ;;  %v625_v20 = vadd.f32 %v4466_v48, %v615_v4  ;;  %s3852_s22 = sld [smem:[#allocation7 + $0x16]] }
  0x88   : > { %v588_v53 = vadd.f32 %v580_v29, %v554_v11  ;;  %v616_v5 = vadd.f32 %v608_v37, %v582_v23  ;;  %v618_v11 = vadd.f32 %v610_v61, %v584_v34  ;;  %v620_v16 = vadd.f32 %v612_v1, %v586_v39  ;;  %s3853_s27 = sld [smem:[#allocation7 + $0x3]] }
  0x89   : > { %v621_v28 = vadd.f32 %v613_v8, %v587_v52  ;;  %v627_v22 = vadd.f32 %v4466_v48, %v617_v10  ;;  %v629_v47 = vadd.f32 %v4466_v48, %v619_v15  ;;  %v4573_v30 = vmax.f32 %v625_v20, 0.0  ;;  %s3854_s25 = sld [smem:[#allocation7 + $0x15]] }
  0x8a   : > { %v626_v21 = vadd.f32 %v4466_v48, %v616_v5  ;;  %v622_v29 = vadd.f32 %v614_v9, %v588_v53  ;;  %v628_v23 = vadd.f32 %v4466_v48, %v618_v11  ;;  %v630_v43 = vadd.f32 %v4466_v48, %v620_v16  ;;  %s4989_s30 = sld [smem:[#allocation7 + $0x2]] }
  0x8b   : > { %v631_v38 = vadd.f32 %v4466_v48, %v621_v28  ;;  %v4579_v37 = vmax.f32 %v627_v22, 0.0  ;;  %v4583_v53 = vmax.f32 %v629_v47, 0.0  ;;  %v645_v61 = vmul.f32 %v4420_v24, %v4469_v49  ;;  %s4993_s12 = sld [smem:[#allocation7 + $0x14]] }
  0x8c   : > { %v4575_v34 = vmax.f32 %v626_v21, 0.0  ;;  %v632_v39 = vadd.f32 %v4466_v48, %v622_v29  ;;  %v4581_v52 = vmax.f32 %v628_v23, 0.0  ;;  %v4585_v60 = vmax.f32 %v630_v43, 0.0  ;;  %s4995_s28 = sld [smem:[#allocation7 + $0x1]] }
  0x8d   : > { %v646_v0 = vmul.f32 %v4423_v25, %v4469_v49  ;;  %v4591_v1 = vmax.f32 %v631_v38, 0.0  ;;  %v647_v48 = vmul.f32 %v4426_v26, %v4469_v49  ;;  %v648_v5 = vmul.f32 %v4429_v27, %v4469_v49  ;;  %s5671_s20 = sld [smem:[#allocation10 + $0x6]] }
  0x8e   : > { %v4593_v4 = vmax.f32 %v632_v39, 0.0  ;;  %v649_v8 = vmul.f32 %v4436_v32, %v4469_v49  ;;  %v650_v9 = vmul.f32 %v4439_v33, %v4469_v49  ;;  %v652_v24 = vstv %s3832_s19  ;;  %s5036_s19 = sld [smem:[#allocation8]] }
  0x8f   : > { %v670_v10 = vstv %s3833_s15  ;;  %v653_v25 = vmul.f32 %v4449_v41, %v652_v24  ;;  %v654_v11 = vmul.f32 %v4452_v42, %v652_v24  ;;  %v655_v15 = vmul.f32 %v4458_v44, %v652_v24  ;;  %s5050_s15 = sld [smem:[#allocation7 + $0x1f]] }
  0x90   : > { %v656_v26 = vmul.f32 %v4461_v45, %v652_v24  ;;  %v657_v27 = vmul.f32 %v4472_v50, %v652_v24  ;;  %v658_v32 = vmul.f32 %v4475_v51, %v652_v24  ;;  %v659_v33 = vmul.f32 %v4486_v56, %v652_v24  ;;  %s5685_s0 = sld [smem:[#allocation10 + $0x7]] }
  0x91   : > { %v660_v49 = vmul.f32 %v4489_v57, %v652_v24  ;;  %v661_v16 = vadd.f32 %v653_v25, %v4480_v54  ;;  %v662_v41 = vadd.f32 %v654_v11, %v4483_v55  ;;  %v663_v20 = vadd.f32 %v655_v15, %v645_v61  ;;  %s5689_s1 = sld [smem:[#allocation11 + $0x3]] }
  0x92   : > { %v664_v42 = vadd.f32 %v656_v26, %v646_v0  ;;  %v665_v21 = vadd.f32 %v657_v27, %v647_v48  ;;  %v666_v44 = vadd.f32 %v658_v32, %v648_v5  ;;  %v667_v28 = vadd.f32 %v659_v33, %v649_v8 }
  0x93   : > { %v668_v45 = vadd.f32 %v660_v49, %v650_v9  ;;  %v671_v29 = vmul.f32 %v4496_v2, %v670_v10  ;;  %v672_v50 = vmul.f32 %v4499_v3, %v670_v10  ;;  %v673_v51 = vmul.f32 %v4502_v6, %v670_v10 }
  0x94   : > { %v674_v56 = vmul.f32 %v4505_v7, %v670_v10  ;;  %v675_v54 = vmul.f32 %v4510_v13, %v670_v10  ;;  %v676_v55 = vmul.f32 %v4513_v14, %v670_v10  ;;  %v677_v57 = vmul.f32 %v4518_v17, %v670_v10 }
  0x95   : > { %v678_v22 = vmul.f32 %v4521_v18, %v670_v10  ;;  %v679_v23 = vadd.f32 %v671_v29, %v661_v16  ;;  %v680_v47 = vadd.f32 %v672_v50, %v662_v41  ;;  %v681_v43 = vadd.f32 %v673_v51, %v663_v20 }
  0x96   : > { %v682_v2 = vadd.f32 %v674_v56, %v664_v42  ;;  %v683_v38 = vadd.f32 %v675_v54, %v665_v21  ;;  %v684_v39 = vadd.f32 %v676_v55, %v666_v44  ;;  %v685_v3 = vadd.f32 %v677_v57, %v667_v28 }
  0x97   : > { %v686_v61 = vadd.f32 %v678_v22, %v668_v45  ;;  %v688_v0 = vstv %s4603_s21  ;;  %v706_v6 = vstv %s4609_s13  ;;  %v1451_v7 = vcombine.low %v4573_v30, %v4575_v34  ;;  %s5000_s21 = sld [smem:[#allocation7 + $0x13]] }
  0x98   : > { %v1453_v13 = vcombine.low %v4579_v37, %v4581_v52  ;;  %v689_v14 = vmul.f32 %v4528_v35, %v688_v0  ;;  %v690_v17 = vmul.f32 %v4531_v36, %v688_v0  ;;  %v691_v18 = vmul.f32 %v4534_v40, %v688_v0  ;;  %s5069_s13 = sld [smem:[#allocation8 + $0x1]] }
  0x99   : > { %v692_v48 = vmul.f32 %v4537_v46, %v688_v0  ;;  %v693_v5 = vmul.f32 %v4544_v58, %v688_v0  ;;  %v694_v8 = vmul.f32 %v4547_v59, %v688_v0  ;;  %v695_v9 = vmul.f32 %v4554_v62, %v688_v0 }
  0x9a   : > { %v696_v24 = vmul.f32 %v4557_v63, %v688_v0  ;;  %v697_v10 = vadd.f32 %v689_v14, %v679_v23  ;;  %v698_v25 = vadd.f32 %v690_v17, %v680_v47  ;;  %v699_v11 = vadd.f32 %v691_v18, %v681_v43 }
  0x9b   : > { %v700_v15 = vadd.f32 %v692_v48, %v682_v2  ;;  %v701_v26 = vadd.f32 %v693_v5, %v683_v38  ;;  %v702_v35 = vadd.f32 %v694_v8, %v684_v39  ;;  %v703_v27 = vadd.f32 %v695_v9, %v685_v3 }
  0x9c   : > { %v704_v36 = vadd.f32 %v696_v24, %v686_v61  ;;  %v707_v32 = vadd.f32 %v706_v6, %v697_v10  ;;  %v708_v40 = vadd.f32 %v706_v6, %v698_v25  ;;  %v709_v33 = vadd.f32 %v706_v6, %v699_v11 }
  0x9d   : > { %v710_v46 = vadd.f32 %v706_v6, %v700_v15  ;;  %v711_v49 = vadd.f32 %v706_v6, %v701_v26  ;;  %v712_v58 = vadd.f32 %v706_v6, %v702_v35  ;;  %v713_v16 = vadd.f32 %v706_v6, %v703_v27 }
  0x9e   : > { %v714_v59 = vadd.f32 %v706_v6, %v704_v36  ;;  %v4639_v41 = vmax.f32 %v707_v32, 0.0  ;;  %v4641_v62 = vmax.f32 %v708_v40, 0.0  ;;  %v4643_v63 = vmax.f32 %v709_v33, 0.0 }
  0x9f   : > { %v4645_v20 = vmax.f32 %v710_v46, 0.0  ;;  %v4647_v42 = vmax.f32 %v711_v49, 0.0  ;;  %v4649_v21 = vmax.f32 %v712_v58, 0.0  ;;  %v4651_v44 = vmax.f32 %v713_v16, 0.0 }
  0xa0   : > { %v4653_v28 = vmax.f32 %v714_v59, 0.0  ;;  %v1455_v45 = vcombine.low %v4583_v53, %v4585_v60  ;;  %v1457_v29 = vcombine.low %v4591_v1, %v4593_v4  ;;  %v1465_v50 = vrot.slane %v1451_v7, %v4433_v31 }
  0xa1   : > { %v1479_v51 = vrot.slane %v1453_v13, %v4433_v31  ;;  %v2340_v56 = vcombine.low %v4639_v41, %v4641_v62  ;;  %v2342_v54 = vcombine.low %v4643_v63, %v4645_v20  ;;  %v2344_v55 = vcombine.low %v4647_v42, %v4649_v21 }
  0xa2   : > { %v2346_v57 = vcombine.low %v4651_v44, %v4653_v28  ;;  %v1493_v22 = vrot.slane %v1455_v45, %v4433_v31  ;;  %v1507_v23 = vrot.slane %v1457_v29, %v4433_v31  ;;  %v1452_v8 = vcombine.high %v4573_v30, %v4575_v34 }
  0xa3   : > { %v1515_v47 = vcombine.low %v1465_v50, %v1479_v51  ;;  %v1516_v43 = vcombine.high %v1465_v50, %v1479_v51  ;;  %v2354_v2 = vrot.slane %v2340_v56, %v4433_v31  ;;  %v2368_v38 = vrot.slane %v2342_v54, %v4433_v31 }
  0xa4   : > { %v2382_v39 = vrot.slane %v2344_v55, %v4433_v31  ;;  %v2396_v3 = vrot.slane %v2346_v57, %v4433_v31  ;;  %v1519_v61 = vcombine.low %v1493_v22, %v1507_v23  ;;  %v1520_v6 = vcombine.high %v1493_v22, %v1507_v23 }
  0xa5   : > { %v1529_v0 = vrot.slane %v1515_v47, %v4433_v31  ;;  %v1543_v7 = vrot.slane %v1516_v43, %v4433_v31  ;;  %v2404_v13 = vcombine.low %v2354_v2, %v2368_v38  ;;  %v2405_v17 = vcombine.high %v2354_v2, %v2368_v38 }
  0xa6   : > { %v2408_v14 = vcombine.low %v2382_v39, %v2396_v3  ;;  %v2409_v18 = vcombine.high %v2382_v39, %v2396_v3  ;;  %v1557_v48 = vrot.slane %v1519_v61, %v4433_v31  ;;  %v1571_v5 = vrot.slane %v1520_v6, %v4433_v31 }
  0xa7   : > { %v1454_v9 = vcombine.high %v4579_v37, %v4581_v52  ;;  %v2418_v24 = vrot.slane %v2404_v13, %v4433_v31  ;;  %v2432_v25 = vrot.slane %v2405_v17, %v4433_v31  ;;  %v1456_v46 = vcombine.high %v4583_v53, %v4585_v60 }
  0xa8   : > { %v2446_v10 = vrot.slane %v2408_v14, %v4433_v31  ;;  %v2460_v11 = vrot.slane %v2409_v18, %v4433_v31  ;;  %v4687_v15 = vcombine.high %v1529_v0, %v1557_v48  ;;  %v4689_v26 = vcombine.low %v1529_v0, %v1557_v48 }
  0xa9   : > { %v4691_v35 = vcombine.high %v1543_v7, %v1571_v5  ;;  %v4693_v27 = vcombine.low %v1543_v7, %v1571_v5  ;;  %v1458_v49 = vcombine.high %v4591_v1, %v4593_v4  ;;  %v1472_v58 = vrot.slane %v1452_v8, %v4433_v31 }
  0xaa   : > { %v4695_v36 = vcombine.high %v2418_v24, %v2446_v10  ;;  %v4697_v32 = vcombine.low %v2418_v24, %v2446_v10  ;;  %v4699_v40 = vcombine.high %v2432_v25, %v2460_v11  ;;  %v4701_v33 = vcombine.low %v2432_v25, %v2460_v11  ;;  %1612 = vrot.lane.b32.xlu1 %v4687_v15, %s4154_s18 }
  0xab   : > { %1608 = vrot.lane.b32.xlu0 %v4689_v26, %s4154_s18  ;;  %v1486_v16 = vrot.slane %v1454_v9, %v4433_v31  ;;  %v2341_v59 = vcombine.high %v4639_v41, %v4641_v62  ;;  %v2343_v45 = vcombine.high %v4643_v63, %v4645_v20  ;;  %v2345_v29 = vcombine.high %v4647_v42, %v4649_v21 }
  0xac   : > { %v1500_v50 = vrot.slane %v1456_v46, %v4433_v31  ;;  %v1514_v51 = vrot.slane %v1458_v49, %v4433_v31  ;;  %v2347_v56 = vcombine.high %v4651_v44, %v4653_v28  ;;  %v1110_v46 = vstv %s3851_s26  ;;  %s5023_s26 = sld [smem:[#allocation7 + $0x12]] }
  0xad   : > { %v1518_v54 = vcombine.high %v1472_v58, %v1486_v16  ;;  %v2361_v55 = vrot.slane %v2341_v59, %v4433_v31  ;;  %v2375_v57 = vrot.slane %v2343_v45, %v4433_v31  ;;  %v2389_v22 = vrot.slane %v2345_v29, %v4433_v31 }
  0xae   : > { %1614 = vrot.lane.b32.xlu1 %v4691_v35, %s4154_s18  ;;  %v1522_v23 = vcombine.high %v1500_v50, %v1514_v51  ;;  %v2403_v47 = vrot.slane %v2347_v56, %v4433_v31  ;;  %v1517_v43 = vcombine.low %v1472_v58, %v1486_v16  ;;  %v1521_v39 = vcombine.low %v1500_v50, %v1514_v51 }
  0xaf   : > { %1610 = vrot.lane.b32.xlu0 %v4693_v27, %s4154_s18  ;;  %v1550_v2 = vrot.slane %v1518_v54, %v4433_v31  ;;  %v2407_v38 = vcombine.high %v2361_v55, %v2375_v57  ;;  %v2406_v3 = vcombine.low %v2361_v55, %v2375_v57  ;;  %v4782_v49 = vmul.f32 %v1110_v46, %v4573_v30 }
  0xb0   : > { %v1578_v61 = vrot.slane %v1522_v23, %v4433_v31  ;;  %v2411_v0 = vcombine.high %v2389_v22, %v2403_v47  ;;  %v1536_v6 = vrot.slane %v1517_v43, %v4433_v31  ;;  %v2410_v7 = vcombine.low %v2389_v22, %v2403_v47 }
  0xb1   : > { %v2439_v13 = vrot.slane %v2407_v38, %v4433_v31  ;;  %v1564_v14 = vrot.slane %v1521_v39, %v4433_v31  ;;  %v2425_v48 = vrot.slane %v2406_v3, %v4433_v31  ;;  %v4785_v58 = vmul.f32 %v1110_v46, %v4575_v34 }
  0xb2   : > { %v4736_v17 = vcombine.low %v1550_v2, %v1578_v61  ;;  %v2467_v18 = vrot.slane %v2411_v0, %v4433_v31  ;;  %v2453_v5 = vrot.slane %v2410_v7, %v4433_v31  ;;  %v4788_v16 = vmul.f32 %v1110_v46, %v4579_v37 }
  0xb3   : > { %v4741_v8 = vcombine.low %v1536_v6, %v1564_v14  ;;  %v1582_v9 = vcombine.high %v1536_v6, %v1564_v14  ;;  %v4791_v59 = vmul.f32 %v1110_v46, %v4581_v52  ;;  %v4794_v45 = vmul.f32 %v1110_v46, %v4583_v53 }
  0xb4   : > { %v4743_v24 = vcombine.low %v2439_v13, %v2467_v18  ;;  %1618 = vrot.lane.b32.xlu1 %v4736_v17, %s4154_s18  ;;  %v4747_v10 = vcombine.low %v2425_v48, %v2453_v5  ;;  %v2471_v25 = vcombine.high %v2425_v48, %v2453_v5  ;;  %v4797_v29 = vmul.f32 %v1110_v46, %v4585_v60 }
  0xb5   : > { %1616 = vrot.lane.b32.xlu0 %v4741_v8, %s4154_s18  ;;  %1600 = vst.msk [vmem:[#allocation2 + $0x30] sm:$0xff] %vm1599_vm3, %v1582_v9  ;;  %v4802_v50 = vmul.f32 %v1110_v46, %v4591_v1  ;;  %v4805_v51 = vmul.f32 %v1110_v46, %v4593_v4  ;;  %v1127_v56 = vcombine.low %v4782_v49, %v4785_v58  ;;  %v1277_v57 = vstv %s3852_s22  ;;  %s5034_s22 = sld [smem:[#allocation7 + $0xd]] }
  0xb6   : > { %v1129_v54 = vcombine.low %v4788_v16, %v4791_v59  ;;  %v1131_v55 = vcombine.low %v4794_v45, %v4797_v29  ;;  %v4819_v23 = vmul.f32 %v1277_v57, %v4573_v30  ;;  %v4822_v47 = vmul.f32 %v1277_v57, %v4575_v34 }
  0xb7   : > { %v1141_v22 = vrot.slane %v1127_v56, %v4433_v31  ;;  %v4827_v38 = vmul.f32 %v1277_v57, %v4579_v37  ;;  %v1281_v39 = vmul.f32 %v1277_v57, %v4581_v52  ;;  %v1282_v30 = vmul.f32 %v1277_v57, %v4583_v53 }
  0xb8   : > { %1707 = vrot.lane.b32.xlu1 %v4689_v26, %s4155_s23  ;;  %v1155_v43 = vrot.slane %v1129_v54, %v4433_v31  ;;  %v1169_v2 = vrot.slane %v1131_v55, %v4433_v31  ;;  %v1283_v61 = vmul.f32 %v1277_v57, %v4585_v60  ;;  %v1284_v34 = vmul.f32 %v1277_v57, %v4591_v1 }
  0xb9   : > { %v1285_v37 = vmul.f32 %v1277_v57, %v4593_v4  ;;  %v1294_v52 = vcombine.low %v4819_v23, %v4822_v47 }
  0xba   : > { %v1191_v0 = vcombine.low %v1141_v22, %v1155_v43  ;;  %v1298_v7 = vcombine.low %v1282_v30, %v1283_v61  ;;  %v1192_v18 = vcombine.high %v1141_v22, %v1155_v43  ;;  %v5112_v43 = vld [vmem:[%s6538_s2 + $0x3] ss:$4 sm:$0x7f] }
  0xbb   : > { %v1300_v53 = vcombine.low %v1284_v34, %v1285_v37  ;;  %v1308_v60 = vrot.slane %v1294_v52, %v4433_v31  ;;  %v5120_v52 = vstv %s5000_s21  ;;  %s5525_s21 = sld [smem:[#allocation7 + $0xb]] }
  0xbc   : > { %v4754_v11 = vld [vmem:[#allocation2 + $0x30] sm:$0xff]  ;;  %1711 = vrot.lane.b32.xlu1 %v4687_v15, %s4155_s23  ;;  %v4843_v13 = vrot.slane %v1191_v0, %v4433_v31  ;;  %v1336_v14 = vrot.slane %v1298_v7, %v4433_v31  ;;  %v4861_v46 = vrot.slane %v1192_v18, %v4433_v31  ;;  %v1299_v7 = vcombine.high %v1282_v30, %v1283_v61  ;;  %v5131_v0 = vld [vmem:[%s6540_s4] sm:$0x7f] }
  0xbd   : > { %2488 = vst.msk [vmem:[#allocation2 + $0x30] sm:$0xff] %vm1599_vm3, %v2471_v25  ;;  %1620 = vrot.lane.b32.xlu0 %v4754_v11, %s4154_s18  ;;  %v1350_v48 = vrot.slane %v1300_v53, %v4433_v31  ;;  %v1301_v53 = vcombine.high %v1284_v34, %v1285_v37  ;;  %6696 = vst [vmem:[#allocation49_spill] sm:$0xff] %v5120_v52 }
  0xbe   : > { %6665 = vst [vmem:[#allocation18_spill] sm:$0xff] %v4861_v46 }
  0xbf   : > { %v1362_v56 = vcombine.low %v1336_v14, %v1350_v48  ;;  %v1363_v57 = vcombine.high %v1336_v14, %v1350_v48  ;;  %v1343_v48 = vrot.slane %v1299_v7, %v4433_v31  ;;  %v3847_v7 = vld [vmem:[%s6538_s2 + $0x1] ss:$4 sm:$0x7f] }
  0xc0   : > { %1715 = vrot.lane.b32.xlu1 %v4741_v8, %s4155_s23 }
  0xc1   : > { %1709 = vrot.lane.b32.xlu0 %v4693_v27, %s4155_s23  ;;  %v4876_v22 = vrot.slane %v1362_v56, %v4433_v31 }
  0xc4   : > { %1719 = vrot.lane.b32.xlu1 %v4754_v11, %s4155_s23 }
  0xc5   : > { %1713 = vrot.lane.b32.xlu0 %v4691_v35, %s4155_s23 }
  0xc8   : > { %1806 = vrot.lane.b32.xlu1 %v4693_v27, %s4156_s24 }
  0xc9   : > { %1717 = vrot.lane.b32.xlu0 %v4736_v17, %s4155_s23 }
  0xcc   : > { %1810 = vrot.lane.b32.xlu1 %v4691_v35, %s4156_s24 }
  0xcd   : > { %1804 = vrot.lane.b32.xlu0 %v4689_v26, %s4156_s24 }
  0xd0   : > { %1814 = vrot.lane.b32.xlu1 %v4736_v17, %s4156_s24 }
  0xd1   : > { %1808 = vrot.lane.b32.xlu0 %v4687_v15, %s4156_s24 }
  0xd4   : > { %1901 = vrot.lane.b32.xlu1 %v4689_v26, %s4157_s29  ;;  %v1133_v26 = vcombine.low %v4802_v50, %v4805_v51 }
  0xd5   : > { %1812 = vrot.lane.b32.xlu0 %v4741_v8, %s4156_s24 }
  0xd6   : > { %v1183_v3 = vrot.slane %v1133_v26, %v4433_v31  ;;  %v1128_v26 = vcombine.high %v4782_v49, %v4785_v58  ;;  %v1130_v49 = vcombine.high %v4788_v16, %v4791_v59  ;;  %v1134_v58 = vcombine.high %v4802_v50, %v4805_v51 }
  0xd7   : > { %v1295_v50 = vcombine.high %v4819_v23, %v4822_v47  ;;  %v1297_v51 = vcombine.high %v4827_v38, %v1281_v39 }
  0xd8   : > { %1905 = vrot.lane.b32.xlu1 %v4687_v15, %s4157_s29  ;;  %v1195_v6 = vcombine.low %v1169_v2, %v1183_v3  ;;  %v1296_v15 = vcombine.low %v4827_v38, %v1281_v39  ;;  %v1196_v5 = vcombine.high %v1169_v2, %v1183_v3  ;;  %v1148_v16 = vrot.slane %v1128_v26, %v4433_v31 }
  0xd9   : > { %1816 = vrot.lane.b32.xlu0 %v4754_v11, %s4156_s24  ;;  %v1162_v59 = vrot.slane %v1130_v49, %v4433_v31  ;;  %v1315_v14 = vrot.slane %v1295_v50, %v4433_v31  ;;  %v1329_v18 = vrot.slane %v1297_v51, %v4433_v31  ;;  %v1084_v50 = vld [vmem:[%s6538_s2] ss:$4 sm:$0x7f]  ;;  %v5005_v51 = vsub.s32 3, %v4403_v19 }
  0xda   : > { %v4849_v1 = vrot.slane %v1195_v6, %v4433_v31  ;;  %v1322_v4 = vrot.slane %v1296_v15, %v4433_v31  ;;  %v4864_v54 = vrot.slane %v1196_v5, %v4433_v31  ;;  %v1357_v5 = vrot.slane %v1301_v53, %v4433_v31 }
  0xdb   : > { %v1194_v47 = vcombine.high %v1148_v16, %v1162_v59  ;;  %v1360_v39 = vcombine.low %v1315_v14, %v1329_v18  ;;  %v1361_v61 = vcombine.high %v1315_v14, %v1329_v18  ;;  %6677 = vst [vmem:[#allocation30_spill] sm:$0xff] %v5005_v51  ;;  %v5015_v53 = vsub.s32 1, %v4403_v19 }
  0xdc   : > { %1909 = vrot.lane.b32.xlu1 %v4741_v8, %s4157_s29  ;;  %v1358_v25 = vcombine.low %v1308_v60, %v1322_v4  ;;  %6666 = vst [vmem:[#allocation19_spill] sm:$0xff] %v4864_v54  ;;  %v1359_v55 = vcombine.high %v1308_v60, %v1322_v4  ;;  %v1193_v60 = vcombine.low %v1148_v16, %v1162_v59  ;;  %v5029_v14 = vsub.s32 0, %v4403_v19 }
  0xdd   : > { %1903 = vrot.lane.b32.xlu0 %v4693_v27, %s4157_s29  ;;  %v1364_v30 = vcombine.low %v1343_v48, %v1357_v5  ;;  %v1365_v34 = vcombine.high %v1343_v48, %v1357_v5  ;;  %v4932_v56 = vrot.slane %v1194_v47, %v4433_v31  ;;  %v4944_v49 = vrot.slane %v1361_v61, %v4433_v31  ;;  %v3848_v61 = vld [vmem:[%s6538_s2 + $0x2] ss:$4 sm:$0x7f] }
  0xde   : > { %v4869_v27 = vrot.slane %v1358_v25, %v4433_v31  ;;  %v4881_v2 = vrot.slane %v1359_v55, %v4433_v31  ;;  %v5032_v18 = vsub.s32 6, %v4403_v19  ;;  %v5041_v48 = vand.u32 127, %v6549_v12 }
  0xdf   : > { %6671 = vst [vmem:[#allocation24_spill] sm:$0xff] %v4932_v56  ;;  %v4941_v26 = vrot.slane %v1364_v30, %v4433_v31  ;;  %6675 = vst [vmem:[#allocation28_spill] sm:$0xff] %v4944_v49  ;;  %v5044_v5 = vrot.slane %v1084_v50, %v5005_v51  ;;  %v5046_v47 = vstv %s3853_s27  ;;  %v5064_v30 = vrot.slane %v3847_v7, %v5015_v53  ;;  %s5580_s27 = sld [smem:[#allocation10]] }
  0xe0   : > { %1913 = vrot.lane.b32.xlu1 %v4754_v11, %s4157_s29  ;;  %6667 = vst [vmem:[#allocation20_spill] sm:$0xff] %v4881_v2  ;;  %v4884_v11 = vrot.slane %v1363_v57, %v4433_v31  ;;  %v4938_v57 = vrot.slane %v1360_v39, %v4433_v31  ;;  %v5075_v12 = vrot.slane %v1084_v50, %v5029_v14  ;;  %v5084_v59 = vstv %s4989_s30  ;;  %s5621_s30 = sld [smem:[#allocation10 + $0x3]] }
  0xe1   : > { %1907 = vrot.lane.b32.xlu0 %v4691_v35, %s4157_s29  ;;  %v1132_v35 = vcombine.high %v4794_v45, %v4797_v29  ;;  %v1190_v29 = vrot.slane %v1134_v58, %v4433_v31  ;;  %6674 = vst [vmem:[#allocation27_spill] sm:$0xff] %v4941_v26  ;;  %6679 = vst [vmem:[#allocation32_spill] sm:$0xff] %v5044_v5  ;;  %v5087_v25 = vstv %s4993_s12  ;;  %vm1624_vm4 = vcmp.lt.s32.totalorder %v5041_v48, 1  ;;  %s5631_s12 = sld [smem:[#allocation11 + $0x1]] }
  0xe2   : > { %6668 = vst [vmem:[#allocation21_spill] sm:$0xff] %v4884_v11  ;;  %6673 = vst [vmem:[#allocation26_spill] sm:$0xff] %v4938_v57  ;;  %v5090_v16 = vrot.slane %v3847_v7, %v5005_v51  ;;  %v5104_v3 = vrot.slane %v3847_v7, %v5032_v18  ;;  %v5107_v6 = vrot.slane %v3848_v61, %v5015_v53  ;;  %v1999_v49 = vstv %s5034_s22  ;;  %s5556_s22 = sld [smem:[#allocation7 + $0x1c]] }
  0xe3   : > { %v1176_v45 = vrot.slane %v1132_v35, %v4433_v31  ;;  %v4947_v35 = vrot.slane %v1365_v34, %v4433_v31  ;;  %6683 = vst [vmem:[#allocation36_spill] sm:$0xff] %v5064_v30  ;;  %6685 = vst [vmem:[#allocation38_spill] sm:$0xff] %v5075_v12  ;;  %v5126_v8 = vrot.slane %v3848_v61, %v5005_v51  ;;  %vm1721_vm5 = vcmp.lt.s32.totalorder %v5041_v48, 27 }
  0xe4   : > { %2498 = vrot.lane.b32.xlu1 %v4701_v33, %s4154_s18  ;;  %6688 = vst [vmem:[#allocation41_spill] sm:$0xff] %v5087_v25  ;;  %6689 = vst [vmem:[#allocation42_spill] sm:$0xff] %v5090_v16  ;;  %v5149_v56 = vrot.slane %v5112_v43, %v5015_v53  ;;  %vm1818_vm6 = vcmp.lt.s32.totalorder %v5041_v48, 28  ;;  %vm1915_vm7 = vcmp.lt.s32.totalorder %v5041_v48, 29 }
  0xe5   : > { %1911 = vrot.lane.b32.xlu0 %v4736_v17, %s4157_s29  ;;  %v1197_v4 = vcombine.low %v1176_v45, %v1190_v29  ;;  %v4920_v17 = vrot.slane %v1193_v60, %v4433_v31  ;;  %v1198_v38 = vcombine.high %v1176_v45, %v1190_v29  ;;  %6676 = vst [vmem:[#allocation29_spill] sm:$0xff] %v4947_v35  ;;  %v4965_v29 = vld [vmem:[#allocation2 + $0x30] sm:$0xff]  ;;  %v5018_v60 = vsub.s32 2, %v4403_v19 }
  0xe6   : > { %v5078_v45 = vrot.slane %v1084_v50, %v5032_v18  ;;  %6693 = vst [vmem:[#allocation46_spill] sm:$0xff] %v5104_v3  ;;  %6694 = vst [vmem:[#allocation47_spill] sm:$0xff] %v5107_v6  ;;  %v5141_v35 = vrot.slane %v3848_v61, %v5029_v14 }
  0xe7   : > { %6669 = vst [vmem:[#allocation22_spill] sm:$0xff] %v4920_v17  ;;  %v4923_v23 = vrot.slane %v1197_v4, %v4433_v31  ;;  %v4935_v55 = vrot.slane %v1198_v38, %v4433_v31  ;;  %v5026_v4 = vsub.s32 5, %v4403_v19  ;;  %v5048_v38 = vstv %s3854_s25  ;;  %6698 = vst [vmem:[#allocation51_spill] sm:$0xff] %v5126_v8  ;;  %s5591_s25 = sld [smem:[#allocation10 + $0x1]] }
  0xe8   : > { %2502 = vrot.lane.b32.xlu1 %v4699_v40, %s4154_s18  ;;  %6686 = vst [vmem:[#allocation39_spill] sm:$0xff] %v5078_v45  ;;  %v5081_v58 = vrot.slane %v3847_v7, %v5018_v60  ;;  %6701 = vst [vmem:[#allocation54_spill] sm:$0xff] %v5141_v35  ;;  %v2004_v35 = vmul.f32 %v1999_v49, %v4647_v42 }
  0xe9   : > { %6670 = vst [vmem:[#allocation23_spill] sm:$0xff] %v4923_v23  ;;  %2496 = vrot.lane.b32.xlu0 %v4697_v32, %s4154_s18  ;;  %6672 = vst [vmem:[#allocation25_spill] sm:$0xff] %v4935_v55  ;;  %v5072_v34 = vrot.slane %v1084_v50, %v5026_v4  ;;  %v5101_v15 = vrot.slane %v3847_v7, %v5026_v4  ;;  %v5138_v9 = vrot.slane %v3848_v61, %v5026_v4 }
  0xea   : > { %6687 = vst [vmem:[#allocation40_spill] sm:$0xff] %v5081_v58  ;;  %v5145_v55 = vrot.slane %v3848_v61, %v5032_v18  ;;  %6703 = vst [vmem:[#allocation56_spill] sm:$0xff] %v5149_v56  ;;  %v5171_v56 = vstv %s5036_s19  ;;  %s5567_s19 = sld [smem:[#allocation7 + $0x9]] }
  0xeb   : > { %6684 = vst [vmem:[#allocation37_spill] sm:$0xff] %v5072_v34  ;;  %6692 = vst [vmem:[#allocation45_spill] sm:$0xff] %v5101_v15  ;;  %v5153_v15 = vrot.slane %v5112_v43, %v5018_v60  ;;  %v2003_v34 = vmul.f32 %v1999_v49, %v4645_v20 }
  0xec   : > { %2506 = vrot.lane.b32.xlu1 %v4743_v24, %s4154_s18  ;;  %6700 = vst [vmem:[#allocation53_spill] sm:$0xff] %v5138_v9  ;;  %6702 = vst [vmem:[#allocation55_spill] sm:$0xff] %v5145_v55  ;;  %v5161_v9 = vstv %s5023_s26  ;;  %v2166_v55 = vstv %s5050_s15  ;;  %s5545_s26 = sld [smem:[#allocation7 + $0xa]] }
  0xed   : > { %2500 = vrot.lane.b32.xlu0 %v4695_v36, %s4154_s18  ;;  %6704 = vst [vmem:[#allocation57_spill] sm:$0xff] %v5153_v15  ;;  %6706 = vst [vmem:[#allocation59_spill] sm:$0xff] %v5161_v9  ;;  %v5174_v15 = vstv %s5069_s13  ;;  %v2002_v9 = vmul.f32 %v1999_v49, %v4643_v63  ;;  %v5185_v45 = vmul.f32 %v2166_v55, %v4639_v41  ;;  %s5573_s15 = sld [smem:[#allocation7 + $0x1b]] }
  0xee   : > { %v5188_v26 = vmul.f32 %v2166_v55, %v4641_v62  ;;  %v5193_v17 = vmul.f32 %v2166_v55, %v4643_v63  ;;  %v5199_v8 = vmul.f32 %v2166_v55, %v4647_v42  ;;  %v5213_v63 = vmul.f32 %v2166_v55, %v4651_v44  ;;  %s5606_s13 = sld [smem:[#allocation11]] }
  0xef   : > { %v5220_v42 = vrot.slane %v5112_v43, %v5005_v51  ;;  %v2019_v11 = vcombine.high %v2002_v9, %v2003_v34 }
  0xf0   : > { %2556 = vrot.lane.b32.xlu1 %v4697_v32, %s4155_s23 }
  0xf1   : > { %2504 = vrot.lane.b32.xlu0 %v4747_v10, %s4154_s18  ;;  %6707 = vst [vmem:[#allocation60_spill] sm:$0xff] %v5220_v42  ;;  %v2183_v42 = vcombine.low %v5185_v45, %v5188_v26 }
  0xf4   : > { %2560 = vrot.lane.b32.xlu1 %v4695_v36, %s4155_s23 }
  0xf5   : > { %2508 = vrot.lane.b32.xlu0 %v4965_v29, %s4154_s18  ;;  %s5643_s18 = sld [smem:[#allocation10 + $0x4]] }
  0xf8   : > { %2564 = vrot.lane.b32.xlu1 %v4747_v10, %s4155_s23 }
  0xf9   : > { %2558 = vrot.lane.b32.xlu0 %v4701_v33, %s4155_s23 }
  0xfc   : > { %2568 = vrot.lane.b32.xlu1 %v4965_v29, %s4155_s23 }
  0xfd   : > { %2562 = vrot.lane.b32.xlu0 %v4699_v40, %s4155_s23 }
 0x100   : > { %2618 = vrot.lane.b32.xlu1 %v4701_v33, %s4156_s24 }
 0x101   : > { %2566 = vrot.lane.b32.xlu0 %v4743_v24, %s4155_s23  ;;  %s5010_s23 = sld [smem:[#allocation7]] }
 0x104   : > { %2622 = vrot.lane.b32.xlu1 %v4699_v40, %s4156_s24 }
 0x105   : > { %2616 = vrot.lane.b32.xlu0 %v4697_v32, %s4156_s24 }
 0x107   : > { %v5156_v3 = vstv %s5010_s23  ;;  %s5534_s23 = sld [smem:[#allocation7 + $0x1d]] }
 0x108   : > { %2626 = vrot.lane.b32.xlu1 %v4743_v24, %s4156_s24  ;;  %6705 = vst [vmem:[#allocation58_spill] sm:$0xff] %v5156_v3  ;;  %v2000_v3 = vmul.f32 %v1999_v49, %v4639_v41 }
 0x109   : > { %2620 = vrot.lane.b32.xlu0 %v4695_v36, %s4156_s24 }
 0x10c   : > { %2676 = vrot.lane.b32.xlu1 %v4697_v32, %s4157_s29  ;;  %v5021_v32 = vsub.s32 4, %v4403_v19  ;;  %v5055_v19 = vrot.slane %v1084_v50, %v5015_v53 }
 0x10d   : > { %2624 = vrot.lane.b32.xlu0 %v4747_v10, %s4156_s24 }
 0x10e   : > { %6678 = vst [vmem:[#allocation31_spill] sm:$0xff] %v5021_v32  ;;  %6680 = vst [vmem:[#allocation33_spill] sm:$0xff] %v5055_v19  ;;  %v5061_v39 = vrot.slane %v1084_v50, %v5021_v32  ;;  %v5093_v37 = vrot.slane %v3847_v7, %v5021_v32 }
 0x110   : > { %2680 = vrot.lane.b32.xlu1 %v4695_v36, %s4157_s29  ;;  %v5058_v36 = vrot.slane %v1084_v50, %v5018_v60  ;;  %6682 = vst [vmem:[#allocation35_spill] sm:$0xff] %v5061_v39  ;;  %6690 = vst [vmem:[#allocation43_spill] sm:$0xff] %v5093_v37  ;;  %v5098_v50 = vrot.slane %v3847_v7, %v5029_v14  ;;  %v5123_v7 = vrot.slane %v3848_v61, %v5018_v60 }
 0x111   : > { %2628 = vrot.lane.b32.xlu0 %v4965_v29, %s4156_s24  ;;  %v5196_v37 = vmul.f32 %v2166_v55, %v4645_v20  ;;  %v5216_v20 = vmul.f32 %v2166_v55, %v4653_v28  ;;  %v5259_v39 = vrot.slane %v5112_v43, %v5029_v14  ;;  %s5611_s24 = sld [smem:[#allocation10 + $0x2]] }
 0x112   : > { %6681 = vst [vmem:[#allocation34_spill] sm:$0xff] %v5058_v36  ;;  %6691 = vst [vmem:[#allocation44_spill] sm:$0xff] %v5098_v50 }
 0x113   : > { %6697 = vst [vmem:[#allocation50_spill] sm:$0xff] %v5123_v7  ;;  %v2189_v16 = vcombine.low %v5213_v63, %v5216_v20  ;;  %6709 = vst [vmem:[#allocation62_spill] sm:$0xff] %v5259_v39 }
 0x114   : > { %2684 = vrot.lane.b32.xlu1 %v4747_v10, %s4157_s29  ;;  %v5117_v10 = vstv %s4995_s28  ;;  %s5204_s28 = sld [smem:[#allocation7 + $0xc]] }
 0x115   : > { %2678 = vrot.lane.b32.xlu0 %v4701_v33, %s4157_s29  ;;  %6695 = vst [vmem:[#allocation48_spill] sm:$0xff] %v5117_v10  ;;  %v5135_v33 = vrot.slane %v3848_v61, %v5021_v32  ;;  %v2005_v61 = vmul.f32 %v1999_v49, %v4649_v21 }
 0x117   : > { %6699 = vst [vmem:[#allocation52_spill] sm:$0xff] %v5135_v33  ;;  %v2006_v33 = vmul.f32 %v1999_v49, %v4651_v44  ;;  %v2018_v44 = vcombine.low %v2002_v9, %v2003_v34  ;;  %v2020_v7 = vcombine.low %v2004_v35, %v2005_v61  ;;  %v2021_v2 = vcombine.high %v2004_v35, %v2005_v61 }
 0x118   : > { %2688 = vrot.lane.b32.xlu1 %v4965_v29, %s4157_s29  ;;  %v2001_v29 = vmul.f32 %v1999_v49, %v4641_v62  ;;  %v5267_v9 = vrot.slane %v5112_v43, %v5032_v18  ;;  %v2197_v35 = vrot.slane %v2183_v42, %v4433_v31 }
 0x119   : > { %2682 = vrot.lane.b32.xlu0 %v4699_v40, %s4157_s29  ;;  %v2007_v40 = vmul.f32 %v1999_v49, %v4653_v28  ;;  %v5202_v49 = vmul.f32 %v2166_v55, %v4649_v21  ;;  %v5224_v21 = vrot.slane %v5112_v43, %v5021_v32  ;;  %v2044_v46 = vrot.slane %v2018_v44, %v4433_v31 }
 0x11a   : > { %v2016_v41 = vcombine.low %v2000_v3, %v2001_v29  ;;  %v2017_v51 = vcombine.high %v2000_v3, %v2001_v29  ;;  %v2058_v25 = vrot.slane %v2020_v7, %v4433_v31  ;;  %6711 = vst [vmem:[#allocation64_spill] sm:$0xff] %v5267_v9  ;;  %v5270_v3 = vstv %s5204_s28  ;;  %s5647_s28 = sld [smem:[#allocation10 + $0x5]] }
 0x11b   : > { %6708 = vst [vmem:[#allocation61_spill] sm:$0xff] %v5224_v21  ;;  %v2022_v52 = vcombine.low %v2006_v33, %v2007_v40  ;;  %v2185_v21 = vcombine.low %v5193_v17, %v5196_v37  ;;  %v2023_v6 = vcombine.high %v2006_v33, %v2007_v40  ;;  %6712 = vst [vmem:[#allocation65_spill] sm:$0xff] %v5270_v3 }
 0x11c   : > { %v1613_v57 = vpop.permute.xlu1 %1612  ;;  %v2030_v54 = vrot.slane %v2016_v41, %v4433_v31  ;;  %v2239_v7 = vrot.slane %v2189_v16, %v4433_v31  ;;  %v2037_v61 = vrot.slane %v2017_v51, %v4433_v31  ;;  %v2051_v29 = vrot.slane %v2019_v11, %v4433_v31 }
 0x11d   : > { %v5190_v23 = vpop.permute.xlu0 %1608  ;;  %2686 = vrot.lane.b32.xlu0 %v4743_v24, %s4157_s29  ;;  %v2187_v24 = vcombine.low %v5199_v8, %v5202_v49  ;;  %v2211_v34 = vrot.slane %v2185_v21, %v4433_v31  ;;  %v2065_v40 = vrot.slane %v2021_v2, %v4433_v31  ;;  %s5280_s29 = sld [smem:[#allocation7 + $0x1e]]  ;;  %v2184_v9 = vcombine.high %v5185_v45, %v5188_v26 }
 0x11e   : > { %v2081_v44 = vcombine.high %v2030_v54, %v2044_v46  ;;  %v2080_v42 = vcombine.low %v2030_v54, %v2044_v46  ;;  %v2186_v46 = vcombine.high %v5193_v17, %v5196_v37  ;;  %v2188_v45 = vcombine.high %v5199_v8, %v5202_v49 }
 0x11f   : > { %v2248_v11 = vcombine.high %v2197_v35, %v2211_v34  ;;  %v2247_v2 = vcombine.low %v2197_v35, %v2211_v34 }
 0x120   : > { %v1615_v28 = vpop.permute.xlu1 %1614  ;;  %v5304_v35 = vrot.slane %v2080_v42, %v4433_v31 }
 0x121   : > { %v1611_v55 = vpop.permute.xlu0 %1610  ;;  %v5240_v62 = vsel %vm1624_vm4, %v1613_v57, %v1615_v28  ;;  %v5310_v17 = vrot.slane %v2248_v11, %v4433_v31  ;;  %v5320_v34 = vrot.slane %v2247_v2, %v4433_v31 }
 0x122   : > { %v5244_v32 = vsel %vm1624_vm4, %v1611_v55, %v1613_v57  ;;  %v5249_v10 = vsel %vm1624_vm4, %v5190_v23, %v1611_v55  ;;  %v2072_v57 = vrot.slane %v2022_v52, %v4433_v31  ;;  %v5263_v55 = vrot.slane %v5112_v43, %v5026_v4  ;;  %6715 = vst [vmem:[#allocation68_spill] sm:$0xff] %v5304_v35  ;;  %v6737_v35 = vld [vmem:[#allocation19_spill] sm:$0xff] }
 0x123   : > { %v2225_v52 = vrot.slane %v2187_v24, %v4433_v31  ;;  %v2079_v43 = vrot.slane %v2023_v6, %v4433_v31  ;;  %6717 = vst [vmem:[#allocation70_spill] sm:$0xff] %v5310_v17  ;;  %6719 = vst [vmem:[#allocation72_spill] sm:$0xff] %v5320_v34 }
 0x124   : > { %6710 = vst [vmem:[#allocation63_spill] sm:$0xff] %v5263_v55  ;;  %v2085_v3 = vcombine.high %v2058_v25, %v2072_v57  ;;  %v2084_v21 = vcombine.low %v2058_v25, %v2072_v57  ;;  %v2082_v25 = vcombine.low %v2037_v61, %v2051_v29  ;;  %v2083_v57 = vcombine.high %v2037_v61, %v2051_v29 }
 0x125   : > { %v2252_v51 = vcombine.high %v2225_v52, %v2239_v7  ;;  %v2251_v6 = vcombine.low %v2225_v52, %v2239_v7  ;;  %v2086_v55 = vcombine.low %v2065_v40, %v2079_v43  ;;  %v2087_v39 = vcombine.high %v2065_v40, %v2079_v43 }
 0x126   : > { %v1619_v33 = vpop.permute.xlu1 %1618  ;;  %v5307_v26 = vrot.slane %v2084_v21, %v4433_v31  ;;  %v2204_v7 = vrot.slane %v2184_v9, %v4433_v31  ;;  %v2218_v61 = vrot.slane %v2186_v46, %v4433_v31  ;;  %v5328_v40 = vrot.slane %v2082_v25, %v4433_v31 }
 0x127   : > { %v1617_v41 = vpop.permute.xlu0 %1616  ;;  %v5313_v37 = vrot.slane %v2252_v51, %v4433_v31  ;;  %v5323_v52 = vrot.slane %v2251_v6, %v4433_v31  ;;  %v5331_v43 = vrot.slane %v2083_v57, %v4433_v31  ;;  %v5334_v8 = vrot.slane %v2086_v55, %v4433_v31 }
 0x128   : > { %v5284_v24 = vsel %vm1624_vm4, %v1617_v41, %v1619_v33  ;;  %v5288_v16 = vsel %vm1624_vm4, %v1615_v28, %v1617_v41  ;;  %v5298_v28 = vrot.slane %v2081_v44, %v4433_v31  ;;  %v5301_v41 = vrot.slane %v2085_v3, %v4433_v31  ;;  %6716 = vst [vmem:[#allocation69_spill] sm:$0xff] %v5307_v26 }
 0x129   : > { %6718 = vst [vmem:[#allocation71_spill] sm:$0xff] %v5313_v37  ;;  %v2190_v3 = vcombine.high %v5213_v63, %v5216_v20  ;;  %6720 = vst [vmem:[#allocation73_spill] sm:$0xff] %v5323_v52  ;;  %v5337_v49 = vrot.slane %v2087_v39, %v4433_v31  ;;  %v5342_v9 = vstv %s5280_s29  ;;  %v5356_v55 = vrot.slane %v2188_v45, %v4433_v31  ;;  %s5657_s29 = sld [smem:[#allocation11 + $0x2]] }
 0x12a   : > { %v5295_v54 = vpop.permute.xlu1 %1707  ;;  %6713 = vst [vmem:[#allocation66_spill] sm:$0xff] %v5298_v28  ;;  %6714 = vst [vmem:[#allocation67_spill] sm:$0xff] %v5301_v41  ;;  %v2249_v6 = vcombine.low %v2204_v7, %v2218_v61  ;;  %v2250_v57 = vcombine.high %v2204_v7, %v2218_v61  ;;  %v6745_v41 = vld [vmem:[#allocation42_spill] sm:$0xff] }
 0x12b   : > { %6721 = vst [vmem:[#allocation74_spill] sm:$0xff] %v5328_v40  ;;  %6722 = vst [vmem:[#allocation75_spill] sm:$0xff] %v5331_v43  ;;  %v5359_v11 = vrot.slane %v2190_v3, %v4433_v31  ;;  %v1671_v3 = vmul.f32 %v5044_v5, %v5240_v62  ;;  %v6726_v62 = vrot.slane %v5131_v0, %v5029_v14 }
 0x12c   : > { %6723 = vst [vmem:[#allocation76_spill] sm:$0xff] %v5334_v8  ;;  %6724 = vst [vmem:[#allocation77_spill] sm:$0xff] %v5337_v49  ;;  %v5398_v51 = vrot.slane %v2249_v6, %v4433_v31  ;;  %v6731_v49 = vcombine.low %v4869_v27, %v4876_v22 }
 0x12d   : > { %6725 = vst [vmem:[#allocation78_spill] sm:$0xff] %v5342_v9  ;;  %v5409_v8 = vmul.f32 %v5046_v47, %v1671_v3  ;;  %v5412_v6 = vmul.f32 %v5048_v38, %v1671_v3  ;;  %v6730_v3 = vcombine.low %v4843_v13, %v4849_v1 }
 0x12e   : > { %v1712_v29 = vpop.permute.xlu1 %1711 }
 0x12f   : > { %v1621_v63 = vpop.permute.xlu0 %1620 }
 0x130   : > { %v5350_v21 = vsel %vm1624_vm4, %v1619_v33, %v1621_v63  ;;  %v1631_v39 = vsel %vm1624_vm4, %v1621_v63, %v5190_v23  ;;  %v1669_v33 = vmul.f32 %v5055_v19, %v5249_v10  ;;  %v1670_v23 = vmul.f32 %v5058_v36, %v5244_v32 }
 0x131   : > { %v1668_v63 = vmul.f32 %v5075_v12, %v1631_v39  ;;  %v6727_v10 = vrot.slane %v5131_v0, %v5018_v60  ;;  %v6728_v32 = vrot.slane %v5131_v0, %v5015_v53 }
 0x132   : > { %v1716_v46 = vpop.permute.xlu1 %1715  ;;  %v867_v42 = vpop.f32.mrf.mxu0 }
 0x133   : > { %v1710_v2 = vpop.permute.xlu0 %1709  ;;  %v868_v61 = vadd.f32 %v867_v42, %v6726_v62  ;;  %v938_v39 = vpop.f32.mrf.mxu1  ;;  %v1693_v5 = vmul.f32 %v5048_v38, %v1668_v63 }
 0x134   : > { %v1726_v25 = vsel %vm1721_vm5, %v1710_v2, %v1712_v29  ;;  %v1727_v7 = vsel %vm1721_vm5, %v5295_v54, %v1710_v2  ;;  %v869_v44 = vpop.f32.mrf.mxu0  ;;  %v939_v20 = vadd.f32 %v938_v39, %v6727_v10  ;;  %v1677_v2 = vmul.f32 %v5046_v47, %v1668_v63 }
 0x135   : > { %v1093_v42 = vadd.f32 %v5171_v56, %v868_v61  ;;  %v1102_v62 = vadd.f32 %v5174_v15, %v868_v61  ;;  %v870_v45 = vadd.f32 %v869_v44, %v6728_v32  ;;  %v940_v12 = vpop.f32.mrf.mxu1  ;;  %v5416_v61 = vrot.slane %v2250_v57, %v4433_v31 }
 0x136   : > { %v1720_v14 = vpop.permute.xlu1 %1719  ;;  %v1678_v10 = vmul.f32 %v5046_v47, %v1669_v33  ;;  %v1679_v57 = vmul.f32 %v5046_v47, %v1670_v23  ;;  %v1104_v34 = vadd.f32 %v5174_v15, %v939_v20 }
 0x137   : > { %v1714_v40 = vpop.permute.xlu0 %1713  ;;  %6729 = vst [vmem:[#allocation79_spill] sm:$0xff] %v5416_v61  ;;  %v1728_v44 = vsel %vm1721_vm5, %v1720_v14, %v5295_v54  ;;  %v1269_v39 = vadd.f32 %v6730_v3, %v1093_v42  ;;  %v1436_v43 = vadd.f32 %v6731_v49, %v1102_v62  ;;  %v5436_v52 = vpop.f32.mrf.mxu1  ;;  %v1095_v54 = vadd.f32 %v5171_v56, %v939_v20 }
 0x138   : > { %v5420_v60 = vsel %vm1721_vm5, %v1714_v40, %v1716_v46  ;;  %v1725_v53 = vsel %vm1721_vm5, %v1712_v29, %v1714_v40  ;;  %v1765_v32 = vmul.f32 %v5098_v50, %v1728_v44  ;;  %v1094_v42 = vadd.f32 %v5171_v56, %v870_v45 }
 0x139   : > { %v1684_v40 = vadd.f32 %v1677_v2, %v1269_v39  ;;  %v1694_v3 = vmul.f32 %v5048_v38, %v1669_v33  ;;  %v1766_v44 = vmul.f32 %v5064_v30, %v1727_v7  ;;  %v1767_v50 = vmul.f32 %v5081_v58, %v1726_v25  ;;  %v3953_v49 = vpop.f32.mrf.mxu1  ;;  %v6732_v33 = vld [vmem:[#allocation35_spill] sm:$0xff]  ;;  %v6733_v7 = vld [vmem:[#allocation41_spill] sm:$0xff] }
 0x13a   : > { %v1807_v29 = vpop.permute.xlu1 %1806  ;;  %v1695_v62 = vmul.f32 %v5048_v38, %v1670_v23  ;;  %v1774_v2 = vmul.f32 %v5084_v59, %v1765_v32  ;;  %v5457_v63 = vmul.f32 %v6732_v33, %v5288_v16  ;;  %v1790_v25 = vmul.f32 %v6733_v7, %v1765_v32 }
 0x13b   : > { %v1718_v9 = vpop.permute.xlu0 %1717  ;;  %v1700_v58 = vadd.f32 %v1693_v5, %v1436_v43  ;;  %v6734_v23 = vcombine.high %v4843_v13, %v4849_v1  ;;  %v1775_v32 = vmul.f32 %v5084_v59, %v1766_v44  ;;  %v1776_v5 = vmul.f32 %v5084_v59, %v1767_v50 }
 0x13c   : > { %v5449_v39 = vsel %vm1721_vm5, %v1718_v9, %v1720_v14  ;;  %v5453_v20 = vsel %vm1721_vm5, %v1716_v46, %v1718_v9  ;;  %v5463_v36 = vadd.f32 %v1774_v2, %v1684_v40  ;;  %v6735_v14 = vcombine.high %v4869_v27, %v4876_v22  ;;  %v6736_v46 = vld [vmem:[#allocation18_spill] sm:$0xff]  ;;  %v1009_v40 = vpop.f32.mrf.mxu0  ;;  %v6740_v2 = vld [vmem:[#allocation20_spill] sm:$0xff] }
 0x13d   : > { %v1271_v49 = vadd.f32 %v6734_v23, %v1095_v54  ;;  %v1103_v9 = vadd.f32 %v5174_v15, %v870_v45  ;;  %v6738_v16 = vcombine.low %v6736_v46, %v6737_v35  ;;  %v1791_v13 = vmul.f32 %v6733_v7, %v1766_v44  ;;  %v6739_v54 = vld [vmem:[#allocation47_spill] sm:$0xff]  ;;  %v6741_v23 = vld [vmem:[#allocation21_spill] sm:$0xff] }
 0x13e   : > { %v1811_v30 = vpop.permute.xlu1 %1810  ;;  %v1438_v26 = vadd.f32 %v6735_v14, %v1104_v34  ;;  %v1792_v1 = vmul.f32 %v6733_v7, %v1767_v50  ;;  %v5481_v22 = vadd.f32 %v1790_v25, %v1700_v58  ;;  %v6742_v14 = vcombine.low %v6740_v2, %v6741_v23  ;;  %v6743_v50 = vld [vmem:[#allocation30_spill] sm:$0xff]  ;;  %v6748_v25 = vld [vmem:[#allocation48_spill] sm:$0xff] }
 0x13f   : > { %v1270_v33 = vadd.f32 %v6738_v16, %v1094_v42  ;;  %v5476_v43 = vpop.permute.xlu0 %1804  ;;  %v1686_v34 = vadd.f32 %v1679_v57, %v1271_v49  ;;  %v6744_v37 = vrot.slane %v5131_v0, %v6743_v50  ;;  %v1768_v28 = vmul.f32 %v6745_v41, %v1725_v53  ;;  %v6746_v57 = vld [vmem:[#allocation31_spill] sm:$0xff] }
 0x140   : > { %v1824_v27 = vsel %vm1818_vm6, %v5476_v43, %v1807_v29  ;;  %v1702_v45 = vadd.f32 %v1695_v62, %v1438_v26  ;;  %v1437_v16 = vadd.f32 %v6742_v14, %v1103_v9  ;;  %v6747_v26 = vrot.slane %v5131_v0, %v6746_v57  ;;  %v6754_v57 = vld [vmem:[#allocation43_spill] sm:$0xff] }
 0x141   : > { %v1863_v42 = vmul.f32 %v6739_v54, %v1824_v27  ;;  %v1685_v44 = vadd.f32 %v1678_v10, %v1270_v33  ;;  %v941_v17 = vadd.f32 %v940_v12, %v6744_v37  ;;  %v1783_v61 = vadd.f32 %v1776_v5, %v1686_v34  ;;  %v6749_v27 = vld [vmem:[#allocation49_spill] sm:$0xff] }
 0x142   : > { %v5491_v19 = vpop.permute.xlu1 %1814  ;;  %v1799_v58 = vadd.f32 %v1792_v1, %v1702_v45  ;;  %v1010_v62 = vadd.f32 %v1009_v40, %v6747_v26  ;;  %v1701_v10 = vadd.f32 %v1694_v3, %v1437_v16  ;;  %v6750_v1 = vld [vmem:[#allocation50_spill] sm:$0xff]  ;;  %v6751_v40 = vld [vmem:[#allocation51_spill] sm:$0xff]  ;;  %v6752_v3 = vcombine.high %v6736_v46, %v6737_v35 }
 0x143   : > { %v1872_v49 = vmul.f32 %v6748_v25, %v1863_v42  ;;  %v1888_v54 = vmul.f32 %v6749_v27, %v1863_v42  ;;  %v1809_v9 = vpop.permute.xlu0 %1808  ;;  %v1782_v33 = vadd.f32 %v1775_v32, %v1685_v44  ;;  %v1096_v53 = vadd.f32 %v5171_v56, %v941_v17 }
 0x144   : > { %v1822_v12 = vsel %vm1818_vm6, %v1809_v9, %v1811_v30  ;;  %v1823_v37 = vsel %vm1818_vm6, %v1807_v29, %v1809_v9  ;;  %v1105_v5 = vadd.f32 %v5174_v15, %v941_v17  ;;  %v1798_v14 = vadd.f32 %v1791_v13, %v1701_v10 }
 0x145   : > { %v1864_v34 = vmul.f32 %v6750_v1, %v1823_v37  ;;  %v1865_v45 = vmul.f32 %v6751_v40, %v1822_v12  ;;  %v5506_v50 = vadd.f32 %v1872_v49, %v1782_v33  ;;  %v1272_v32 = vadd.f32 %v6752_v3, %v1096_v53  ;;  %v6756_v37 = vld [vmem:[#allocation22_spill] sm:$0xff]  ;;  %v6757_v53 = vld [vmem:[#allocation23_spill] sm:$0xff]  ;;  %v6819_v1 = vld [vmem:[#allocation65_spill] sm:$0xff] }
 0x146   : > { %v5508_v42 = vpop.permute.xlu1 %1901  ;;  %v6753_v29 = vcombine.high %v6740_v2, %v6741_v23  ;;  %v1097_v44 = vadd.f32 %v5171_v56, %v1010_v62  ;;  %v1106_v17 = vadd.f32 %v5174_v15, %v1010_v62  ;;  %v1769_v26 = vmul.f32 %v6754_v57, %v5420_v60 }
 0x147   : > { %v1777_v13 = vmul.f32 %v5084_v59, %v1768_v28  ;;  %v1873_v49 = vmul.f32 %v6748_v25, %v1864_v34  ;;  %v1889_v9 = vmul.f32 %v6749_v27, %v1864_v34  ;;  %v5523_v10 = vpop.permute.xlu0 %1812  ;;  %v1793_v35 = vmul.f32 %v6733_v7, %v1768_v28 }
 0x148   : > { %v1439_v16 = vadd.f32 %v6753_v29, %v1105_v5  ;;  %v1821_v46 = vsel %vm1818_vm6, %v1811_v30, %v5523_v10  ;;  %v5531_v2 = vadd.f32 %v1888_v54, %v1798_v14  ;;  %v1687_v60 = vadd.f32 %v5409_v8, %v1272_v32  ;;  %v6760_v14 = vld [vmem:[#allocation27_spill] sm:$0xff]  ;;  %v6763_v29 = vld [vmem:[#allocation52_spill] sm:$0xff] }
 0x149   : > { %v1874_v23 = vmul.f32 %v6748_v25, %v1865_v45  ;;  %v5537_v62 = vadd.f32 %v1873_v49, %v1783_v61  ;;  %v5539_v33 = vadd.f32 %v1889_v9, %v1799_v58  ;;  %v6755_v12 = vrot.slane %v5131_v0, %v5032_v18  ;;  %v6759_v61 = vld [vmem:[#allocation26_spill] sm:$0xff]  ;;  %v6762_v32 = vld [vmem:[#allocation39_spill] sm:$0xff] }
 0x14a   : > { %v5547_v30 = vpop.permute.xlu1 %1905  ;;  %v1703_v54 = vadd.f32 %v5412_v6, %v1439_v16  ;;  %v1784_v8 = vadd.f32 %v1777_v13, %v1687_v60  ;;  %v6758_v5 = vcombine.low %v6756_v37, %v6757_v53  ;;  %v6761_v58 = vcombine.low %v6759_v61, %v6760_v14 }
 0x14b   : > { %v1081_v28 = vadd.f32 %v5436_v52, %v6755_v12  ;;  %v1681_v18 = vmul.f32 %v5046_v47, %v5457_v63  ;;  %v1697_v52 = vmul.f32 %v5048_v38, %v5457_v63  ;;  %v1674_v6 = vmul.f32 %v6762_v32, %v5350_v21  ;;  %v5565_v13 = vpop.permute.xlu0 %1816 }
 0x14c   : > { %v1273_v34 = vadd.f32 %v6758_v5, %v1097_v44  ;;  %v1440_v3 = vadd.f32 %v6761_v58, %v1106_v17  ;;  %v1866_v16 = vmul.f32 %v6763_v29, %v1821_v46  ;;  %v1011_v44 = vpop.f32.mrf.mxu0  ;;  %v1778_v17 = vmul.f32 %v5084_v59, %v1769_v26 }
 0x14d   : > { %v1890_v49 = vmul.f32 %v6749_v27, %v1865_v45  ;;  %v1800_v9 = vadd.f32 %v1793_v35, %v1703_v54  ;;  %v5571_v60 = vadd.f32 %v1874_v23, %v1784_v8  ;;  %v1794_v63 = vmul.f32 %v6733_v7, %v1769_v26  ;;  %v6766_v8 = vld [vmem:[#allocation46_spill] sm:$0xff] }
 0x14e   : > { %v1825_v21 = vsel %vm1818_vm6, %v5565_v13, %v5476_v43  ;;  %v1688_v46 = vadd.f32 %v1681_v18, %v1273_v34  ;;  %v1704_v12 = vadd.f32 %v1697_v52, %v1440_v3  ;;  %v5582_v5 = vpop.permute.xlu1 %1909  ;;  %v1099_v45 = vadd.f32 %v5171_v56, %v1081_v28  ;;  %v6765_v43 = vld [vmem:[#allocation37_spill] sm:$0xff] }
 0x14f   : > { %v5584_v58 = vadd.f32 %v1890_v49, %v1800_v9  ;;  %v1108_v35 = vadd.f32 %v5174_v15, %v1081_v28  ;;  %v6764_v26 = vrot.slane %v5131_v0, %v5026_v4  ;;  %v1673_v54 = vmul.f32 %v6765_v43, %v5284_v24  ;;  %v5598_v18 = vpop.permute.xlu0 %1903  ;;  %v6768_v4 = vld [vmem:[#allocation54_spill] sm:$0xff] }
 0x150   : > { %v1771_v34 = vmul.f32 %v6766_v8, %v5449_v39  ;;  %v1875_v3 = vmul.f32 %v6748_v25, %v1866_v16  ;;  %v6767_v28 = vcombine.low %v5356_v55, %v5359_v11  ;;  %v1891_v0 = vmul.f32 %v6749_v27, %v1866_v16 }
 0x151   : > { %v1012_v23 = vadd.f32 %v1011_v44, %v6764_v26  ;;  %v1862_v44 = vmul.f32 %v6768_v4, %v1825_v21  ;;  %v1785_v24 = vadd.f32 %v1778_v17, %v1688_v46  ;;  %v1801_v39 = vadd.f32 %v1794_v63, %v1704_v12 }
 0x152   : > { %v5604_v52 = vrot.slane %v6767_v28, %v4433_v31  ;;  %v1683_v49 = vmul.f32 %v5046_v47, %v1674_v6  ;;  %v1699_v9 = vmul.f32 %v5048_v38, %v1674_v6  ;;  %v6769_v26 = vcombine.high %v6756_v37, %v6757_v53  ;;  %v5629_v12 = vpop.permute.xlu1 %1913  ;;  %v6771_v37 = vld [vmem:[#allocation45_spill] sm:$0xff] }
 0x153   : > { %v6770_v29 = vcombine.high %v6759_v61, %v6760_v14  ;;  %v5623_v21 = vadd.f32 %v1875_v3, %v1785_v24  ;;  %v5625_v17 = vadd.f32 %v1891_v0, %v1801_v39  ;;  %v1098_v63 = vadd.f32 %v5171_v56, %v1012_v23  ;;  %v1908_v6 = vpop.permute.xlu0 %1907  ;;  %v6776_v24 = vld [vmem:[#allocation28_spill] sm:$0xff]  ;;  %v6777_v39 = vld [vmem:[#allocation29_spill] sm:$0xff] }
 0x154   : > { %v1275_v28 = vadd.f32 %v6769_v26, %v1099_v45  ;;  %v1107_v46 = vadd.f32 %v5174_v15, %v1012_v23  ;;  %v1770_v53 = vmul.f32 %v6771_v37, %v5453_v20  ;;  %v1780_v61 = vmul.f32 %v5084_v59, %v1771_v34 }
 0x155   : > { %v1442_v16 = vadd.f32 %v6770_v29, %v1108_v35  ;;  %v1796_v14 = vmul.f32 %v6733_v7, %v1771_v34  ;;  %v6772_v29 = vcombine.high %v5356_v55, %v5359_v11  ;;  %v1871_v15 = vmul.f32 %v6748_v25, %v1862_v44  ;;  %v6773_v11 = vld [vmem:[#allocation24_spill] sm:$0xff]  ;;  %v6774_v34 = vld [vmem:[#allocation25_spill] sm:$0xff] }
 0x156   : > { %v1887_v56 = vmul.f32 %v6749_v27, %v1862_v44  ;;  %v1690_v35 = vadd.f32 %v1683_v49, %v1275_v28  ;;  %v1682_v23 = vmul.f32 %v5046_v47, %v1673_v54  ;;  %v1698_v55 = vmul.f32 %v5048_v38, %v1673_v54  ;;  %v5669_v38 = vpop.permute.xlu1 %2498 }
 0x157   : > { %v5641_v45 = vrot.slane %v6772_v29, %v4433_v31  ;;  %v1706_v20 = vadd.f32 %v1699_v9, %v1442_v16  ;;  %v6775_v3 = vcombine.low %v6773_v11, %v6774_v34  ;;  %v6778_v26 = vcombine.low %v6776_v24, %v6777_v39  ;;  %v1912_v54 = vpop.permute.xlu0 %1911 }
 0x158   : > { %v5659_v49 = vadd.f32 %v1780_v61, %v1690_v35  ;;  %v5664_v28 = vadd.f32 %v1871_v15, %v5463_v36  ;;  %v5667_v47 = vadd.f32 %v1887_v56, %v5481_v22  ;;  %v5674_v16 = vstv %s5525_s21  ;;  %v6781_v56 = vld [vmem:[#allocation79_spill] sm:$0xff] }
 0x159   : > { %v1274_v0 = vadd.f32 %v6775_v3, %v1098_v63  ;;  %v1441_v44 = vadd.f32 %v6778_v26, %v1107_v46  ;;  %v5661_v9 = vadd.f32 %v1796_v14, %v1706_v20  ;;  %v5677_v63 = vstv %s5534_s23 }
 0x15a   : > { %v5680_v46 = vstv %s5545_s26  ;;  %v5683_v61 = vstv %s5556_s22  ;;  %v1779_v36 = vmul.f32 %v5084_v59, %v1770_v53  ;;  %v1795_v22 = vmul.f32 %v6733_v7, %v1770_v53  ;;  %v5708_v11 = vpop.permute.xlu1 %2502  ;;  %v6791_v59 = vld [vmem:[#allocation56_spill] sm:$0xff] }
 0x15b   : > { %6779 = vst [vmem:[#allocation41_spill] sm:$0xff] %v5680_v46  ;;  %6780 = vst [vmem:[#allocation18_spill] sm:$0xff] %v5683_v61  ;;  %v1689_v14 = vadd.f32 %v1682_v23, %v1274_v0  ;;  %v1705_v29 = vadd.f32 %v1698_v55, %v1441_v44  ;;  %v5698_v20 = vstv %s5567_s19  ;;  %v1820_v7 = vsel %vm1818_vm6, %v5523_v10, %v5491_v19  ;;  %v5714_v3 = vpop.permute.xlu0 %2496  ;;  %v6788_v44 = vld [vmem:[#allocation53_spill] sm:$0xff] }
 0x15c   : > { %6782 = vst [vmem:[#allocation19_spill] sm:$0xff] %v5698_v20  ;;  %v1819_v53 = vsel %vm1818_vm6, %v5491_v19, %v5565_v13  ;;  %v1921_v34 = vsel %vm1915_vm7, %v5508_v42, %v5598_v18  ;;  %v5717_v10 = vstv %s5573_s15  ;;  %v5720_v0 = vstv %s5580_s27 }
 0x15d   : > { %v1786_v23 = vadd.f32 %v1779_v36, %v1689_v14  ;;  %v1802_v55 = vadd.f32 %v1795_v22, %v1705_v29  ;;  %6783 = vst [vmem:[#allocation20_spill] sm:$0xff] %v5717_v10  ;;  %6784 = vst [vmem:[#allocation21_spill] sm:$0xff] %v5720_v0  ;;  %v5723_v19 = vstv %s5591_s25  ;;  %v1920_v13 = vsel %vm1915_vm7, %v5598_v18, %v5547_v30  ;;  %v6789_v22 = vld [vmem:[#allocation55_spill] sm:$0xff] }
 0x15e   : > { %6785 = vst [vmem:[#allocation30_spill] sm:$0xff] %v5723_v19  ;;  %v1919_v24 = vsel %vm1915_vm7, %v5547_v30, %v1908_v6  ;;  %v5733_v39 = vstv %s5606_s13  ;;  %v5736_v26 = vstv %s5611_s24  ;;  %v1867_v36 = vmul.f32 %v6788_v44, %v1820_v7  ;;  %v5747_v15 = vpop.permute.xlu1 %2506  ;;  %v6795_v7 = vld [vmem:[#allocation57_spill] sm:$0xff] }
 0x15f   : > { %6786 = vst [vmem:[#allocation42_spill] sm:$0xff] %v5733_v39  ;;  %6787 = vst [vmem:[#allocation31_spill] sm:$0xff] %v5736_v26  ;;  %v1868_v14 = vmul.f32 %v6789_v22, %v1819_v53  ;;  %v1918_v18 = vsel %vm1915_vm7, %v1908_v6, %v5582_v5  ;;  %v5744_v29 = vstv %s5621_s30  ;;  %v1960_v30 = vmul.f32 %v6791_v59, %v1921_v34  ;;  %v6796_v53 = vld [vmem:[#allocation60_spill] sm:$0xff]  ;;  %v6798_v34 = vld [vmem:[#allocation61_spill] sm:$0xff] }
 0x160   : > { %6790 = vst [vmem:[#allocation48_spill] sm:$0xff] %v5744_v29  ;;  %v5750_v35 = vstv %s5631_s12  ;;  %v5753_v31 = vstv %s5643_s18  ;;  %v5756_v39 = vstv %s5647_s28  ;;  %v1961_v26 = vmul.f32 %v6795_v7, %v1920_v13  ;;  %v2501_v29 = vpop.permute.xlu0 %2500  ;;  %v6804_v22 = vld [vmem:[#allocation59_spill] sm:$0xff] }
 0x161   : > { %6792 = vst [vmem:[#allocation49_spill] sm:$0xff] %v5750_v35  ;;  %6793 = vst [vmem:[#allocation43_spill] sm:$0xff] %v5753_v31  ;;  %v1962_v19 = vmul.f32 %v6796_v53, %v1919_v24  ;;  %v1922_v6 = vsel %vm1915_vm7, %v5629_v12, %v5508_v42  ;;  %v5765_v0 = vstv %s5657_s29  ;;  %v1963_v10 = vmul.f32 %v6798_v34, %v1918_v18  ;;  %v6802_v53 = vld [vmem:[#allocation58_spill] sm:$0xff] }
 0x162   : > { %6794 = vst [vmem:[#allocation22_spill] sm:$0xff] %v5756_v39  ;;  %6797 = vst [vmem:[#allocation23_spill] sm:$0xff] %v5765_v0  ;;  %v5769_v20 = vstv %s5671_s20  ;;  %v5772_v35 = vstv %s5685_s0  ;;  %v5775_v31 = vstv %s5689_s1  ;;  %v1876_v13 = vmul.f32 %v6748_v25, %v1867_v36  ;;  %v6803_v34 = vld [vmem:[#allocation62_spill] sm:$0xff]  ;;  %s6877_s0 = smul.u32 28, %s6884_s16 }
 0x163   : > { %6799 = vst [vmem:[#allocation26_spill] sm:$0xff] %v5769_v20  ;;  %6800 = vst [vmem:[#allocation27_spill] sm:$0xff] %v5772_v35  ;;  %v1892_v24 = vmul.f32 %v6749_v27, %v1867_v36  ;;  %v1877_v39 = vmul.f32 %v6748_v25, %v1868_v14  ;;  %v1917_v42 = vsel %vm1915_vm7, %v5582_v5, %v1912_v54  ;;  %v5789_v35 = vpop.permute.xlu1 %2556 }
 0x164   : > { %6801 = vst [vmem:[#allocation39_spill] sm:$0xff] %v5775_v31  ;;  %v1893_v0 = vmul.f32 %v6749_v27, %v1868_v14  ;;  %v1969_v18 = vmul.f32 %v6802_v53, %v1960_v30  ;;  %v1959_v20 = vmul.f32 %v6803_v34, %v1922_v6  ;;  %v1916_v31 = vsel %vm1915_vm7, %v1912_v54, %v5629_v12  ;;  %v2505_v7 = vpop.permute.xlu0 %2504  ;;  %v6805_v34 = vld [vmem:[#allocation63_spill] sm:$0xff]  ;;  %s6333_s21 = scalar_lea.vmem %s6547_s11, %s6877_s0 }
 0x165   : > { %v1970_v36 = vmul.f32 %v6802_v53, %v1961_v26  ;;  %v1985_v25 = vmul.f32 %v6804_v22, %v1960_v30  ;;  %v1971_v4 = vmul.f32 %v6802_v53, %v1962_v19  ;;  %v1987_v5 = vmul.f32 %v6804_v22, %v1962_v19  ;;  %v6806_v30 = vld [vmem:[#allocation64_spill] sm:$0xff] }
 0x166   : > { %v1986_v27 = vmul.f32 %v6804_v22, %v1961_v26  ;;  %v1972_v14 = vmul.f32 %v6802_v53, %v1963_v10  ;;  %v1988_v6 = vmul.f32 %v6804_v22, %v1963_v10  ;;  %v1964_v59 = vmul.f32 %v6805_v34, %v1917_v42  ;;  %v6807_v34 = vld [vmem:[#allocation33_spill] sm:$0xff] }
 0x167   : > { %v1978_v12 = vadd.f32 %v1971_v4, %v5571_v60  ;;  %v1994_v54 = vadd.f32 %v1987_v5, %v5584_v58  ;;  %v1884_v44 = vadd.f32 %v1877_v39, %v5659_v49  ;;  %v1965_v61 = vmul.f32 %v6806_v30, %v1916_v31  ;;  %v5810_v42 = vpop.permute.xlu1 %2560 }
 0x168   : > { %v1968_v46 = vmul.f32 %v6802_v53, %v1959_v20  ;;  %v1984_v19 = vmul.f32 %v6804_v22, %v1959_v20  ;;  %v1976_v26 = vadd.f32 %v1969_v18, %v5506_v50  ;;  %v2515_v10 = vsel %vm1624_vm4, %v5714_v3, %v5669_v38  ;;  %v2509_v31 = vpop.permute.xlu0 %2508 }
 0x169   : > { %v1883_v60 = vadd.f32 %v1876_v13, %v1786_v23  ;;  %v1899_v4 = vadd.f32 %v1892_v24, %v1802_v55  ;;  %v1900_v58 = vadd.f32 %v1893_v0, %v5661_v9  ;;  %v1992_v49 = vadd.f32 %v1985_v25, %v5531_v2  ;;  %v6808_v55 = vld [vmem:[#allocation66_spill] sm:$0xff] }
 0x16a   : > { %v1975_v39 = vadd.f32 %v1968_v46, %v5664_v28  ;;  %v1991_v20 = vadd.f32 %v1984_v19, %v5667_v47  ;;  %v1973_v50 = vmul.f32 %v6802_v53, %v1964_v59  ;;  %v1977_v18 = vadd.f32 %v1970_v36, %v5537_v62  ;;  %v6809_v28 = vld [vmem:[#allocation67_spill] sm:$0xff]  ;;  %v6811_v24 = vld [vmem:[#allocation70_spill] sm:$0xff]  ;;  %v6814_v19 = vld [vmem:[#allocation68_spill] sm:$0xff] }
 0x16b   : > { %v1974_v5 = vmul.f32 %v6802_v53, %v1965_v61  ;;  %v1989_v30 = vmul.f32 %v6804_v22, %v1964_v59  ;;  %v2518_v23 = vmul.f32 %v2515_v10, %v6807_v34  ;;  %v2514_v9 = vsel %vm1624_vm4, %v5669_v38, %v2501_v29  ;;  %v5832_v53 = vpop.permute.xlu1 %2564  ;;  %v6812_v36 = vld [vmem:[#allocation71_spill] sm:$0xff]  ;;  %v6815_v10 = vld [vmem:[#allocation69_spill] sm:$0xff] }
 0x16c   : > { %v1990_v2 = vmul.f32 %v6804_v22, %v1965_v61  ;;  %v6810_v46 = vcombine.low %v6808_v55, %v6809_v28  ;;  %v1993_v0 = vadd.f32 %v1986_v27, %v5539_v33  ;;  %v2513_v62 = vsel %vm1624_vm4, %v2501_v29, %v5708_v11  ;;  %v2559_v61 = vpop.permute.xlu0 %2558  ;;  %v6818_v29 = vld [vmem:[#allocation34_spill] sm:$0xff] }
 0x16d   : > { %v1980_v59 = vadd.f32 %v1973_v50, %v1883_v60  ;;  %v1981_v34 = vadd.f32 %v1974_v5, %v1884_v44  ;;  %v1996_v13 = vadd.f32 %v1989_v30, %v1899_v4  ;;  %v6813_v38 = vcombine.low %v6811_v24, %v6812_v36  ;;  %v6820_v44 = vld [vmem:[#allocation78_spill] sm:$0xff]  ;;  %v6822_v50 = vld [vmem:[#allocation32_spill] sm:$0xff] }
 0x16e   : > { %v2159_v47 = vadd.f32 %v6810_v46, %v1976_v26  ;;  %v1997_v22 = vadd.f32 %v1990_v2, %v1900_v58  ;;  %v6816_v26 = vcombine.high %v6814_v19, %v6815_v10  ;;  %v6817_v33 = vcombine.high %v6808_v55, %v6809_v28  ;;  %v6823_v5 = vld [vmem:[#allocation72_spill] sm:$0xff]  ;;  %v6824_v2 = vld [vmem:[#allocation73_spill] sm:$0xff] }
 0x16f   : > { %v2326_v25 = vadd.f32 %v6813_v38, %v1992_v49  ;;  %v2519_v40 = vmul.f32 %v2514_v9, %v6818_v29  ;;  %v2527_v60 = vmul.f32 %v6819_v1, %v2518_v23  ;;  %v2543_v30 = vmul.f32 %v6820_v44, %v2518_v23  ;;  %v2569_v9 = vpop.permute.xlu1 %2568 }
 0x170   : > { %v2160_v46 = vadd.f32 %v6816_v26, %v1977_v18  ;;  %v2161_v27 = vadd.f32 %v6817_v33, %v1978_v12  ;;  %v6821_v4 = vcombine.high %v6811_v24, %v6812_v36  ;;  %v2520_v58 = vmul.f32 %v2513_v62, %v6822_v50  ;;  %v6826_v24 = vld [vmem:[#allocation75_spill] sm:$0xff]  ;;  %v6834_v50 = vld [vmem:[#allocation38_spill] sm:$0xff] }
 0x171   : > { %v6825_v38 = vcombine.high %v6823_v5, %v6824_v2  ;;  %v1979_v26 = vadd.f32 %v1972_v14, %v5623_v21  ;;  %v2511_v12 = vsel %vm1624_vm4, %v2505_v7, %v5747_v15  ;;  %v2512_v23 = vsel %vm1624_vm4, %v5708_v11, %v2505_v7  ;;  %v2563_v14 = vpop.permute.xlu0 %2562  ;;  %v6827_v11 = vld [vmem:[#allocation77_spill] sm:$0xff]  ;;  %v6830_v33 = vld [vmem:[#allocation35_spill] sm:$0xff] }
 0x172   : > { %v2328_v49 = vadd.f32 %v6821_v4, %v1994_v54  ;;  %v5860_v55 = vadd.f32 %v2527_v60, %v2159_v47  ;;  %v1995_v54 = vadd.f32 %v1988_v6, %v5625_v17  ;;  %v2510_v28 = vsel %vm1624_vm4, %v5747_v15, %v2509_v31  ;;  %v6832_v60 = vld [vmem:[#allocation76_spill] sm:$0xff] }
 0x173   : > { %v2327_v18 = vadd.f32 %v6825_v38, %v1993_v0  ;;  %v2516_v21 = vsel %vm1624_vm4, %v2509_v31, %v5714_v3  ;;  %v5869_v0 = vadd.f32 %v2543_v30, %v2326_v25  ;;  %v2528_v62 = vmul.f32 %v6819_v1, %v2519_v40  ;;  %v6831_v25 = vld [vmem:[#allocation74_spill] sm:$0xff] }
 0x174   : > { %v6828_v7 = vcombine.low %v6826_v24, %v6827_v11  ;;  %v6829_v17 = vcombine.low %v6781_v56, %v5641_v45  ;;  %v2529_v36 = vmul.f32 %v6819_v1, %v2520_v58  ;;  %v2544_v15 = vmul.f32 %v6820_v44, %v2519_v40  ;;  %v2619_v45 = vpop.permute.xlu1 %2618  ;;  %v6840_v11 = vld [vmem:[#allocation36_spill] sm:$0xff] }
 0x175   : > { %v2521_v29 = vmul.f32 %v2512_v23, %v6830_v33  ;;  %v2522_v3 = vmul.f32 %v2511_v12, %v6765_v43  ;;  %v2545_v31 = vmul.f32 %v6820_v44, %v2520_v58  ;;  %v6833_v30 = vcombine.low %v6831_v25, %v6832_v60  ;;  %v2567_v43 = vpop.permute.xlu0 %2566  ;;  %v6841_v33 = vld [vmem:[#allocation40_spill] sm:$0xff] }
 0x176   : > { %v2163_v47 = vadd.f32 %v6828_v7, %v1980_v59  ;;  %v2330_v6 = vadd.f32 %v6829_v17, %v1996_v13  ;;  %v2517_v59 = vmul.f32 %v2516_v21, %v6834_v50  ;;  %v2523_v38 = vmul.f32 %v2510_v28, %v6762_v32  ;;  %v6842_v50 = vld [vmem:[#allocation44_spill] sm:$0xff] }
 0x177   : > { %v2162_v4 = vadd.f32 %v6833_v30, %v1979_v26  ;;  %v2535_v56 = vadd.f32 %v2528_v62, %v2160_v46  ;;  %v5888_v13 = vadd.f32 %v2529_v36, %v2161_v27  ;;  %v2551_v24 = vadd.f32 %v2544_v15, %v2327_v18 }
 0x178   : > { %v6835_v40 = vcombine.low %v5398_v51, %v5604_v52  ;;  %v5893_v12 = vadd.f32 %v2545_v31, %v2328_v49  ;;  %v6836_v58 = vcombine.low %v6814_v19, %v6815_v10  ;;  %v6837_v21 = vcombine.high %v6831_v25, %v6832_v60  ;;  %v2623_v62 = vpop.permute.xlu1 %2622 }
 0x179   : > { %v2575_v46 = vsel %vm1721_vm5, %v5789_v35, %v2559_v61  ;;  %v2530_v27 = vmul.f32 %v6819_v1, %v2521_v29  ;;  %v2531_v18 = vmul.f32 %v6819_v1, %v2522_v3  ;;  %v6838_v49 = vcombine.low %v6823_v5, %v6824_v2 }
 0x17a   : > { %v2329_v23 = vadd.f32 %v6835_v40, %v1995_v54  ;;  %v2158_v26 = vadd.f32 %v6836_v58, %v1975_v39  ;;  %v2164_v32 = vadd.f32 %v6837_v21, %v1981_v34  ;;  %v2574_v39 = vsel %vm1721_vm5, %v2559_v61, %v5810_v42 }
 0x17b   : > { %v2325_v54 = vadd.f32 %v6838_v49, %v1991_v20  ;;  %v2526_v19 = vmul.f32 %v6819_v1, %v2517_v59  ;;  %v2532_v34 = vmul.f32 %v6819_v1, %v2523_v38  ;;  %v2572_v10 = vsel %vm1721_vm5, %v2563_v14, %v5832_v53  ;;  %v5926_v1 = vpop.permute.xlu0 %2616 }
 0x17c   : > { %v2573_v28 = vsel %vm1721_vm5, %v5810_v42, %v2563_v14  ;;  %v2546_v5 = vmul.f32 %v6820_v44, %v2521_v29  ;;  %v6839_v20 = vcombine.high %v5398_v51, %v5604_v52  ;;  %v2542_v61 = vmul.f32 %v6820_v44, %v2517_v59  ;;  %v2627_v30 = vpop.permute.xlu1 %2626 }
 0x17d   : > { %v2578_v7 = vmul.f32 %v2575_v46, %v6840_v11  ;;  %v2537_v17 = vadd.f32 %v2530_v27, %v2162_v4  ;;  %v2538_v36 = vadd.f32 %v2531_v18, %v2163_v47  ;;  %v2547_v15 = vmul.f32 %v6820_v44, %v2522_v3  ;;  %v6843_v18 = vld [vmem:[#allocation47_spill] sm:$0xff] }
 0x17e   : > { %v2331_v2 = vadd.f32 %v6839_v20, %v1997_v22  ;;  %v2579_v31 = vmul.f32 %v2574_v39, %v6841_v33  ;;  %v2548_v42 = vmul.f32 %v6820_v44, %v2523_v38  ;;  %v2580_v14 = vmul.f32 %v2573_v28, %v6745_v41 }
 0x17f   : > { %v2581_v29 = vmul.f32 %v2572_v10, %v6754_v57  ;;  %v2576_v51 = vsel %vm1721_vm5, %v2569_v9, %v5789_v35  ;;  %v2553_v52 = vadd.f32 %v2546_v5, %v2329_v23  ;;  %v2554_v22 = vadd.f32 %v2547_v15, %v2330_v6  ;;  %v2621_v57 = vpop.permute.xlu0 %2620  ;;  %v6844_v10 = vld [vmem:[#allocation50_spill] sm:$0xff] }
 0x180   : > { %v2533_v25 = vadd.f32 %v2526_v19, %v2158_v26  ;;  %v2539_v60 = vadd.f32 %v2532_v34, %v2164_v32  ;;  %v2549_v47 = vadd.f32 %v2542_v61, %v2325_v54  ;;  %v2587_v3 = vmul.f32 %v5674_v16, %v2578_v7  ;;  %v5957_v21 = vpop.permute.xlu1 %2676 }
 0x181   : > { %v2570_v4 = vsel %vm1721_vm5, %v2567_v43, %v2569_v9  ;;  %v2571_v41 = vsel %vm1721_vm5, %v5832_v53, %v2567_v43  ;;  %v2588_v44 = vmul.f32 %v5674_v16, %v2579_v31  ;;  %v2603_v35 = vmul.f32 %v5677_v63, %v2578_v7  ;;  %v6846_v7 = vld [vmem:[#allocation41_spill] sm:$0xff] }
 0x182   : > { %v2577_v6 = vmul.f32 %v2576_v51, %v6842_v50  ;;  %v2635_v59 = vsel %vm1818_vm6, %v5926_v1, %v2619_v45  ;;  %v2555_v38 = vadd.f32 %v2548_v42, %v2331_v2  ;;  %v2604_v40 = vmul.f32 %v5677_v63, %v2579_v31  ;;  %v6848_v51 = vld [vmem:[#allocation52_spill] sm:$0xff] }
 0x183   : > { %v2589_v9 = vmul.f32 %v5674_v16, %v2580_v14  ;;  %v2590_v23 = vmul.f32 %v5674_v16, %v2581_v29  ;;  %v2582_v53 = vmul.f32 %v2571_v41, %v6771_v37  ;;  %v2583_v43 = vmul.f32 %v2570_v4, %v6766_v8  ;;  %v2625_v54 = vpop.permute.xlu0 %2624 }
 0x184   : > { %v2633_v58 = vsel %vm1818_vm6, %v2621_v57, %v2623_v62  ;;  %v2634_v26 = vsel %vm1818_vm6, %v2619_v45, %v2621_v57  ;;  %v2594_v32 = vadd.f32 %v2587_v3, %v5860_v55  ;;  %v2605_v46 = vmul.f32 %v5677_v63, %v2580_v14  ;;  %v6845_v55 = vld [vmem:[#allocation51_spill] sm:$0xff]  ;;  %v2681_v42 = vpop.permute.xlu1 %2680  ;;  %v6847_v14 = vld [vmem:[#allocation18_spill] sm:$0xff] }
 0x185   : > { %v2606_v27 = vmul.f32 %v5677_v63, %v2581_v29  ;;  %v2638_v49 = vmul.f32 %v2635_v59, %v6843_v18  ;;  %v2595_v37 = vadd.f32 %v2588_v44, %v2535_v56  ;;  %v2610_v8 = vadd.f32 %v2603_v35, %v5869_v0  ;;  %v6849_v44 = vld [vmem:[#allocation53_spill] sm:$0xff] }
 0x186   : > { %v2586_v39 = vmul.f32 %v5674_v16, %v2577_v6  ;;  %v2602_v19 = vmul.f32 %v5677_v63, %v2577_v6  ;;  %v2611_v34 = vadd.f32 %v2604_v40, %v2551_v24  ;;  %v2596_v45 = vadd.f32 %v2589_v9, %v5888_v13 }
 0x187   : > { %v2639_v28 = vmul.f32 %v2634_v26, %v6844_v10  ;;  %v2640_v5 = vmul.f32 %v2633_v58, %v6845_v55  ;;  %v2597_v20 = vadd.f32 %v2590_v23, %v2537_v17  ;;  %v2591_v2 = vmul.f32 %v5674_v16, %v2582_v53  ;;  %v2629_v15 = vpop.permute.xlu0 %2628  ;;  %v6851_v58 = vld [vmem:[#allocation57_spill] sm:$0xff] }
 0x188   : > { %v2592_v61 = vmul.f32 %v5674_v16, %v2583_v43  ;;  %v2632_v56 = vsel %vm1818_vm6, %v2623_v62, %v2625_v54  ;;  %v2612_v0 = vadd.f32 %v2605_v46, %v5893_v12  ;;  %v2607_v11 = vmul.f32 %v5677_v63, %v2582_v53  ;;  %v6013_v26 = vpop.permute.xlu1 %2684 }
 0x189   : > { %v2608_v24 = vmul.f32 %v5677_v63, %v2583_v43  ;;  %v2647_v13 = vmul.f32 %v6846_v7, %v2638_v49  ;;  %v2613_v33 = vadd.f32 %v2606_v27, %v2553_v52  ;;  %v5977_v31 = vadd.f32 %v2586_v39, %v2533_v25  ;;  %v6852_v27 = vld [vmem:[#allocation54_spill] sm:$0xff] }
 0x18a   : > { %v5979_v17 = vadd.f32 %v2602_v19, %v2549_v47  ;;  %v2631_v16 = vsel %vm1818_vm6, %v2625_v54, %v2627_v30  ;;  %v2663_v62 = vmul.f32 %v6847_v14, %v2638_v49  ;;  %v2648_v12 = vmul.f32 %v6846_v7, %v2639_v28  ;;  %v6853_v49 = vld [vmem:[#allocation55_spill] sm:$0xff] }
 0x18b   : > { %v2649_v29 = vmul.f32 %v6846_v7, %v2640_v5  ;;  %v2641_v63 = vmul.f32 %v2632_v56, %v6848_v51  ;;  %v2598_v3 = vadd.f32 %v2591_v2, %v2538_v36  ;;  %v5987_v4 = vadd.f32 %v2592_v61, %v2539_v60  ;;  %v2679_v50 = vpop.permute.xlu0 %2678 }
 0x18c   : > { %v2664_v52 = vmul.f32 %v6847_v14, %v2639_v28  ;;  %v2665_v25 = vmul.f32 %v6847_v14, %v2640_v5  ;;  %v5991_v47 = vadd.f32 %v2607_v11, %v2554_v22  ;;  %v5993_v41 = vadd.f32 %v2608_v24, %v2555_v38 }
 0x18d   : > { %v2654_v57 = vadd.f32 %v2647_v13, %v2594_v32  ;;  %v2642_v35 = vmul.f32 %v2631_v16, %v6849_v44  ;;  %v2630_v6 = vsel %vm1818_vm6, %v2627_v30, %v2629_v15  ;;  %v2636_v36 = vsel %vm1818_vm6, %v2629_v15, %v5926_v1  ;;  %v6850_v30 = vld [vmem:[#allocation56_spill] sm:$0xff]  ;;  %v6858_v44 = vld [vmem:[#allocation21_spill] sm:$0xff] }
 0x18e   : > { %v2694_v60 = vsel %vm1915_vm7, %v2679_v50, %v2681_v42  ;;  %v2695_v22 = vsel %vm1915_vm7, %v5957_v21, %v2679_v50  ;;  %v2670_v59 = vadd.f32 %v2663_v62, %v2610_v8  ;;  %v2655_v38 = vadd.f32 %v2648_v12, %v2595_v37  ;;  %v6854_v8 = vld [vmem:[#allocation19_spill] sm:$0xff] }
 0x18f   : > { %v6006_v40 = vadd.f32 %v2649_v29, %v2596_v45  ;;  %v2650_v9 = vmul.f32 %v6846_v7, %v2641_v63  ;;  %v2671_v23 = vadd.f32 %v2664_v52, %v2611_v34  ;;  %v6009_v53 = vadd.f32 %v2665_v25, %v2612_v0  ;;  %v2683_v37 = vpop.permute.xlu0 %2682  ;;  %v6855_v34 = vld [vmem:[#allocation20_spill] sm:$0xff]  ;;  %v6857_v25 = vld [vmem:[#allocation61_spill] sm:$0xff] }
 0x190   : > { %v2698_v43 = vmul.f32 %v2695_v22, %v6850_v30  ;;  %v2699_v1 = vmul.f32 %v2694_v60, %v6851_v58  ;;  %v2651_v32 = vmul.f32 %v6846_v7, %v2642_v35  ;;  %v2666_v46 = vmul.f32 %v6847_v14, %v2641_v63  ;;  %v6861_v22 = vld [vmem:[#allocation48_spill] sm:$0xff] }
 0x191   : > { %v2637_v18 = vmul.f32 %v2636_v36, %v6852_v27  ;;  %v2643_v54 = vmul.f32 %v2630_v6, %v6853_v49  ;;  %v2657_v28 = vadd.f32 %v2650_v9, %v2597_v20  ;;  %v2667_v55 = vmul.f32 %v6847_v14, %v2642_v35  ;;  %v6859_v35 = vld [vmem:[#allocation30_spill] sm:$0xff]  ;;  %v6860_v6 = vld [vmem:[#allocation31_spill] sm:$0xff] }
 0x192   : > { %v2707_v39 = vmul.f32 %v6854_v8, %v2698_v43  ;;  %v2708_v19 = vmul.f32 %v6854_v8, %v2699_v1  ;;  %v2723_v45 = vmul.f32 %v6855_v34, %v2698_v43  ;;  %v2724_v10 = vmul.f32 %v6855_v34, %v2699_v1 }
 0x193   : > { %v2692_v5 = vsel %vm1915_vm7, %v2683_v37, %v6013_v26  ;;  %v2693_v2 = vsel %vm1915_vm7, %v2681_v42, %v2683_v37  ;;  %v6029_v24 = vadd.f32 %v2651_v32, %v2598_v3  ;;  %v2673_v13 = vadd.f32 %v2666_v46, %v2613_v33  ;;  %v6856_v42 = vld [vmem:[#allocation60_spill] sm:$0xff]  ;;  %v6863_v32 = vld [vmem:[#allocation22_spill] sm:$0xff] }
 0x194   : > { %v2714_v61 = vadd.f32 %v2707_v39, %v2654_v57  ;;  %v2715_v56 = vadd.f32 %v2708_v19, %v2655_v38  ;;  %v2730_v0 = vadd.f32 %v2723_v45, %v2670_v59  ;;  %v2731_v11 = vadd.f32 %v2724_v10, %v2671_v23  ;;  %v6862_v23 = vld [vmem:[#allocation43_spill] sm:$0xff]  ;;  %v6053_v19 = vpop.permute.xlu1 %2688 }
 0x195   : > { %v2646_v15 = vmul.f32 %v6846_v7, %v2637_v18  ;;  %v2652_v20 = vmul.f32 %v6846_v7, %v2643_v54  ;;  %v2662_v51 = vmul.f32 %v6847_v14, %v2637_v18  ;;  %v2668_v63 = vmul.f32 %v6847_v14, %v2643_v54  ;;  %v6864_v18 = vld [vmem:[#allocation26_spill] sm:$0xff] }
 0x196   : > { %v2737_v16 = vmax.f32 %v2714_v61, 0.0  ;;  %v2738_v62 = vmax.f32 %v2715_v56, 0.0  ;;  %v2744_v12 = vmax.f32 %v2730_v0, 0.0  ;;  %v2745_v29 = vmax.f32 %v2731_v11, 0.0  ;;  %v6865_v0 = vld [vmem:[#allocation27_spill] sm:$0xff] }
 0x197   : > { %v2700_v52 = vmul.f32 %v2693_v2, %v6856_v42  ;;  %v2701_v57 = vmul.f32 %v2692_v5, %v6857_v25  ;;  %v6058_v61 = vadd.f32 %v2667_v55, %v5991_v47  ;;  %v6061_v56 = vadd.f32 %v2646_v15, %v5977_v31  ;;  %v6866_v42 = vld [vmem:[#allocation42_spill] sm:$0xff] }
 0x198   : > { %v2753_v3 = vmul.f32 %v6858_v44, %v2737_v16  ;;  %v2754_v33 = vmul.f32 %v6858_v44, %v2738_v62  ;;  %v2762_v50 = vmul.f32 %v6859_v35, %v2744_v12  ;;  %v2763_v7 = vmul.f32 %v6859_v35, %v2745_v29 }
 0x199   : > { %v2979_v36 = vmul.f32 %v6860_v6, %v2737_v16  ;;  %v2980_v60 = vmul.f32 %v6860_v6, %v2738_v62  ;;  %v2988_v59 = vmul.f32 %v6861_v22, %v2744_v12  ;;  %v2989_v14 = vmul.f32 %v6861_v22, %v2745_v29 }
 0x19a   : > { %v2769_v38 = vadd.f32 %v2762_v50, %v2753_v3  ;;  %v2770_v9 = vadd.f32 %v2763_v7, %v2754_v33  ;;  %v3202_v30 = vmul.f32 %v6862_v23, %v2737_v16  ;;  %v3203_v43 = vmul.f32 %v6862_v23, %v2738_v62  ;;  %v6867_v3 = vld [vmem:[#allocation49_spill] sm:$0xff] }
 0x19b   : > { %v2995_v58 = vadd.f32 %v2988_v59, %v2979_v36  ;;  %v2996_v1 = vadd.f32 %v2989_v14, %v2980_v60  ;;  %v3211_v46 = vmul.f32 %v6863_v32, %v2744_v12  ;;  %v3212_v27 = vmul.f32 %v6863_v32, %v2745_v29  ;;  %v6869_v59 = vld [vmem:[#allocation23_spill] sm:$0xff] }
 0x19c   : > { %v3425_v49 = vmul.f32 %v6864_v18, %v2737_v16  ;;  %v3426_v54 = vmul.f32 %v6864_v18, %v2738_v62  ;;  %v2709_v37 = vmul.f32 %v6854_v8, %v2700_v52  ;;  %v2710_v39 = vmul.f32 %v6854_v8, %v2701_v57 }
 0x19d   : > { %v3218_v45 = vadd.f32 %v3211_v46, %v3202_v30  ;;  %v3219_v10 = vadd.f32 %v3212_v27, %v3203_v43  ;;  %v2725_v5 = vmul.f32 %v6855_v34, %v2700_v52  ;;  %v2726_v2 = vmul.f32 %v6855_v34, %v2701_v57 }
 0x19e   : > { %v3434_v11 = vmul.f32 %v6865_v0, %v2744_v12  ;;  %v3435_v16 = vmul.f32 %v6865_v0, %v2745_v29  ;;  %v6066_v62 = vadd.f32 %v2652_v20, %v5987_v4  ;;  %v2787_v25 = vadd.f32 %v6866_v42, %v2770_v9 }
 0x19f   : > { %v3013_v33 = vadd.f32 %v6867_v3, %v2996_v1  ;;  %v2696_v47 = vsel %vm1915_vm7, %v6053_v19, %v5957_v21  ;;  %v2716_v31 = vadd.f32 %v2709_v37, %v6006_v40  ;;  %v2717_v15 = vadd.f32 %v2710_v39, %v2657_v28  ;;  %v6868_v21 = vld [vmem:[#allocation62_spill] sm:$0xff] }
 0x1a0   : > { %v3441_v55 = vadd.f32 %v3434_v11, %v3425_v49  ;;  %v3442_v52 = vadd.f32 %v3435_v16, %v3426_v54  ;;  %v6076_v12 = vadd.f32 %v2662_v51, %v5979_v17  ;;  %v6079_v4 = vadd.f32 %v2668_v63, %v5993_v41 }
 0x1a1   : > { %v2732_v20 = vadd.f32 %v2725_v5, %v6009_v53  ;;  %v2733_v29 = vadd.f32 %v2726_v2, %v2673_v13  ;;  %v6083_v57 = vadd.f32 %v6866_v42, %v2769_v38  ;;  %v2739_v50 = vmax.f32 %v2716_v31, 0.0 }
 0x1a2   : > { %v2740_v7 = vmax.f32 %v2717_v15, 0.0  ;;  %v2697_v36 = vmul.f32 %v2696_v47, %v6868_v21  ;;  %v2794_v60 = vmax.f32 %v2787_v25, 0.0  ;;  %v6087_v40 = vadd.f32 %v6867_v3, %v2995_v58 }
 0x1a3   : > { %v2746_v28 = vmax.f32 %v2732_v20, 0.0  ;;  %v2747_v17 = vmax.f32 %v2733_v29, 0.0  ;;  %v3020_v51 = vmax.f32 %v3013_v33, 0.0  ;;  %v3236_v41 = vadd.f32 %v6869_v59, %v3219_v10  ;;  %v6870_v20 = vld [vmem:[#allocation39_spill] sm:$0xff] }
 0x1a4   : > { %v2755_v63 = vmul.f32 %v6858_v44, %v2739_v50  ;;  %v2756_v53 = vmul.f32 %v6858_v44, %v2740_v7  ;;  %v2981_v38 = vmul.f32 %v6860_v6, %v2739_v50  ;;  %v2982_v9 = vmul.f32 %v6860_v6, %v2740_v7 }
 0x1a5   : > { %v2764_v13 = vmul.f32 %v6859_v35, %v2746_v28  ;;  %v2765_v14 = vmul.f32 %v6859_v35, %v2747_v17  ;;  %v2990_v30 = vmul.f32 %v6861_v22, %v2746_v28  ;;  %v2991_v43 = vmul.f32 %v6861_v22, %v2747_v17 }
 0x1a6   : > { %v3204_v58 = vmul.f32 %v6862_v23, %v2739_v50  ;;  %v3205_v1 = vmul.f32 %v6862_v23, %v2740_v7  ;;  %v3213_v49 = vmul.f32 %v6863_v32, %v2746_v28  ;;  %v3214_v54 = vmul.f32 %v6863_v32, %v2747_v17 }
 0x1a7   : > { %v2771_v46 = vadd.f32 %v2764_v13, %v2755_v63  ;;  %v2772_v27 = vadd.f32 %v2765_v14, %v2756_v53  ;;  %v2997_v37 = vadd.f32 %v2990_v30, %v2981_v38  ;;  %v2998_v39 = vadd.f32 %v2991_v43, %v2982_v9 }
 0x1a8   : > { %v3427_v10 = vmul.f32 %v6864_v18, %v2739_v50  ;;  %v3428_v5 = vmul.f32 %v6864_v18, %v2740_v7  ;;  %v6105_v2 = vadd.f32 %v6869_v59, %v3218_v45  ;;  %v3220_v16 = vadd.f32 %v3213_v49, %v3204_v58 }
 0x1a9   : > { %v2788_v11 = vadd.f32 %v6866_v42, %v2771_v46  ;;  %v3221_v25 = vadd.f32 %v3214_v54, %v3205_v1  ;;  %v3243_v33 = vmax.f32 %v3236_v41, 0.0  ;;  %v3014_v47 = vadd.f32 %v6867_v3, %v2997_v37  ;;  %v2687_v46 = vpop.permute.xlu0 %2686 }
 0x1aa   : > { %v3436_v31 = vmul.f32 %v6865_v0, %v2746_v28  ;;  %v3437_v15 = vmul.f32 %v6865_v0, %v2747_v17  ;;  %v6112_v29 = vadd.f32 %v6870_v20, %v3441_v55  ;;  %v3459_v50 = vadd.f32 %v6870_v20, %v3442_v52 }
 0x1ab   : > { %v2795_v7 = vmax.f32 %v2788_v11, 0.0  ;;  %v3237_v45 = vadd.f32 %v6869_v59, %v3220_v16  ;;  %v3021_v21 = vmax.f32 %v3014_v47, 0.0  ;;  %v2706_v13 = vmul.f32 %v6854_v8, %v2697_v36  ;;  %v6871_v16 = vld [vmem:[#allocation63_spill] sm:$0xff] }
 0x1ac   : > { %v3443_v63 = vadd.f32 %v3436_v31, %v3427_v10  ;;  %v3444_v53 = vadd.f32 %v3437_v15, %v3428_v5  ;;  %v2722_v28 = vmul.f32 %v6855_v34, %v2697_v36  ;;  %v2793_v17 = vmax.f32 %v6083_v57, 0.0 }
 0x1ad   : > { %v2808_v41 = vcombine.low %v2794_v60, %v2795_v7  ;;  %v2809_v14 = vcombine.high %v2794_v60, %v2795_v7  ;;  %v3244_v38 = vmax.f32 %v3237_v45, 0.0  ;;  %v3034_v9 = vcombine.low %v3020_v51, %v3021_v21 }
 0x1ae   : > { %v3035_v55 = vcombine.high %v3020_v51, %v3021_v21  ;;  %v3460_v30 = vadd.f32 %v6870_v20, %v3443_v63  ;;  %v3019_v52 = vmax.f32 %v6087_v40, 0.0  ;;  %v3466_v43 = vmax.f32 %v3459_v50, 0.0 }
 0x1af   : > { %v6121_v58 = vcombine.low %v3243_v33, %v3244_v38  ;;  %v6123_v1 = vcombine.high %v3243_v33, %v3244_v38  ;;  %v6126_v49 = vadd.f32 %v6866_v42, %v2772_v27  ;;  %v6129_v60 = vadd.f32 %v6867_v3, %v2998_v39  ;;  %v6872_v33 = vld [vmem:[#allocation64_spill] sm:$0xff] }
 0x1b0   : > { %v6132_v57 = vadd.f32 %v6869_v59, %v3221_v25  ;;  %v3467_v36 = vmax.f32 %v3460_v30, 0.0  ;;  %v3242_v51 = vmax.f32 %v6105_v2, 0.0  ;;  %v3465_v40 = vmax.f32 %v6112_v29, 0.0 }
 0x1b1   : > { %v2713_v54 = vadd.f32 %v2706_v13, %v6061_v56  ;;  %v2729_v37 = vadd.f32 %v2722_v28, %v6076_v12  ;;  %v2690_v27 = vsel %vm1915_vm7, %v2687_v46, %v6053_v19  ;;  %v2691_v39 = vsel %vm1915_vm7, %v6013_v26, %v2687_v46 }
 0x1b2   : > { %v6138_v10 = vcombine.low %v3466_v43, %v3467_v36  ;;  %v6140_v5 = vcombine.high %v3466_v43, %v3467_v36  ;;  %v2702_v25 = vmul.f32 %v2691_v39, %v6871_v16  ;;  %v2703_v56 = vmul.f32 %v2690_v27, %v6872_v33  ;;  %v6873_v36 = vld [vmem:[#allocation17_spill] sm:$0xff] }
 0x1b3   : > { %v2736_v11 = vmax.f32 %v2713_v54, 0.0  ;;  %v2743_v2 = vmax.f32 %v2729_v37, 0.0  ;;  %v2796_v12 = vmax.f32 %v6126_v49, 0.0  ;;  %v3022_v47 = vmax.f32 %v6129_v60, 0.0 }
 0x1b4   : > { %v3245_v31 = vmax.f32 %v6132_v57, 0.0  ;;  %v6154_v15 = vadd.f32 %v6870_v20, %v3444_v53  ;;  %v2711_v53 = vmul.f32 %v6854_v8, %v2702_v25  ;;  %v2712_v38 = vmul.f32 %v6854_v8, %v2703_v56 }
 0x1b5   : > { %v2752_v19 = vmul.f32 %v6858_v44, %v2736_v11  ;;  %v2761_v48 = vmul.f32 %v6859_v35, %v2743_v2  ;;  %v2978_v26 = vmul.f32 %v6860_v6, %v2736_v11  ;;  %v2987_v29 = vmul.f32 %v6861_v22, %v2743_v2 }
 0x1b6   : > { %v3201_v50 = vmul.f32 %v6862_v23, %v2736_v11  ;;  %v3210_v7 = vmul.f32 %v6863_v32, %v2743_v2  ;;  %v3424_v45 = vmul.f32 %v6864_v18, %v2736_v11  ;;  %v3433_v21 = vmul.f32 %v6865_v0, %v2743_v2 }
 0x1b7   : > { %v2768_v63 = vadd.f32 %v2761_v48, %v2752_v19  ;;  %v2994_v13 = vadd.f32 %v2987_v29, %v2978_v26  ;;  %v2727_v43 = vmul.f32 %v6855_v34, %v2702_v25  ;;  %v2728_v46 = vmul.f32 %v6855_v34, %v2703_v56 }
 0x1b8   : > { %v3217_v28 = vadd.f32 %v3210_v7, %v3201_v50  ;;  %v3440_v30 = vadd.f32 %v3433_v21, %v3424_v45  ;;  %v2833_v54 = vrot.slane %v2808_v41, %v6873_v36  ;;  %v2840_v37 = vrot.slane %v2809_v14, %v6873_v36 }
 0x1b9   : > { %v2785_v27 = vadd.f32 %v6866_v42, %v2768_v63  ;;  %v3011_v39 = vadd.f32 %v6867_v3, %v2994_v13  ;;  %v3059_v11 = vrot.slane %v3034_v9, %v6873_v36  ;;  %v3066_v2 = vrot.slane %v3035_v55, %v6873_v36 }
 0x1ba   : > { %v3234_v8 = vadd.f32 %v6869_v59, %v3217_v28  ;;  %v3457_v16 = vadd.f32 %v6870_v20, %v3440_v30  ;;  %v2718_v34 = vadd.f32 %v2711_v53, %v6029_v24  ;;  %v2719_v41 = vadd.f32 %v2712_v38, %v6066_v62 }
 0x1bb   : > { %v2792_v33 = vmax.f32 %v2785_v27, 0.0  ;;  %v3018_v25 = vmax.f32 %v3011_v39, 0.0  ;;  %v2734_v19 = vadd.f32 %v2727_v43, %v6058_v61  ;;  %v2735_v48 = vadd.f32 %v2728_v46, %v6079_v4 }
 0x1bc   : > { %v3241_v56 = vmax.f32 %v3234_v8, 0.0  ;;  %v3464_v14 = vmax.f32 %v3457_v16, 0.0  ;;  %v6198_v27 = vrot.slane %v6121_v58, %v6873_v36  ;;  %v6202_v39 = vrot.slane %v6123_v1, %v6873_v36 }
 0x1bd   : > { %v2806_v26 = vcombine.low %v2792_v33, %v2793_v17  ;;  %v2807_v9 = vcombine.high %v2792_v33, %v2793_v17  ;;  %v3032_v29 = vcombine.low %v3018_v25, %v3019_v52  ;;  %v3033_v55 = vcombine.high %v3018_v25, %v3019_v52  ;;  %v3891_v25 = vld [vmem:[%s4410_s14 + $0x71] ss:$4 sm:$0x7f] }
 0x1be   : > { %v3255_v50 = vcombine.low %v3241_v56, %v3242_v51  ;;  %v3256_v7 = vcombine.high %v3241_v56, %v3242_v51  ;;  %v3478_v45 = vcombine.low %v3464_v14, %v3465_v40  ;;  %v3479_v21 = vcombine.high %v3464_v14, %v3465_v40 }
 0x1bf   : > { %v2819_v63 = vrot.slane %v2806_v26, %v6873_v36  ;;  %v2826_v24 = vrot.slane %v2807_v9, %v6873_v36  ;;  %v3045_v62 = vrot.slane %v3032_v29, %v6873_v36  ;;  %v3052_v13 = vrot.slane %v3033_v55, %v6873_v36 }
 0x1c0   : > { %v6185_v61 = vrot.slane %v3255_v50, %v6873_v36  ;;  %v6188_v4 = vrot.slane %v3256_v7, %v6873_v36  ;;  %v6191_v17 = vrot.slane %v3478_v45, %v6873_v36  ;;  %v6194_v52 = vrot.slane %v3479_v21, %v6873_v36 }
 0x1c1   : > { %v2869_v51 = vcombine.low %v2819_v63, %v2833_v54  ;;  %v2870_v40 = vcombine.high %v2819_v63, %v2833_v54  ;;  %v2871_v53 = vcombine.low %v2826_v24, %v2840_v37  ;;  %v2872_v38 = vcombine.high %v2826_v24, %v2840_v37 }
 0x1c2   : > { %v3095_v28 = vcombine.low %v3045_v62, %v3059_v11  ;;  %v3096_v30 = vcombine.high %v3045_v62, %v3059_v11  ;;  %v3097_v43 = vcombine.low %v3052_v13, %v3066_v2  ;;  %v3098_v46 = vcombine.high %v3052_v13, %v3066_v2 }
 0x1c3   : > { %v6206_v8 = vrot.slane %v6138_v10, %v6873_v36  ;;  %v6210_v54 = vrot.slane %v6140_v5, %v6873_v36  ;;  %v2741_v37 = vmax.f32 %v2718_v34, 0.0  ;;  %v2742_v11 = vmax.f32 %v2719_v41, 0.0  ;;  %v3892_v5 = vld [vmem:[%s4410_s14 + $0x8d] ss:$4 sm:$0x7f] }
 0x1c4   : > { %v2748_v16 = vmax.f32 %v2734_v19, 0.0  ;;  %v2749_v2 = vmax.f32 %v2735_v48, 0.0  ;;  %v3318_v58 = vcombine.low %v6185_v61, %v6198_v27  ;;  %v3319_v33 = vcombine.high %v6185_v61, %v6198_v27  ;;  %v3894_v10 = vld [vmem:[%s4410_s14 + $0xc5] ss:$4 sm:$0x7f] }
 0x1c5   : > { %v3320_v1 = vcombine.low %v6188_v4, %v6202_v39  ;;  %v6229_v56 = vrot.slane %v2869_v51, %v6873_v36  ;;  %v6232_v14 = vrot.slane %v2871_v53, %v6873_v36  ;;  %v6235_v19 = vrot.slane %v2870_v40, %v6873_v36 }
 0x1c6   : > { %v6238_v48 = vrot.slane %v2872_v38, %v6873_v36  ;;  %v6241_v26 = vrot.slane %v3095_v28, %v6873_v36  ;;  %v6244_v9 = vrot.slane %v3097_v43, %v6873_v36  ;;  %v6247_v29 = vrot.slane %v3096_v30, %v6873_v36 }
 0x1c7   : > { %v6250_v55 = vrot.slane %v3098_v46, %v6873_v36  ;;  %v2757_v50 = vmul.f32 %v6858_v44, %v2741_v37  ;;  %v2758_v7 = vmul.f32 %v6858_v44, %v2742_v11  ;;  %v2766_v45 = vmul.f32 %v6859_v35, %v2748_v16 }
 0x1c8   : > { %v2767_v21 = vmul.f32 %v6859_v35, %v2749_v2  ;;  %v2983_v63 = vmul.f32 %v6860_v6, %v2741_v37  ;;  %v2984_v24 = vmul.f32 %v6860_v6, %v2742_v11  ;;  %v2992_v62 = vmul.f32 %v6861_v22, %v2748_v16 }
 0x1c9   : > { %v2993_v13 = vmul.f32 %v6861_v22, %v2749_v2  ;;  %v2773_v51 = vadd.f32 %v2766_v45, %v2757_v50  ;;  %v3206_v53 = vmul.f32 %v6862_v23, %v2741_v37  ;;  %v3207_v38 = vmul.f32 %v6862_v23, %v2742_v11 }
 0x1ca   : > { %v2774_v40 = vadd.f32 %v2767_v21, %v2758_v7  ;;  %v2999_v28 = vadd.f32 %v2992_v62, %v2983_v63  ;;  %v3215_v30 = vmul.f32 %v6863_v32, %v2748_v16  ;;  %v3216_v35 = vmul.f32 %v6863_v32, %v2749_v2 }
 0x1cb   : > { %v3000_v44 = vadd.f32 %v2993_v13, %v2984_v24  ;;  %v2790_v43 = vadd.f32 %v6866_v42, %v2773_v51  ;;  %v6267_v46 = vmul.f32 %v6864_v18, %v2741_v37  ;;  %v6270_v22 = vmul.f32 %v6864_v18, %v2742_v11 }
 0x1cc   : > { %v2791_v6 = vadd.f32 %v6866_v42, %v2774_v40  ;;  %v3016_v50 = vadd.f32 %v6867_v3, %v2999_v28  ;;  %v3222_v7 = vadd.f32 %v3215_v30, %v3206_v53  ;;  %v3223_v45 = vadd.f32 %v3216_v35, %v3207_v38 }
 0x1cd   : > { %v3017_v23 = vadd.f32 %v6867_v3, %v3000_v44  ;;  %v2797_v21 = vmax.f32 %v2790_v43, 0.0  ;;  %v6275_v32 = vmul.f32 %v6865_v0, %v2748_v16  ;;  %v6278_v24 = vmul.f32 %v6865_v0, %v2749_v2 }
 0x1ce   : > { %v2798_v63 = vmax.f32 %v2791_v6, 0.0  ;;  %v3023_v42 = vmax.f32 %v3016_v50, 0.0  ;;  %v6281_v62 = vadd.f32 %v6869_v59, %v3222_v7  ;;  %v3240_v18 = vadd.f32 %v6869_v59, %v3223_v45 }
 0x1cf   : > { %v3024_v37 = vmax.f32 %v3017_v23, 0.0  ;;  %v2810_v3 = vcombine.low %v2796_v12, %v2797_v21  ;;  %v2811_v11 = vcombine.high %v2796_v12, %v2797_v21  ;;  %v6874_v51 = vlaneseq  ;;  %v2775_v23 = vld [vmem:[%s4410_s14] ss:$4 sm:$0x7f] }
 0x1d0   : > { %v2812_v13 = vcombine.high %v2798_v63, %v2798_v63  ;;  %v2861_v16 = vrot.slane %v2798_v63, %v6873_v36  ;;  %v3036_v2 = vcombine.low %v3022_v47, %v3023_v42  ;;  %v3037_v59 = vcombine.high %v3022_v47, %v3023_v42  ;;  %v3871_v42 = vld [vmem:[%s4410_s14 + $0x1c] ss:$4 sm:$0x7f] }
 0x1d1   : > { %vm6290_vm8 = vcmp.lt.s32.totalorder %v6874_v51, 784  ;;  %v3038_v40 = vcombine.high %v3024_v37, %v3024_v37  ;;  %v3087_v53 = vrot.slane %v3024_v37, %v6873_v36  ;;  %v2847_v49 = vrot.slane %v2810_v3, %v6873_v36  ;;  %v3872_v37 = vld [vmem:[%s4410_s14 + $0x38] ss:$4 sm:$0x7f] }
 0x1d2   : > { %v2854_v12 = vrot.slane %v2811_v11, %v6873_v36  ;;  %v2868_v38 = vrot.slane %v2812_v13, %v6873_v36  ;;  %v3246_v28 = vmax.f32 %v6281_v62, 0.0  ;;  %v3073_v44 = vrot.slane %v3036_v2, %v6873_v36  ;;  %v3873_v3 = vld [vmem:[%s4410_s14 + $0x54] ss:$4 sm:$0x7f] }
 0x1d3   : > { %v3080_v60 = vrot.slane %v3037_v59, %v6873_v36  ;;  %v3094_v47 = vrot.slane %v3038_v40, %v6873_v36  ;;  %v6306_v30 = vmax.f32 %v3240_v18, 0.0  ;;  %v2873_v35 = vcombine.low %v2847_v49, %v2861_v16  ;;  %v3874_v51 = vld [vmem:[%s4410_s14 + $0x70] ss:$4 sm:$0x7f] }
 0x1d4   : > { %v2874_v43 = vcombine.high %v2847_v49, %v2861_v16  ;;  %v2875_v6 = vcombine.low %v2854_v12, %v2868_v38  ;;  %v2876_v50 = vcombine.high %v2854_v12, %v2868_v38  ;;  %v3099_v7 = vcombine.low %v3073_v44, %v3087_v53  ;;  %v3876_v2 = vld [vmem:[%s4410_s14 + $0xa8] ss:$4 sm:$0x7f] }
 0x1d5   : > { %v3100_v45 = vcombine.high %v3073_v44, %v3087_v53  ;;  %v3101_v21 = vcombine.low %v3080_v60, %v3094_v47  ;;  %v3102_v63 = vcombine.high %v3080_v60, %v3094_v47  ;;  %v2911_v11 = vrot.slane %v2873_v35, %v6873_v36  ;;  %v3875_v12 = vld [vmem:[%s4410_s14 + $0x8c] ss:$4 sm:$0x7f] }
 0x1d6   : > { %v2918_v18 = vrot.slane %v2875_v6, %v6873_v36  ;;  %v2925_v13 = vrot.slane %v2874_v43, %v6873_v36  ;;  %v2932_v16 = vrot.slane %v2876_v50, %v6873_v36  ;;  %v3137_v59 = vrot.slane %v3099_v7, %v6873_v36  ;;  %v3877_v38 = vld [vmem:[%s4410_s14 + $0xc4] ss:$4 sm:$0x7f]  ;;  %v3887_v43 = vld [vmem:[%s4410_s14 + $0x1] ss:$4 sm:$0x7f] }
 0x1d7   : > { %v3144_v40 = vrot.slane %v3101_v21, %v6873_v36  ;;  %v3151_v53 = vrot.slane %v3100_v45, %v6873_v36  ;;  %v3158_v49 = vrot.slane %v3102_v63, %v6873_v36  ;;  %v2933_v44 = vcombine.low %v6229_v56, %v2911_v11  ;;  %v3888_v45 = vld [vmem:[%s4410_s14 + $0x1d] ss:$4 sm:$0x7f] }
 0x1d8   : > { %v2934_v60 = vcombine.high %v6229_v56, %v2911_v11  ;;  %v2935_v47 = vcombine.low %v6232_v14, %v2918_v18  ;;  %v2936_v35 = vcombine.high %v6232_v14, %v2918_v18  ;;  %v2937_v6 = vcombine.low %v6235_v19, %v2925_v13  ;;  %v3889_v14 = vld [vmem:[%s4410_s14 + $0x39] ss:$4 sm:$0x7f] }
 0x1d9   : > { %v2938_v50 = vcombine.high %v6235_v19, %v2925_v13  ;;  %v2939_v56 = vcombine.low %v6238_v48, %v2932_v16  ;;  %v2940_v7 = vcombine.high %v6238_v48, %v2932_v16  ;;  %v3890_v21 = vld [vmem:[%s4410_s14 + $0x55] ss:$4 sm:$0x7f]  ;;  %v2949_v63 = vadd.f32 %v2933_v44, %v2775_v23 }
 0x1da   : > { %v2951_v11 = vadd.f32 %v3872_v37, %v2934_v60  ;;  %v2953_v18 = vadd.f32 %v3874_v51, %v2935_v47  ;;  %v2955_v41 = vadd.f32 %v3876_v2, %v2936_v35  ;;  %v3893_v19 = vld [vmem:[%s4410_s14 + $0xa9] ss:$4 sm:$0x7f]  ;;  %v2950_v13 = vadd.f32 %v3871_v42, %v2937_v6 }
 0x1db   : > { %v2952_v34 = vadd.f32 %v3873_v3, %v2938_v50  ;;  %v2954_v48 = vadd.f32 %v3875_v12, %v2939_v56  ;;  %v2956_v16 = vadd.f32 %v3877_v38, %v2940_v7  ;;  %2961 = vst.msk [vmem:[%s6333_s21] ss:$4 sm:$0x7f] %vm6290_vm8, %v2949_v63  ;;  %v3159_v23 = vcombine.low %v6241_v26, %v3137_v59  ;;  %v3907_v50 = vld [vmem:[%s4410_s14 + $0x1e] ss:$4 sm:$0x7f] }
 0x1dc   : > { %3879 = vst.msk [vmem:[%s6333_s21 + $0x38] ss:$4 sm:$0x7f] %vm6290_vm8, %v2951_v11  ;;  %3881 = vst.msk [vmem:[%s6333_s21 + $0x70] ss:$4 sm:$0x7f] %vm6290_vm8, %v2953_v18  ;;  %v3160_v42 = vcombine.high %v6241_v26, %v3137_v59  ;;  %v3161_v37 = vcombine.low %v6244_v9, %v3144_v40  ;;  %v3162_v3 = vcombine.high %v6244_v9, %v3144_v40 }
 0x1dd   : > { %3883 = vst.msk [vmem:[%s6333_s21 + $0xa8] ss:$4 sm:$0x7f] %vm6290_vm8, %v2955_v41  ;;  %3878 = vst.msk [vmem:[%s6333_s21 + $0x1c] ss:$4 sm:$0x7f] %vm6290_vm8, %v2950_v13  ;;  %v3163_v41 = vcombine.low %v6247_v29, %v3151_v53  ;;  %v3164_v26 = vcombine.high %v6247_v29, %v3151_v53  ;;  %v3165_v9 = vcombine.low %v6250_v55, %v3158_v49 }
 0x1de   : > { %3880 = vst.msk [vmem:[%s6333_s21 + $0x54] ss:$4 sm:$0x7f] %vm6290_vm8, %v2952_v34  ;;  %3882 = vst.msk [vmem:[%s6333_s21 + $0x8c] ss:$4 sm:$0x7f] %vm6290_vm8, %v2954_v48  ;;  %v3166_v51 = vcombine.high %v6250_v55, %v3158_v49  ;;  %v3175_v2 = vadd.f32 %v3887_v43, %v3159_v23  ;;  %v3177_v34 = vadd.f32 %v3889_v14, %v3160_v42 }
 0x1df   : > { %3884 = vst.msk [vmem:[%s6333_s21 + $0xc4] ss:$4 sm:$0x7f] %vm6290_vm8, %v2956_v16  ;;  %v3179_v59 = vadd.f32 %v3891_v25, %v3161_v37  ;;  %v3181_v40 = vadd.f32 %v3893_v19, %v3162_v3  ;;  %v3176_v12 = vadd.f32 %v3888_v45, %v3163_v41  ;;  %v3178_v38 = vadd.f32 %v3890_v21, %v3164_v26  ;;  %v3906_v43 = vld [vmem:[%s4410_s14 + $0x2] ss:$4 sm:$0x7f] }
 0x1e0   : > { %v3180_v44 = vadd.f32 %v3892_v5, %v3165_v9  ;;  %v3182_v60 = vadd.f32 %v3894_v10, %v3166_v51  ;;  %3896 = vst.msk [vmem:[%s6333_s21 + $0x1] ss:$4 sm:$0x7f] %vm6290_vm8, %v3175_v2  ;;  %3898 = vst.msk [vmem:[%s6333_s21 + $0x39] ss:$4 sm:$0x7f] %vm6290_vm8, %v3177_v34  ;;  %v3259_v25 = vcombine.low %v3245_v31, %v3246_v28 }
 0x1e1   : > { %3900 = vst.msk [vmem:[%s6333_s21 + $0x71] ss:$4 sm:$0x7f] %vm6290_vm8, %v3179_v59  ;;  %3902 = vst.msk [vmem:[%s6333_s21 + $0xa9] ss:$4 sm:$0x7f] %vm6290_vm8, %v3181_v40  ;;  %v3260_v10 = vcombine.high %v3245_v31, %v3246_v28  ;;  %v3261_v5 = vcombine.high %v6306_v30, %v6306_v30  ;;  %v3445_v57 = vadd.f32 %v6275_v32, %v6267_v46 }
 0x1e2   : > { %v3468_v29 = vmax.f32 %v6154_v15, 0.0  ;;  %3897 = vst.msk [vmem:[%s6333_s21 + $0x1d] ss:$4 sm:$0x7f] %vm6290_vm8, %v3176_v12  ;;  %v3446_v31 = vadd.f32 %v6278_v24, %v6270_v22  ;;  %v3296_v15 = vrot.slane %v3259_v25, %v6873_v36  ;;  %v3310_v62 = vrot.slane %v6306_v30, %v6873_v36 }
 0x1e3   : > { %3899 = vst.msk [vmem:[%s6333_s21 + $0x55] ss:$4 sm:$0x7f] %vm6290_vm8, %v3178_v38  ;;  %3901 = vst.msk [vmem:[%s6333_s21 + $0x8d] ss:$4 sm:$0x7f] %vm6290_vm8, %v3180_v44  ;;  %v3303_v55 = vrot.slane %v3260_v10, %v6873_v36  ;;  %v3317_v28 = vrot.slane %v3261_v5, %v6873_v36  ;;  %v3332_v46 = vrot.slane %v3318_v58, %v6873_v36 }
 0x1e4   : > { %3903 = vst.msk [vmem:[%s6333_s21 + $0xc5] ss:$4 sm:$0x7f] %vm6290_vm8, %v3182_v60  ;;  %v3339_v22 = vrot.slane %v3320_v1, %v6873_v36  ;;  %v3462_v32 = vadd.f32 %v6870_v20, %v3445_v57  ;;  %v3463_v24 = vadd.f32 %v6870_v20, %v3446_v31  ;;  %v3322_v53 = vcombine.low %v3296_v15, %v3310_v62  ;;  %v3908_v56 = vld [vmem:[%s4410_s14 + $0x3a] ss:$4 sm:$0x7f] }
 0x1e5   : > { %v3323_v30 = vcombine.high %v3296_v15, %v3310_v62  ;;  %v3324_v49 = vcombine.low %v3303_v55, %v3317_v28  ;;  %v3325_v47 = vcombine.high %v3303_v55, %v3317_v28  ;;  %v3346_v58 = vrot.slane %v3319_v33, %v6873_v36  ;;  %v3909_v7 = vld [vmem:[%s4410_s14 + $0x56] ss:$4 sm:$0x7f] }
 0x1e6   : > { %v6878_v35 = vcombine.high %v6188_v4, %v6202_v39  ;;  %v3469_v20 = vmax.f32 %v3462_v32, 0.0  ;;  %v3470_v6 = vmax.f32 %v3463_v24, 0.0  ;;  %v3360_v45 = vrot.slane %v3322_v53, %v6873_v36  ;;  %v3910_v33 = vld [vmem:[%s4410_s14 + $0x72] ss:$4 sm:$0x7f] }
 0x1e7   : > { %v3367_v14 = vrot.slane %v3324_v49, %v6873_v36  ;;  %v3374_v61 = vrot.slane %v3323_v30, %v6873_v36  ;;  %v3381_v27 = vrot.slane %v3325_v47, %v6873_v36  ;;  %v3912_v21 = vld [vmem:[%s4410_s14 + $0xaa] ss:$4 sm:$0x7f]  ;;  %v6879_v25 = vcombine.low %v6191_v17, %v6206_v8  ;;  %v3925_v32 = vld [vmem:[%s4410_s14 + $0x3] ss:$4 sm:$0x7f] }
 0x1e8   : > { %v3353_v1 = vrot.slane %v6878_v35, %v6873_v36  ;;  %v3482_v4 = vcombine.low %v3468_v29, %v3469_v20  ;;  %v3483_v39 = vcombine.high %v3468_v29, %v3469_v20  ;;  %v3484_v63 = vcombine.high %v3470_v6, %v3470_v6  ;;  %v3911_v11 = vld [vmem:[%s4410_s14 + $0x8e] ss:$4 sm:$0x7f]  ;;  %v3926_v24 = vld [vmem:[%s4410_s14 + $0x1f] ss:$4 sm:$0x7f] }
 0x1e9   : > { %v3913_v18 = vld [vmem:[%s4410_s14 + $0xc6] ss:$4 sm:$0x7f]  ;;  %v3382_v19 = vcombine.low %v3332_v46, %v3360_v45  ;;  %v3383_v13 = vcombine.high %v3332_v46, %v3360_v45  ;;  %v3384_v48 = vcombine.low %v3339_v22, %v3367_v14  ;;  %v3385_v16 = vcombine.high %v3339_v22, %v3367_v14  ;;  %v3927_v53 = vld [vmem:[%s4410_s14 + $0x3b] ss:$4 sm:$0x7f] }
 0x1ea   : > { %v3386_v23 = vcombine.low %v3346_v58, %v3374_v61  ;;  %v3387_v42 = vcombine.high %v3346_v58, %v3374_v61  ;;  %v3388_v37 = vcombine.low %v3353_v1, %v3381_v27  ;;  %v3389_v3 = vcombine.high %v3353_v1, %v3381_v27  ;;  %v3928_v30 = vld [vmem:[%s4410_s14 + $0x57] ss:$4 sm:$0x7f] }
 0x1eb   : > { %v3398_v41 = vadd.f32 %v3906_v43, %v3382_v19  ;;  %v3400_v26 = vadd.f32 %v3908_v56, %v3383_v13  ;;  %v3402_v9 = vadd.f32 %v3910_v33, %v3384_v48  ;;  %v3404_v51 = vadd.f32 %v3912_v21, %v3385_v16  ;;  %v3929_v1 = vld [vmem:[%s4410_s14 + $0x73] ss:$4 sm:$0x7f] }
 0x1ec   : > { %v3399_v2 = vadd.f32 %v3907_v50, %v3386_v23  ;;  %v3401_v34 = vadd.f32 %v3909_v7, %v3387_v42  ;;  %v3403_v59 = vadd.f32 %v3911_v11, %v3388_v37  ;;  %v3405_v40 = vadd.f32 %v3913_v18, %v3389_v3  ;;  %v3932_v43 = vld [vmem:[%s4410_s14 + $0xc7] ss:$4 sm:$0x7f] }
 0x1ed   : > { %3915 = vst.msk [vmem:[%s6333_s21 + $0x2] ss:$4 sm:$0x7f] %vm6290_vm8, %v3398_v41  ;;  %3917 = vst.msk [vmem:[%s6333_s21 + $0x3a] ss:$4 sm:$0x7f] %vm6290_vm8, %v3400_v26  ;;  %v3519_v12 = vrot.slane %v3482_v4, %v6873_v36  ;;  %v3526_v38 = vrot.slane %v3483_v39, %v6873_v36  ;;  %v3533_v44 = vrot.slane %v3470_v6, %v6873_v36 }
 0x1ee   : > { %3919 = vst.msk [vmem:[%s6333_s21 + $0x72] ss:$4 sm:$0x7f] %vm6290_vm8, %v3402_v9  ;;  %3921 = vst.msk [vmem:[%s6333_s21 + $0xaa] ss:$4 sm:$0x7f] %vm6290_vm8, %v3404_v51  ;;  %v3540_v60 = vrot.slane %v3484_v63, %v6873_v36  ;;  %v3555_v10 = vrot.slane %v6879_v25, %v6873_v36  ;;  %v6880_v5 = vcombine.low %v6194_v52, %v6210_v54 }
 0x1ef   : > { %3916 = vst.msk [vmem:[%s6333_s21 + $0x1e] ss:$4 sm:$0x7f] %vm6290_vm8, %v3399_v2  ;;  %3918 = vst.msk [vmem:[%s6333_s21 + $0x56] ss:$4 sm:$0x7f] %vm6290_vm8, %v3401_v34  ;;  %v3545_v57 = vcombine.low %v3519_v12, %v3533_v44  ;;  %v3546_v31 = vcombine.high %v3519_v12, %v3533_v44  ;;  %v6881_v62 = vcombine.high %v6191_v17, %v6206_v8 }
 0x1f0   : > { %v3562_v29 = vrot.slane %v6880_v5, %v6873_v36  ;;  %3920 = vst.msk [vmem:[%s6333_s21 + $0x8e] ss:$4 sm:$0x7f] %vm6290_vm8, %v3403_v59  ;;  %3922 = vst.msk [vmem:[%s6333_s21 + $0xc6] ss:$4 sm:$0x7f] %vm6290_vm8, %v3405_v40  ;;  %v3547_v15 = vcombine.low %v3526_v38, %v3540_v60  ;;  %v3548_v55 = vcombine.high %v3526_v38, %v3540_v60 }
 0x1f1   : > { %v3569_v28 = vrot.slane %v6881_v62, %v6873_v36  ;;  %v6882_v46 = vcombine.high %v6194_v52, %v6210_v54  ;;  %v3583_v49 = vrot.slane %v3545_v57, %v6873_v36  ;;  %v3597_v58 = vrot.slane %v3546_v31, %v6873_v36  ;;  %v3931_v17 = vld [vmem:[%s4410_s14 + $0xab] ss:$4 sm:$0x7f] }
 0x1f2   : > { %v3590_v47 = vrot.slane %v3547_v15, %v6873_v36  ;;  %v3604_v35 = vrot.slane %v3548_v55, %v6873_v36  ;;  %v3930_v8 = vld [vmem:[%s4410_s14 + $0x8f] ss:$4 sm:$0x7f] }
 0x1f3   : > { %v3576_v22 = vrot.slane %v6882_v46, %v6873_v36  ;;  %v3605_v20 = vcombine.low %v3555_v10, %v3583_v49  ;;  %v3606_v52 = vcombine.high %v3555_v10, %v3583_v49  ;;  %v3609_v50 = vcombine.low %v3569_v28, %v3597_v58 }
 0x1f4   : > { %v3607_v54 = vcombine.low %v3562_v29, %v3590_v47  ;;  %v3608_v6 = vcombine.high %v3562_v29, %v3590_v47  ;;  %v3610_v56 = vcombine.high %v3569_v28, %v3597_v58 }
 0x1f5   : > { %v3611_v7 = vcombine.low %v3576_v22, %v3604_v35  ;;  %v3612_v45 = vcombine.high %v3576_v22, %v3604_v35  ;;  %v3621_v36 = vadd.f32 %v3925_v32, %v3605_v20  ;;  %v3623_v14 = vadd.f32 %v3927_v53, %v3606_v52 }
 0x1f6   : > { %v3625_v61 = vadd.f32 %v3929_v1, %v3607_v54  ;;  %v3627_v27 = vadd.f32 %v3931_v17, %v3608_v6  ;;  %v3622_v33 = vadd.f32 %v3926_v24, %v3609_v50  ;;  %v3624_v21 = vadd.f32 %v3928_v30, %v3610_v56 }
 0x1f7   : > { %v3626_v4 = vadd.f32 %v3930_v8, %v3611_v7  ;;  %v3628_v39 = vadd.f32 %v3932_v43, %v3612_v45  ;;  %3934 = vst.msk [vmem:[%s6333_s21 + $0x3] ss:$4 sm:$0x7f] %vm6290_vm8, %v3621_v36  ;;  %3936 = vst.msk [vmem:[%s6333_s21 + $0x3b] ss:$4 sm:$0x7f] %vm6290_vm8, %v3623_v14 }
 0x1f8   : > { %3938 = vst.msk [vmem:[%s6333_s21 + $0x73] ss:$4 sm:$0x7f] %vm6290_vm8, %v3625_v61  ;;  %3940 = vst.msk [vmem:[%s6333_s21 + $0xab] ss:$4 sm:$0x7f] %vm6290_vm8, %v3627_v27 }
 0x1f9   : > { %3935 = vst.msk [vmem:[%s6333_s21 + $0x1f] ss:$4 sm:$0x7f] %vm6290_vm8, %v3622_v33  ;;  %3937 = vst.msk [vmem:[%s6333_s21 + $0x57] ss:$4 sm:$0x7f] %vm6290_vm8, %v3624_v21 }
 0x1fa   : > { %3939 = vst.msk [vmem:[%s6333_s21 + $0x8f] ss:$4 sm:$0x7f] %vm6290_vm8, %v3626_v4  ;;  %3941 = vst.msk [vmem:[%s6333_s21 + $0xc7] ss:$4 sm:$0x7f] %vm6290_vm8, %v3628_v39 }
 0x1fb PF: > { %s25_s17 = sadd.s32 1, %s4143_s17  }
 0x1fc   : > { %p22_p12 = scmp.ge.s32.totalorder %s25_s17, 4  }
 0x1fe   :  { %24 = sbr.rel (!%p22_p12) target bundleno = 7 (0x7), region = 187 }
 0x203   :  { %3669 = vsyncpa [#allocation4], 1 }
 0x204   :  { %3671 = vsyncpa [#allocation4 + $0x1], 1 }
 0x205   :  { %3672 = vsyncpa [#allocation6], 1 }
 0x206   :  { %3673 = vsyncpa [#allocation9], 1 }
 0x207   :  { %3674 = vsyncpa [#allocation12], 1 }

</bundles_post_ra>
